<compile_context>
chip_gen: v6e
topology: v6e:2x2x1
jax: 0.10.0
libtpu: 0.0.40
codegen_flags: <defaults>
</compile_context>

<pallas_src>
import functools
import math

import jax
import jax.numpy as jnp
from jax import lax
from jax.experimental import pallas as pl
from jax.experimental.pallas import tpu as pltpu

EPS = 1e-5
LANE = 128
LPAD = 8        # left zero-pad columns of the conv1 scratch (sublane-aligned store)
M_TARGET = 512  # target conv2 matmul M-dim (TH_out * Wo)


def _bottleneck_kernel(*refs, TH_out, Wo, W, Cin, Mid_p, Cout_p, stride,
                       has_downsample):
    if has_downsample:
        (x_ref, w1_ref, b1_ref, w2_ref, b2_ref, w3_ref, b3_ref,
         wd_ref, bd_ref, out_ref, c1_ref) = refs
    else:
        (x_ref, w1_ref, b1_ref, w2_ref, b2_ref, w3_ref, b3_ref,
         out_ref, c1_ref) = refs
        wd_ref = bd_ref = None

    t = pl.program_id(1)
    th_in = TH_out * stride                 # input rows covered by this tile
    row0 = t * th_in                        # top of this tile's slab (halo coords)

    # ---- conv1 (1x1) + BN1 (folded) + ReLU, over the slab incl. 1-row halo --
    xs = x_ref[0, pl.ds(row0, th_in + 2), :, :]                  # (th_in+2, W, Cin)
    h1 = jnp.dot(xs.reshape((th_in + 2) * W, Cin), w1_ref[...],
                 preferred_element_type=jnp.float32)
    h1 = jnp.maximum(h1 + b1_ref[...], 0.0)
    c1_ref[:, LPAD:LPAD + W, :] = h1.reshape(th_in + 2, W, Mid_p).astype(c1_ref.dtype)

    # Zero only the 1-element borders of the scratch (never the whole buffer):
    # the two pad columns every step, and a halo row only when it falls
    # outside the image (first / last tile) -- otherwise it holds the
    # neighbour's real conv1 rows, recomputed from the x halo.
    zc = jnp.zeros((th_in + 2, 1, Mid_p), c1_ref.dtype)
    c1_ref[:, LPAD - 1:LPAD, :] = zc                 # left zero-pad column
    c1_ref[:, LPAD + W:LPAD + W + 1, :] = zc         # right zero-pad column
    zr = jnp.zeros((1, c1_ref.shape[1], Mid_p), c1_ref.dtype)

    @pl.when(t == 0)
    def _():                                         # top halo row = image padding
        c1_ref[0:1, :, :] = zr

    @pl.when(t == pl.num_programs(1) - 1)
    def _():                                         # bottom halo row = image padding
        c1_ref[th_in + 1:th_in + 2, :, :] = zr

    # ---- conv2 (3x3, stride) + BN2 + ReLU ------------------------------------
    # Nine (M, Mid) x (Mid, Mid) matmuls accumulating straight into acc; no
    # (M, 3*Mid) operand concatenation (saves vst/vld traffic + VMEM copies).
    acc = jnp.zeros((TH_out * Wo, Mid_p), jnp.float32)
    for dy in range(3):
        for dx in range(3):
            col0 = LPAD - 1 + dx
            if stride == 1:
                win = c1_ref[dy:dy + TH_out, col0:col0 + Wo, :]
            else:
                # Strided window read: conv2 is evaluated only at the output
                # positions (no full-resolution compute + subsample).
                win = c1_ref[pl.ds(dy, TH_out, stride=stride),
                             pl.ds(col0, Wo, stride=stride), :]
            acc = acc + jnp.dot(win.reshape(TH_out * Wo, Mid_p), w2_ref[dy, dx],
                                preferred_element_type=jnp.float32)
    h2 = jnp.maximum(acc + b2_ref[...], 0.0)

    # ---- conv3 (1x1) + BN3 ----------------------------------------------------
    h3 = jnp.dot(h2.astype(w3_ref.dtype), w3_ref[...],
                 preferred_element_type=jnp.float32) + b3_ref[...]

    # ---- identity / downsample -------------------------------------------------
    if stride == 1:
        xi = x_ref[0, pl.ds(row0 + 1, TH_out), :, :]             # (TH_out, Wo, Cin)
    else:
        xi = x_ref[0, pl.ds(row0 + 1, TH_out, stride=stride),
                   pl.ds(0, Wo, stride=stride), :]
    xi2d = xi.reshape(TH_out * Wo, Cin)
    if has_downsample:
        idn = jnp.dot(xi2d, wd_ref[...],
                      preferred_element_type=jnp.float32) + bd_ref[...]
    else:
        # wrapper guarantees Cin == Cout == Cout_p on this path
        idn = xi2d.astype(jnp.float32)

    out = jnp.maximum(h3 + idn, 0.0)
    out_ref[...] = out.reshape(1, TH_out, Wo, Cout_p).astype(out_ref.dtype)


# ------------------------------ wrapper helpers --------------------------------
def _fold_bn(bn):
    gamma, beta, mean, var = bn
    scale = gamma / jnp.sqrt(var + EPS)
    return scale.astype(jnp.float32), (beta - mean * scale).astype(jnp.float32)


def _pad_lanes(c):
    return ((c + LANE - 1) // LANE) * LANE


def _physical_vmem_bytes():
    """Generation-aware physical VMEM size (fallback: conservative 64 MiB)."""
    try:
        info = pltpu.get_tpu_info()
        v = getattr(info, "vmem_capacity_bytes", None)
        if v:
            return int(v)
    except Exception:
        pass
    return 64 * 1024 * 1024


def _spec(block_shape, index_map, buffer_count=None):
    """BlockSpec with an optional buffer-count hint (single-buffer constants)."""
    if buffer_count is not None and hasattr(pl, "Buffered"):
        try:
            return pl.BlockSpec(block_shape, index_map,
                                pipeline_mode=pl.Buffered(buffer_count))
        except TypeError:
            pass
    return pl.BlockSpec(block_shape, index_map)


# ------------------------------ public wrappers --------------------------------
def bottleneck_forward_nhwc(x_nhwc, params, stride=1, compute_dtype=jnp.bfloat16,
                            row_tile=None, keep_padded_channels=False):
    """BottleneckBlock forward in NHWC.  x: (N, H, W, Cin) -> (N, Ho, Wo, Cout) f32.

    compute_dtype: dtype of the MXU operands (bfloat16 default = fast path on
    v5e/v6e/v7x); accumulation, bias-add, ReLU and the residual add are f32.
    """
    N, H, W, Cin = x_nhwc.shape
    Cout = params["w3"].shape[0]
    Mid = Cout // 4
    has_ds = "wd" in params
    if not has_ds:
        assert stride == 1 and Cin == Cout, (
            "identity residual requires stride == 1 and in_channels == out_channels")
    assert H % stride == 0 and W % stride == 0, "H, W must be divisible by stride"
    Ho, Wo = H // stride, W // stride
    assert W % 8 == 0 and Wo % 8 == 0, (
        "kernel assumes width (and output width) is a multiple of 8 so the "
        "in-kernel reshapes stay layout-free")

    Mid_p, Cout_p = _pad_lanes(Mid), _pad_lanes(Cout)
    item = jnp.dtype(compute_dtype).itemsize
    # route the identity residual through an exact eye-matmul when Cout is not
    # a lane multiple, so the kernel's Cout_p-padded output path stays uniform
    use_ds_matmul = has_ds or (Cout_p != Cout)

    # ---- fold BN into conv weights; pad mid/out channel dims to lanes --------
    s1, b1 = _fold_bn(params["bn1"])
    s2, b2 = _fold_bn(params["bn2"])
    s3, b3 = _fold_bn(params["bn3"])

    def pad2(a, r, c):
        return jnp.zeros((r, c), jnp.float32).at[:a.shape[0], :a.shape[1]].set(a)

    def pad_bias(b, c):
        return jnp.zeros((1, c), jnp.float32).at[0, :b.shape[0]].set(b)

    w1 = pad2(jnp.transpose(params["w1"][:, :, 0, 0] * s1[:, None], (1, 0)),
              Cin, Mid_p).astype(compute_dtype)                       # (Cin, Mid_p)
    w3 = pad2(jnp.transpose(params["w3"][:, :, 0, 0] * s3[:, None], (1, 0)),
              Mid_p, Cout_p).astype(compute_dtype)                    # (Mid_p, Cout_p)
    w2 = jnp.transpose(params["w2"] * s2[:, None, None, None], (2, 3, 1, 0))  # (dy,dx,ci,co)
    w2 = (jnp.zeros((3, 3, Mid_p, Mid_p), jnp.float32)
          .at[:, :, :Mid, :Mid].set(w2).astype(compute_dtype))        # (3,3,Mid_p,Mid_p)
    b1p, b2p, b3p = pad_bias(b1, Mid_p), pad_bias(b2, Mid_p), pad_bias(b3, Cout_p)

    in_arrays = [None, w1, b1p, w2, b2p, w3, b3p]    # x filled in below
    if use_ds_matmul:
        if has_ds:
            sd, bd = _fold_bn(params["bnd"])
            wd = pad2(jnp.transpose(params["wd"][:, :, 0, 0] * sd[:, None], (1, 0)),
                      Cin, Cout_p).astype(compute_dtype)              # (Cin, Cout_p)
            bdp = pad_bias(bd, Cout_p)
        else:
            wd = pad2(jnp.eye(Cin, dtype=jnp.float32), Cin, Cout_p).astype(compute_dtype)
            bdp = jnp.zeros((1, Cout_p), jnp.float32)
        in_arrays += [wd, bdp]

    weight_bytes = sum(int(a.size) * jnp.dtype(a.dtype).itemsize
                       for a in in_arrays[1:])

    # ---- input: NHWC, 1-row zero halo, TRUE channel count (no lane pad) ------
    x = jnp.pad(x_nhwc.astype(compute_dtype), ((0, 0), (1, 1), (0, 0), (0, 0)))
    in_arrays[0] = x
    x_block_bytes = (H + 2) * W * Cin * item

    # ---- row-tile selection: conv2 M ~ M_TARGET, megacore & VMEM aware -------
    phys_vmem = _physical_vmem_bytes()
    vmem_cap = (phys_vmem * 3) // 4               # headroom for Mosaic internals

    def tile_bytes(d):
        th = d * stride
        return (2 * d * Wo * Cout_p * 4                        # out block (x2 buffers)
                + (th + 2) * (LPAD + W + 1) * Mid_p * item     # c1 halo scratch
                + (th + 2) * W * Mid_p * 4                     # conv1 activation value
                + 6 * d * Wo * Mid_p * 4)                      # conv2/conv3 temporaries

    tile_budget = max(vmem_cap - 2 * x_block_bytes - weight_bytes, 2 * 1024 * 1024)
    if row_tile is None:
        divs = sorted((d for d in range(1, Ho + 1) if Ho % d == 0), reverse=True)
        TH_out = 1
        for min_steps in (2, 1):                  # prefer >= 2 grid steps (megacore)
            ok = [d for d in divs
                  if d * Wo <= M_TARGET and (Ho // d) * N >= min_steps
                  and tile_bytes(d) <= tile_budget]
            if ok:
                TH_out = ok[0]
                break
    else:
        assert Ho % row_tile == 0
        TH_out = row_tile
    T = Ho // TH_out
    th_in = TH_out * stride

    # ---- specs ----------------------------------------------------------------
    # x is reused across the row-tile axis -> single buffer when T > 1; the
    # constant weights/biases are always single-buffered.
    in_specs = [_spec((1, H + 2, W, Cin), lambda b, t: (b, 0, 0, 0),
                      buffer_count=1 if T > 1 else None)]
    for a in in_arrays[1:]:
        in_specs.append(_spec(a.shape, lambda b, t, _nd=a.ndim: (0,) * _nd,
                              buffer_count=1))

    kernel = functools.partial(
        _bottleneck_kernel, TH_out=TH_out, Wo=Wo, W=W, Cin=Cin, Mid_p=Mid_p,
        Cout_p=Cout_p, stride=stride, has_downsample=use_ds_matmul)

    # advisory cost estimate (helps XLA schedule around the custom call)
    flops = 2 * N * (H * W * Cin * Mid_p
                     + Ho * Wo * 9 * Mid_p * Mid_p
                     + Ho * Wo * Mid_p * Cout_p
                     + (Ho * Wo * Cin * Cout_p if use_ds_matmul else 0))
    bytes_accessed = int(x.size) * item + N * Ho * Wo * Cout_p * 4 + weight_bytes
    cost = pl.CostEstimate(flops=int(flops), transcendentals=0,
                           bytes_accessed=int(bytes_accessed))

    x_bufs = 1 if T > 1 else 2
    vmem_est = x_bufs * x_block_bytes + weight_bytes + tile_bytes(TH_out)
    vmem_limit = int(min(vmem_cap, max(32 * 1024 * 1024, 2 * vmem_est)))

    out = pl.pallas_call(
        kernel,
        out_shape=jax.ShapeDtypeStruct((N, Ho, Wo, Cout_p), jnp.float32),
        grid=(N, T),
        in_specs=in_specs,
        out_specs=pl.BlockSpec((1, TH_out, Wo, Cout_p), lambda b, t: (b, t, 0, 0)),
        scratch_shapes=[pltpu.VMEM((th_in + 2, LPAD + W + 1, Mid_p), compute_dtype)],
        compiler_params=pltpu.CompilerParams(
            dimension_semantics=("parallel", "parallel"),
            vmem_limit_bytes=vmem_limit),
        cost_estimate=cost,
    )(*in_arrays)

    if keep_padded_channels or Cout_p == Cout:
        return out
    return out[:, :, :, :Cout]


def bottleneck_forward(x_nchw, params, stride=1, compute_dtype=jnp.bfloat16,
                       row_tile=None):
    """PyTorch-layout wrapper: (N, Cin, H, W) f32 -> (N, Cout, Ho, Wo) f32."""
    x_nhwc = jnp.transpose(x_nchw, (0, 2, 3, 1))
    y = bottleneck_forward_nhwc(x_nhwc, params, stride=stride,
                                compute_dtype=compute_dtype, row_tile=row_tile)
    return jnp.transpose(y, (0, 3, 1, 2))


# ----------------------------- parameter init ---------------------------------
def init_params(key, in_channels, out_channels, stride):
    mid = out_channels // 4
    ks = jax.random.split(key, 8)

    def conv_w(k, co, ci, kh, kw):
        bound = 1.0 / math.sqrt(ci * kh * kw)
        return jax.random.uniform(k, (co, ci, kh, kw), jnp.float32, -bound, bound)

    def bn(k, c):
        k1, k2, k3, k4 = jax.random.split(k, 4)
        gamma = 1.0 + 0.1 * jax.random.normal(k1, (c,), jnp.float32)
        beta = 0.1 * jax.random.normal(k2, (c,), jnp.float32)
        mean = 0.1 * jax.random.normal(k3, (c,), jnp.float32)
        var = jax.random.uniform(k4, (c,), jnp.float32, 0.5, 1.5)
        return gamma, beta, mean, var

    p = {
        "w1": conv_w(ks[0], mid, in_channels, 1, 1), "bn1": bn(ks[1], mid),
        "w2": conv_w(ks[2], mid, mid, 3, 3),         "bn2": bn(ks[3], mid),
        "w3": conv_w(ks[4], out_channels, mid, 1, 1), "bn3": bn(ks[5], out_channels),
    }
    if stride != 1 or in_channels != out_channels:
        p["wd"] = conv_w(ks[6], out_channels, in_channels, 1, 1)
        p["bnd"] = bn(ks[7], out_channels)
    return p


# ----------------------------- pure-JAX reference ------------------------------
def reference_forward(x_nhwc, params, stride):
    def conv(x, w_torch, s=1, pad=0):
        w = jnp.transpose(w_torch, (2, 3, 1, 0))                         # HWIO
        return lax.conv_general_dilated(x, w, (s, s), [(pad, pad), (pad, pad)],
                                        dimension_numbers=("NHWC", "HWIO", "NHWC"))

    def bn(x, p):
        g, b, m, v = p
        return (x - m) / jnp.sqrt(v + EPS) * g + b

    out = jax.nn.relu(bn(conv(x_nhwc, params["w1"]), params["bn1"]))
    out = jax.nn.relu(bn(conv(out, params["w2"], stride, 1), params["bn2"]))
    out = bn(conv(out, params["w3"]), params["bn3"])
    if "wd" in params:
        identity = bn(conv(x_nhwc, params["wd"], stride), params["bnd"])
    else:
        identity = x_nhwc
    return jax.nn.relu(out + identity)


if __name__ == "__main__":
    key = jax.random.PRNGKey(0)
    kx, kp, kx2, kp2 = jax.random.split(key, 4)

    # config 1: Cin != Cout -> downsample branch active, stride 1, f32 MXU
    N, Cin, H, W, Cout, stride = 2, 4, 16, 16, 16, 1
    x = jax.random.normal(kx, (N, Cin, H, W), jnp.float32)
    params = init_params(kp, Cin, Cout, stride)
    y = jax.block_until_ready(
        bottleneck_forward(x, params, stride, compute_dtype=jnp.float32))
    y_ref = jnp.transpose(
        reference_forward(jnp.transpose(x, (0, 2, 3, 1)), params, stride), (0, 3, 1, 2))
    assert y.shape == (N, Cout, H // stride, W // stride)
    assert jnp.allclose(y, y_ref, atol=5e-3, rtol=5e-3), "mismatch (downsample, f32)"

    # config 2: Cin == Cout, stride 1 -> identity residual (eye-matmul path), f32
    Cin2 = Cout2 = 16
    x2 = jax.random.normal(kx2, (N, Cin2, H, W), jnp.float32)
    params2 = init_params(kp2, Cin2, Cout2, 1)
    y2 = jax.block_until_ready(
        bottleneck_forward(x2, params2, 1, compute_dtype=jnp.float32))
    y2_ref = jnp.transpose(
        reference_forward(jnp.transpose(x2, (0, 2, 3, 1)), params2, 1), (0, 3, 1, 2))
    assert jnp.allclose(y2, y2_ref, atol=5e-3, rtol=5e-3), "mismatch (identity, f32)"

    # config 3: same as config 1 with the default bfloat16 MXU operands
    # (v5e/v6e/v7x fast path), f32 accumulation / element-wise math.
    y3 = jax.block_until_ready(bottleneck_forward(x, params, stride))
    assert jnp.allclose(y3, y_ref, atol=5e-2, rtol=5e-2), "mismatch (downsample, bf16)"

    print("KERNEL_OK")
</pallas_src>

<mosaic_0001>
module attributes {stable_mosaic.version = 11 : i64} {
  func.func @_bottleneck_kernel(%arg0: i32, %arg1: i32, %arg2: memref<1x18x16x4xf32, #tpu.memory_space<vmem>>, %arg3: memref<4x128xf32, #tpu.memory_space<vmem>>, %arg4: memref<1x128xf32, #tpu.memory_space<vmem>>, %arg5: memref<3x3x128x128xf32, #tpu.memory_space<vmem>>, %arg6: memref<1x128xf32, #tpu.memory_space<vmem>>, %arg7: memref<128x128xf32, #tpu.memory_space<vmem>>, %arg8: memref<1x128xf32, #tpu.memory_space<vmem>>, %arg9: memref<4x128xf32, #tpu.memory_space<vmem>>, %arg10: memref<1x128xf32, #tpu.memory_space<vmem>>, %arg11: memref<1x16x16x128xf32, #tpu.memory_space<vmem>>, %arg12: memref<18x25x128xf32, #tpu.memory_space<vmem>>) attributes {dimension_semantics = [#tpu.dimension_semantics<parallel>, #tpu.dimension_semantics<parallel>], iteration_bounds = array<i64: 2, 1>, scalar_prefetch = 0 : i64, scratch_operands = 1 : i64, tpu.core_type = #tpu.core_type<tc>, window_params = [{transform_indices = @transform_0, window_bounds = array<i64: 1, 18, 16, 4>}, {pipeline_mode = #tpu.pipeline_mode<synchronous>, transform_indices = @transform_1, window_bounds = array<i64: 4, 128>}, {pipeline_mode = #tpu.pipeline_mode<synchronous>, transform_indices = @transform_2, window_bounds = array<i64: 1, 128>}, {pipeline_mode = #tpu.pipeline_mode<synchronous>, transform_indices = @transform_3, window_bounds = array<i64: 3, 3, 128, 128>}, {pipeline_mode = #tpu.pipeline_mode<synchronous>, transform_indices = @transform_4, window_bounds = array<i64: 1, 128>}, {pipeline_mode = #tpu.pipeline_mode<synchronous>, transform_indices = @transform_5, window_bounds = array<i64: 128, 128>}, {pipeline_mode = #tpu.pipeline_mode<synchronous>, transform_indices = @transform_6, window_bounds = array<i64: 1, 128>}, {pipeline_mode = #tpu.pipeline_mode<synchronous>, transform_indices = @transform_7, window_bounds = array<i64: 4, 128>}, {pipeline_mode = #tpu.pipeline_mode<synchronous>, transform_indices = @transform_8, window_bounds = array<i64: 1, 128>}, {transform_indices = @transform_9, window_bounds = array<i64: 1, 16, 16, 128>}]} {
    %c16_i32 = arith.constant 16 : i32
    %0 = arith.muli %arg1, %c16_i32 : i32
    %c0 = arith.constant 0 : index
    %1 = arith.index_cast %0 : i32 to index
    %c0_0 = arith.constant 0 : index
    %c0_1 = arith.constant 0 : index
    %2 = vector.load %arg2[%c0, %1, %c0_0, %c0_1] : memref<1x18x16x4xf32, #tpu.memory_space<vmem>>, vector<1x18x16x4xf32>
    %3 = vector.shape_cast %2 : vector<1x18x16x4xf32> to vector<18x16x4xf32>
    %4 = vector.shape_cast %3 : vector<18x16x4xf32> to vector<288x4xf32>
    %c0_2 = arith.constant 0 : index
    %c0_3 = arith.constant 0 : index
    %5 = vector.load %arg3[%c0_2, %c0_3] : memref<4x128xf32, #tpu.memory_space<vmem>>, vector<4x128xf32>
    %cst = arith.constant dense<0.000000e+00> : vector<288x128xf32>
    %6 = tpu.matmul %4, %5, %cst {dimension_numbers = #tpu.dot_dimension_numbers<[1], [0], [0], [1], [0, 0, 1, 1], [], []>} : vector<288x4xf32>, vector<4x128xf32>, vector<288x128xf32> -> vector<288x128xf32>
    %c0_4 = arith.constant 0 : index
    %c0_5 = arith.constant 0 : index
    %7 = vector.load %arg4[%c0_4, %c0_5] : memref<1x128xf32, #tpu.memory_space<vmem>>, vector<1x128xf32>
    %8 = vector.broadcast %7 : vector<1x128xf32> to vector<288x128xf32>
    %9 = arith.addf %6, %8 : vector<288x128xf32>
    %cst_6 = arith.constant 0.000000e+00 : f32
    %10 = vector.broadcast %cst_6 : f32 to vector<288x128xf32>
    %11 = arith.maximumf %9, %10 : vector<288x128xf32>
    %12 = vector.shape_cast %11 : vector<288x128xf32> to vector<18x16x128xf32>
    %c0_7 = arith.constant 0 : index
    %c8 = arith.constant 8 : index
    %c0_8 = arith.constant 0 : index
    %13 = vector.load %arg12[%c0_7, %c8, %c0_8] : memref<18x25x128xf32, #tpu.memory_space<vmem>>, vector<18x16x128xf32>
    tpu.vector_store %arg12[%c0_7, %c8, %c0_8], %12 {strides = array<i32>} : memref<18x25x128xf32, #tpu.memory_space<vmem>>, vector<18x16x128xf32>,
    %cst_9 = arith.constant 0.000000e+00 : f32
    %14 = vector.broadcast %cst_9 : f32 to vector<18x1x128xf32>
    %c0_10 = arith.constant 0 : index
    %c7 = arith.constant 7 : index
    %c0_11 = arith.constant 0 : index
    %15 = vector.load %arg12[%c0_10, %c7, %c0_11] : memref<18x25x128xf32, #tpu.memory_space<vmem>>, vector<18x1x128xf32>
    tpu.vector_store %arg12[%c0_10, %c7, %c0_11], %14 {strides = array<i32>} : memref<18x25x128xf32, #tpu.memory_space<vmem>>, vector<18x1x128xf32>,
    %c0_12 = arith.constant 0 : index
    %c24 = arith.constant 24 : index
    %c0_13 = arith.constant 0 : index
    %16 = vector.load %arg12[%c0_12, %c24, %c0_13] : memref<18x25x128xf32, #tpu.memory_space<vmem>>, vector<18x1x128xf32>
    tpu.vector_store %arg12[%c0_12, %c24, %c0_13], %14 {strides = array<i32>} : memref<18x25x128xf32, #tpu.memory_space<vmem>>, vector<18x1x128xf32>,
    %cst_14 = arith.constant 0.000000e+00 : f32
    %17 = vector.broadcast %cst_14 : f32 to vector<1x25x128xf32>
    %c0_i32 = arith.constant 0 : i32
    %18 = arith.cmpi eq, %arg1, %c0_i32 : i32
    %19 = arith.extui %18 : i1 to i32
    %c0_i32_15 = arith.constant 0 : i32
    %20 = arith.cmpi ne, %19, %c0_i32_15 : i32
    scf.if %20 {
      %c0_109 = arith.constant 0 : index
      %c0_110 = arith.constant 0 : index
      %c0_111 = arith.constant 0 : index
      %104 = vector.load %arg12[%c0_109, %c0_110, %c0_111] : memref<18x25x128xf32, #tpu.memory_space<vmem>>, vector<1x25x128xf32>
      tpu.vector_store %arg12[%c0_109, %c0_110, %c0_111], %17 {strides = array<i32>} : memref<18x25x128xf32, #tpu.memory_space<vmem>>, vector<1x25x128xf32>,
    } else {
    }
    %c0_i32_16 = arith.constant 0 : i32
    %21 = arith.cmpi eq, %arg1, %c0_i32_16 : i32
    %22 = arith.extui %21 : i1 to i32
    %c0_i32_17 = arith.constant 0 : i32
    %23 = arith.cmpi ne, %22, %c0_i32_17 : i32
    scf.if %23 {
      %c17 = arith.constant 17 : index
      %c0_109 = arith.constant 0 : index
      %c0_110 = arith.constant 0 : index
      %104 = vector.load %arg12[%c17, %c0_109, %c0_110] : memref<18x25x128xf32, #tpu.memory_space<vmem>>, vector<1x25x128xf32>
      tpu.vector_store %arg12[%c17, %c0_109, %c0_110], %17 {strides = array<i32>} : memref<18x25x128xf32, #tpu.memory_space<vmem>>, vector<1x25x128xf32>,
    } else {
    }
    %cst_18 = arith.constant 0.000000e+00 : f32
    %24 = vector.broadcast %cst_18 : f32 to vector<256x128xf32>
    %c0_19 = arith.constant 0 : index
    %c7_20 = arith.constant 7 : index
    %c0_21 = arith.constant 0 : index
    %25 = vector.load %arg12[%c0_19, %c7_20, %c0_21] : memref<18x25x128xf32, #tpu.memory_space<vmem>>, vector<16x16x128xf32>
    %26 = vector.shape_cast %25 : vector<16x16x128xf32> to vector<256x128xf32>
    %c0_22 = arith.constant 0 : index
    %c0_23 = arith.constant 0 : index
    %c0_24 = arith.constant 0 : index
    %c0_25 = arith.constant 0 : index
    %27 = vector.load %arg5[%c0_22, %c0_23, %c0_24, %c0_25] : memref<3x3x128x128xf32, #tpu.memory_space<vmem>>, vector<1x1x128x128xf32>
    %28 = vector.shape_cast %27 : vector<1x1x128x128xf32> to vector<128x128xf32>
    %cst_26 = arith.constant dense<0.000000e+00> : vector<256x128xf32>
    %29 = tpu.matmul %26, %28, %cst_26 {dimension_numbers = #tpu.dot_dimension_numbers<[1], [0], [0], [1], [0, 0, 1, 1], [], []>} : vector<256x128xf32>, vector<128x128xf32>, vector<256x128xf32> -> vector<256x128xf32>
    %30 = arith.addf %24, %29 : vector<256x128xf32>
    %c0_27 = arith.constant 0 : index
    %c8_28 = arith.constant 8 : index
    %c0_29 = arith.constant 0 : index
    %31 = vector.load %arg12[%c0_27, %c8_28, %c0_29] : memref<18x25x128xf32, #tpu.memory_space<vmem>>, vector<16x16x128xf32>
    %32 = vector.shape_cast %31 : vector<16x16x128xf32> to vector<256x128xf32>
    %c0_30 = arith.constant 0 : index
    %c1 = arith.constant 1 : index
    %c0_31 = arith.constant 0 : index
    %c0_32 = arith.constant 0 : index
    %33 = vector.load %arg5[%c0_30, %c1, %c0_31, %c0_32] : memref<3x3x128x128xf32, #tpu.memory_space<vmem>>, vector<1x1x128x128xf32>
    %34 = vector.shape_cast %33 : vector<1x1x128x128xf32> to vector<128x128xf32>
    %cst_33 = arith.constant dense<0.000000e+00> : vector<256x128xf32>
    %35 = tpu.matmul %32, %34, %cst_33 {dimension_numbers = #tpu.dot_dimension_numbers<[1], [0], [0], [1], [0, 0, 1, 1], [], []>} : vector<256x128xf32>, vector<128x128xf32>, vector<256x128xf32> -> vector<256x128xf32>
    %36 = arith.addf %30, %35 : vector<256x128xf32>
    %c0_34 = arith.constant 0 : index
    %c9 = arith.constant 9 : index
    %c0_35 = arith.constant 0 : index
    %37 = vector.load %arg12[%c0_34, %c9, %c0_35] : memref<18x25x128xf32, #tpu.memory_space<vmem>>, vector<16x16x128xf32>
    %38 = vector.shape_cast %37 : vector<16x16x128xf32> to vector<256x128xf32>
    %c0_36 = arith.constant 0 : index
    %c2 = arith.constant 2 : index
    %c0_37 = arith.constant 0 : index
    %c0_38 = arith.constant 0 : index
    %39 = vector.load %arg5[%c0_36, %c2, %c0_37, %c0_38] : memref<3x3x128x128xf32, #tpu.memory_space<vmem>>, vector<1x1x128x128xf32>
    %40 = vector.shape_cast %39 : vector<1x1x128x128xf32> to vector<128x128xf32>
    %cst_39 = arith.constant dense<0.000000e+00> : vector<256x128xf32>
    %41 = tpu.matmul %38, %40, %cst_39 {dimension_numbers = #tpu.dot_dimension_numbers<[1], [0], [0], [1], [0, 0, 1, 1], [], []>} : vector<256x128xf32>, vector<128x128xf32>, vector<256x128xf32> -> vector<256x128xf32>
    %42 = arith.addf %36, %41 : vector<256x128xf32>
    %c1_40 = arith.constant 1 : index
    %c7_41 = arith.constant 7 : index
    %c0_42 = arith.constant 0 : index
    %43 = vector.load %arg12[%c1_40, %c7_41, %c0_42] : memref<18x25x128xf32, #tpu.memory_space<vmem>>, vector<16x16x128xf32>
    %44 = vector.shape_cast %43 : vector<16x16x128xf32> to vector<256x128xf32>
    %c1_43 = arith.constant 1 : index
    %c0_44 = arith.constant 0 : index
    %c0_45 = arith.constant 0 : index
    %c0_46 = arith.constant 0 : index
    %45 = vector.load %arg5[%c1_43, %c0_44, %c0_45, %c0_46] : memref<3x3x128x128xf32, #tpu.memory_space<vmem>>, vector<1x1x128x128xf32>
    %46 = vector.shape_cast %45 : vector<1x1x128x128xf32> to vector<128x128xf32>
    %cst_47 = arith.constant dense<0.000000e+00> : vector<256x128xf32>
    %47 = tpu.matmul %44, %46, %cst_47 {dimension_numbers = #tpu.dot_dimension_numbers<[1], [0], [0], [1], [0, 0, 1, 1], [], []>} : vector<256x128xf32>, vector<128x128xf32>, vector<256x128xf32> -> vector<256x128xf32>
    %48 = arith.addf %42, %47 : vector<256x128xf32>
    %c1_48 = arith.constant 1 : index
    %c8_49 = arith.constant 8 : index
    %c0_50 = arith.constant 0 : index
    %49 = vector.load %arg12[%c1_48, %c8_49, %c0_50] : memref<18x25x128xf32, #tpu.memory_space<vmem>>, vector<16x16x128xf32>
    %50 = vector.shape_cast %49 : vector<16x16x128xf32> to vector<256x128xf32>
    %c1_51 = arith.constant 1 : index
    %c1_52 = arith.constant 1 : index
    %c0_53 = arith.constant 0 : index
    %c0_54 = arith.constant 0 : index
    %51 = vector.load %arg5[%c1_51, %c1_52, %c0_53, %c0_54] : memref<3x3x128x128xf32, #tpu.memory_space<vmem>>, vector<1x1x128x128xf32>
    %52 = vector.shape_cast %51 : vector<1x1x128x128xf32> to vector<128x128xf32>
    %cst_55 = arith.constant dense<0.000000e+00> : vector<256x128xf32>
    %53 = tpu.matmul %50, %52, %cst_55 {dimension_numbers = #tpu.dot_dimension_numbers<[1], [0], [0], [1], [0, 0, 1, 1], [], []>} : vector<256x128xf32>, vector<128x128xf32>, vector<256x128xf32> -> vector<256x128xf32>
    %54 = arith.addf %48, %53 : vector<256x128xf32>
    %c1_56 = arith.constant 1 : index
    %c9_57 = arith.constant 9 : index
    %c0_58 = arith.constant 0 : index
    %55 = vector.load %arg12[%c1_56, %c9_57, %c0_58] : memref<18x25x128xf32, #tpu.memory_space<vmem>>, vector<16x16x128xf32>
    %56 = vector.shape_cast %55 : vector<16x16x128xf32> to vector<256x128xf32>
    %c1_59 = arith.constant 1 : index
    %c2_60 = arith.constant 2 : index
    %c0_61 = arith.constant 0 : index
    %c0_62 = arith.constant 0 : index
    %57 = vector.load %arg5[%c1_59, %c2_60, %c0_61, %c0_62] : memref<3x3x128x128xf32, #tpu.memory_space<vmem>>, vector<1x1x128x128xf32>
    %58 = vector.shape_cast %57 : vector<1x1x128x128xf32> to vector<128x128xf32>
    %cst_63 = arith.constant dense<0.000000e+00> : vector<256x128xf32>
    %59 = tpu.matmul %56, %58, %cst_63 {dimension_numbers = #tpu.dot_dimension_numbers<[1], [0], [0], [1], [0, 0, 1, 1], [], []>} : vector<256x128xf32>, vector<128x128xf32>, vector<256x128xf32> -> vector<256x128xf32>
    %60 = arith.addf %54, %59 : vector<256x128xf32>
    %c2_64 = arith.constant 2 : index
    %c7_65 = arith.constant 7 : index
    %c0_66 = arith.constant 0 : index
    %61 = vector.load %arg12[%c2_64, %c7_65, %c0_66] : memref<18x25x128xf32, #tpu.memory_space<vmem>>, vector<16x16x128xf32>
    %62 = vector.shape_cast %61 : vector<16x16x128xf32> to vector<256x128xf32>
    %c2_67 = arith.constant 2 : index
    %c0_68 = arith.constant 0 : index
    %c0_69 = arith.constant 0 : index
    %c0_70 = arith.constant 0 : index
    %63 = vector.load %arg5[%c2_67, %c0_68, %c0_69, %c0_70] : memref<3x3x128x128xf32, #tpu.memory_space<vmem>>, vector<1x1x128x128xf32>
    %64 = vector.shape_cast %63 : vector<1x1x128x128xf32> to vector<128x128xf32>
    %cst_71 = arith.constant dense<0.000000e+00> : vector<256x128xf32>
    %65 = tpu.matmul %62, %64, %cst_71 {dimension_numbers = #tpu.dot_dimension_numbers<[1], [0], [0], [1], [0, 0, 1, 1], [], []>} : vector<256x128xf32>, vector<128x128xf32>, vector<256x128xf32> -> vector<256x128xf32>
    %66 = arith.addf %60, %65 : vector<256x128xf32>
    %c2_72 = arith.constant 2 : index
    %c8_73 = arith.constant 8 : index
    %c0_74 = arith.constant 0 : index
    %67 = vector.load %arg12[%c2_72, %c8_73, %c0_74] : memref<18x25x128xf32, #tpu.memory_space<vmem>>, vector<16x16x128xf32>
    %68 = vector.shape_cast %67 : vector<16x16x128xf32> to vector<256x128xf32>
    %c2_75 = arith.constant 2 : index
    %c1_76 = arith.constant 1 : index
    %c0_77 = arith.constant 0 : index
    %c0_78 = arith.constant 0 : index
    %69 = vector.load %arg5[%c2_75, %c1_76, %c0_77, %c0_78] : memref<3x3x128x128xf32, #tpu.memory_space<vmem>>, vector<1x1x128x128xf32>
    %70 = vector.shape_cast %69 : vector<1x1x128x128xf32> to vector<128x128xf32>
    %cst_79 = arith.constant dense<0.000000e+00> : vector<256x128xf32>
    %71 = tpu.matmul %68, %70, %cst_79 {dimension_numbers = #tpu.dot_dimension_numbers<[1], [0], [0], [1], [0, 0, 1, 1], [], []>} : vector<256x128xf32>, vector<128x128xf32>, vector<256x128xf32> -> vector<256x128xf32>
    %72 = arith.addf %66, %71 : vector<256x128xf32>
    %c2_80 = arith.constant 2 : index
    %c9_81 = arith.constant 9 : index
    %c0_82 = arith.constant 0 : index
    %73 = vector.load %arg12[%c2_80, %c9_81, %c0_82] : memref<18x25x128xf32, #tpu.memory_space<vmem>>, vector<16x16x128xf32>
    %74 = vector.shape_cast %73 : vector<16x16x128xf32> to vector<256x128xf32>
    %c2_83 = arith.constant 2 : index
    %c2_84 = arith.constant 2 : index
    %c0_85 = arith.constant 0 : index
    %c0_86 = arith.constant 0 : index
    %75 = vector.load %arg5[%c2_83, %c2_84, %c0_85, %c0_86] : memref<3x3x128x128xf32, #tpu.memory_space<vmem>>, vector<1x1x128x128xf32>
    %76 = vector.shape_cast %75 : vector<1x1x128x128xf32> to vector<128x128xf32>
    %cst_87 = arith.constant dense<0.000000e+00> : vector<256x128xf32>
    %77 = tpu.matmul %74, %76, %cst_87 {dimension_numbers = #tpu.dot_dimension_numbers<[1], [0], [0], [1], [0, 0, 1, 1], [], []>} : vector<256x128xf32>, vector<128x128xf32>, vector<256x128xf32> -> vector<256x128xf32>
    %78 = arith.addf %72, %77 : vector<256x128xf32>
    %c0_88 = arith.constant 0 : index
    %c0_89 = arith.constant 0 : index
    %79 = vector.load %arg6[%c0_88, %c0_89] : memref<1x128xf32, #tpu.memory_space<vmem>>, vector<1x128xf32>
    %80 = vector.broadcast %79 : vector<1x128xf32> to vector<256x128xf32>
    %81 = arith.addf %78, %80 : vector<256x128xf32>
    %cst_90 = arith.constant 0.000000e+00 : f32
    %82 = vector.broadcast %cst_90 : f32 to vector<256x128xf32>
    %83 = arith.maximumf %81, %82 : vector<256x128xf32>
    %c0_91 = arith.constant 0 : index
    %c0_92 = arith.constant 0 : index
    %84 = vector.load %arg7[%c0_91, %c0_92] : memref<128x128xf32, #tpu.memory_space<vmem>>, vector<128x128xf32>
    %cst_93 = arith.constant dense<0.000000e+00> : vector<256x128xf32>
    %85 = tpu.matmul %83, %84, %cst_93 {dimension_numbers = #tpu.dot_dimension_numbers<[1], [0], [0], [1], [0, 0, 1, 1], [], []>} : vector<256x128xf32>, vector<128x128xf32>, vector<256x128xf32> -> vector<256x128xf32>
    %c0_94 = arith.constant 0 : index
    %c0_95 = arith.constant 0 : index
    %86 = vector.load %arg8[%c0_94, %c0_95] : memref<1x128xf32, #tpu.memory_space<vmem>>, vector<1x128xf32>
    %87 = vector.broadcast %86 : vector<1x128xf32> to vector<256x128xf32>
    %88 = arith.addf %85, %87 : vector<256x128xf32>
    %c1_i32 = arith.constant 1 : i32
    %89 = arith.addi %0, %c1_i32 : i32
    %c0_96 = arith.constant 0 : index
    %90 = arith.index_cast %89 : i32 to index
    %c0_97 = arith.constant 0 : index
    %c0_98 = arith.constant 0 : index
    %91 = vector.load %arg2[%c0_96, %90, %c0_97, %c0_98] : memref<1x18x16x4xf32, #tpu.memory_space<vmem>>, vector<1x16x16x4xf32>
    %92 = vector.shape_cast %91 : vector<1x16x16x4xf32> to vector<16x16x4xf32>
    %93 = vector.shape_cast %92 : vector<16x16x4xf32> to vector<256x4xf32>
    %c0_99 = arith.constant 0 : index
    %c0_100 = arith.constant 0 : index
    %94 = vector.load %arg9[%c0_99, %c0_100] : memref<4x128xf32, #tpu.memory_space<vmem>>, vector<4x128xf32>
    %cst_101 = arith.constant dense<0.000000e+00> : vector<256x128xf32>
    %95 = tpu.matmul %93, %94, %cst_101 {dimension_numbers = #tpu.dot_dimension_numbers<[1], [0], [0], [1], [0, 0, 1, 1], [], []>} : vector<256x4xf32>, vector<4x128xf32>, vector<256x128xf32> -> vector<256x128xf32>
    %c0_102 = arith.constant 0 : index
    %c0_103 = arith.constant 0 : index
    %96 = vector.load %arg10[%c0_102, %c0_103] : memref<1x128xf32, #tpu.memory_space<vmem>>, vector<1x128xf32>
    %97 = vector.broadcast %96 : vector<1x128xf32> to vector<256x128xf32>
    %98 = arith.addf %95, %97 : vector<256x128xf32>
    %99 = arith.addf %88, %98 : vector<256x128xf32>
    %cst_104 = arith.constant 0.000000e+00 : f32
    %100 = vector.broadcast %cst_104 : f32 to vector<256x128xf32>
    %101 = arith.maximumf %99, %100 : vector<256x128xf32>
    %102 = vector.shape_cast %101 : vector<256x128xf32> to vector<1x16x16x128xf32>
    %c0_105 = arith.constant 0 : index
    %c0_106 = arith.constant 0 : index
    %c0_107 = arith.constant 0 : index
    %c0_108 = arith.constant 0 : index
    %103 = vector.load %arg11[%c0_105, %c0_106, %c0_107, %c0_108] : memref<1x16x16x128xf32, #tpu.memory_space<vmem>>, vector<1x16x16x128xf32>
    tpu.vector_store %arg11[%c0_105, %c0_106, %c0_107, %c0_108], %102 {strides = array<i32>} : memref<1x16x16x128xf32, #tpu.memory_space<vmem>>, vector<1x16x16x128xf32>,
    return
  }
  func.func @transform_0(%arg0: i32, %arg1: i32) -> (i32, i32, i32, i32) {
    %c0_i32 = arith.constant 0 : i32
    %c0_i32_0 = arith.constant 0 : i32
    %c0_i32_1 = arith.constant 0 : i32
    %c0_i32_2 = arith.constant 0 : i32
    return %arg0, %c0_i32, %c0_i32_0, %c0_i32_1 : i32, i32, i32, i32
  }
  func.func @transform_1(%arg0: i32, %arg1: i32) -> (i32, i32) {
    %c0_i32 = arith.constant 0 : i32
    %c0_i32_0 = arith.constant 0 : i32
    %c0_i32_1 = arith.constant 0 : i32
    return %c0_i32, %c0_i32_0 : i32, i32
  }
  func.func @transform_2(%arg0: i32, %arg1: i32) -> (i32, i32) {
    %c0_i32 = arith.constant 0 : i32
    %c0_i32_0 = arith.constant 0 : i32
    %c0_i32_1 = arith.constant 0 : i32
    return %c0_i32, %c0_i32_0 : i32, i32
  }
  func.func @transform_3(%arg0: i32, %arg1: i32) -> (i32, i32, i32, i32) {
    %c0_i32 = arith.constant 0 : i32
    %c0_i32_0 = arith.constant 0 : i32
    %c0_i32_1 = arith.constant 0 : i32
    %c0_i32_2 = arith.constant 0 : i32
    %c0_i32_3 = arith.constant 0 : i32
    return %c0_i32, %c0_i32_0, %c0_i32_1, %c0_i32_2 : i32, i32, i32, i32
  }
  func.func @transform_4(%arg0: i32, %arg1: i32) -> (i32, i32) {
    %c0_i32 = arith.constant 0 : i32
    %c0_i32_0 = arith.constant 0 : i32
    %c0_i32_1 = arith.constant 0 : i32
    return %c0_i32, %c0_i32_0 : i32, i32
  }
  func.func @transform_5(%arg0: i32, %arg1: i32) -> (i32, i32) {
    %c0_i32 = arith.constant 0 : i32
    %c0_i32_0 = arith.constant 0 : i32
    %c0_i32_1 = arith.constant 0 : i32
    return %c0_i32, %c0_i32_0 : i32, i32
  }
  func.func @transform_6(%arg0: i32, %arg1: i32) -> (i32, i32) {
    %c0_i32 = arith.constant 0 : i32
    %c0_i32_0 = arith.constant 0 : i32
    %c0_i32_1 = arith.constant 0 : i32
    return %c0_i32, %c0_i32_0 : i32, i32
  }
  func.func @transform_7(%arg0: i32, %arg1: i32) -> (i32, i32) {
    %c0_i32 = arith.constant 0 : i32
    %c0_i32_0 = arith.constant 0 : i32
    %c0_i32_1 = arith.constant 0 : i32
    return %c0_i32, %c0_i32_0 : i32, i32
  }
  func.func @transform_8(%arg0: i32, %arg1: i32) -> (i32, i32) {
    %c0_i32 = arith.constant 0 : i32
    %c0_i32_0 = arith.constant 0 : i32
    %c0_i32_1 = arith.constant 0 : i32
    return %c0_i32, %c0_i32_0 : i32, i32
  }
  func.func @transform_9(%arg0: i32, %arg1: i32) -> (i32, i32, i32, i32) {
    %c0_i32 = arith.constant 0 : i32
    %c0_i32_0 = arith.constant 0 : i32
    %c0_i32_1 = arith.constant 0 : i32
    return %arg0, %arg1, %c0_i32, %c0_i32_0 : i32, i32, i32, i32
  }
}

</mosaic_0001>

<bundles_post_ra>
// kernel: tpu_custom_call.1
= control target key start
LH: loop header
LB: loop body
LE: loop exit
PB: predicated region body
PF: predicated region fallthrough
CT: control target
= control target key end

     0   :  { %14 = vsyncpa [#allocation4], 0  ;;  %s7899_s0 = inlined_call_operand.vmem [shape: f32[2,18,16,4], index: 0, kind: input, shape index: {}]   ;;  %s7900_s1 = inlined_call_operand.vmem [shape: f32[4,128], index: 1, kind: input, shape index: {}]   ;;  %s7901_s2 = inlined_call_operand.vmem [shape: f32[1,128], index: 2, kind: input, shape index: {}]   ;;  %s7902_s3 = inlined_call_operand.hbm [shape: f32[3,3,128,128], index: 3, kind: input, shape index: {}]   ;;  %s7903_s4 = inlined_call_operand.vmem [shape: f32[1,128], index: 4, kind: input, shape index: {}]   ;;  %s7904_s5 = inlined_call_operand.vmem [shape: f32[128,128], index: 5, kind: input, shape index: {}]   ;;  %s7905_s6 = inlined_call_operand.vmem [shape: f32[1,128], index: 6, kind: input, shape index: {}]   ;;  %s7906_s7 = inlined_call_operand.vmem [shape: f32[4,128], index: 7, kind: input, shape index: {}]   ;;  %s7907_s8 = inlined_call_operand.vmem [shape: f32[1,128], index: 8, kind: input, shape index: {}]   ;;  %s7908_s9 = inlined_call_operand.hbm [shape: f32[2,16,16,128], index: 9, kind: output, shape index: {}]  }
   0x1   :  { %15 = vsyncpa [#allocation5], 0 }
   0x2   :  { %17 = vsyncpa [#allocation5 + $0x1], 0  ;;  %s6285_s30 = smov 0   ;;  %s6287_s10 = smov 0  }
   0x3   :  { %s6289_s11 = smov 0   ;;  %s6291_s12 = smov 0  }
   0x4   :  { %s6293_s13 = smov 0   ;;  %s6295_s14 = smov 0  }
   0x5 LB: > { %s4468_s15 = sadd.s32 4294967295, %s6226_s14   ;;  %s4469_s16 = sadd.s32 4294967294, %s6226_s14   ;;  %s6226_s14 = sphi %s6295_s14, %s23_s14   ;;  %s6222_s13 = sphi %s6293_s13, %s8033_s13   ;;  %s6218_s12 = sphi %s6291_s12, %s8032_s12   ;;  %s6214_s11 = sphi %s6289_s11, %s8031_s11   ;;  %s6210_s10 = sphi %s6287_s10, %s8030_s10   ;;  %s6206_s30 = sphi %s6285_s30, %s8029_s30  }
   0x6   : > { %s35_s17 = sadd.s32 1, %s6222_s13  ;;  %s238_s18 = sadd.s32 1, %s6214_s11 }
   0x7   : > { %p37_p0 = scmp.ge.s32.totalorder %s35_s17, 2  ;;  %p248_p1 = scmp.ne.s32.totalorder %s6214_s11, %s6210_s10 }
   0x8   : > { %p249_p2 = scmp.eq.s32.totalorder %s4468_s15, 1  ;;  %p254_p3 = scmp.ne.s32.totalorder %s6210_s10, %s6206_s30 }
   0x9   : > { %s8035_s17 = smov (%p37_p0, %s35_s17), 0  ;;  %p255_p5 = scmp.eq.s32.totalorder %s4469_s16, 1 }
   0xa   : > { %p6325_p4 = por %p249_p2, %p248_p1  ;;  %s233_s20 = ssub.s32 %s6222_s13, %s8035_s17 }
   0xb   : > { %p4470_p6 = scmp.ge.s32.totalorder %s6226_s14, 1  ;;  %p236_p7 = scmp.eq.s32.totalorder %s233_s20, 0 }
   0xc   : > { %p6332_p8 = por %p255_p5, %p254_p3  ;;  %p262_p9 = scmp.lt.s32.totalorder %s6226_s14, 3 }
   0xd   : > { %s6338_s22 = scalar_select %p236_p7, %s6214_s11, %s238_s18  }
   0xe   : > { %p6340_p10 = pnand %p4470_p6, %p262_p9  ;;  %p6344_p11 = scmp.eq.s32.totalorder %s4468_s15, 0 }
   0xf   : > { %s6228_s25 = smov [#allocation3]  }
  0x10   : > { %p6054_p12 = pneg %p6340_p10  ;;  %s280_s26 = sshll.u32 %s6228_s25, 4  ;;  %s281_s26 = int_to_ptr.vmem [resolvable:$true] %s280_s26 }
  0x11   : > { %s6131_s27 = scalar_lea.vmem %s281_s26, 18432  ;;  %p6139_p5 = scmp.lt.s32.totalorder %s281_s26, %s281_s26 }
  0x12   : > { %p6055_p13 = pnand %p6344_p11, %p6054_p12  ;;  %p6132_p1 = scmp.ne.s32.totalorder %s281_s26, %s6131_s27 }
  0x13   : > { %p6140_p6 = scmp.lt.s32.totalorder %s6131_s27, %s6131_s27 }
  0x14   : > { %p6122_p0 = pneg %p6055_p13 }
  0x15   : > { %p6141_p7 = por %p6140_p6, %p6139_p5 }
  0x16   : > { %p6134_p2 = pnand %p6132_p1, %p6122_p0 }
  0x18   : > { %p6135_p3 = pneg %p6134_p2 }
  0x1a   : > { %p6142_p9 = pnand %p6141_p7, %p6135_p3 }
  0x1c   : > { %6145 = shalt.err (!%p6142_p9)
}
  0x1d   : > { %s6229_s28 = smov 128   ;;  %s6230_s29 = smov 8  }
  0x1e   : > { %6057 = dma.hbm_to_vmem [thread:$0]  (!%p6055_p13), %s7902_s3, 18432, %s281_s26, [#allocation4], %s6229_s28, %s6229_s28, %s6230_s29  }
  0x1f   : > { %319 = sbr.rel (%p6340_p10) target bundleno = 989 (0x3dd), region = 56 }
  0x24   : > { %6197 = dma.done.wait (%p6344_p11), [#allocation4], 18432  }
  0x25   : > { %6199 = vsyncadd (%p6344_p11), [#allocation4], 4294948864  ;;  %p355_p12 = scmp.lt.s32.totalorder %s6218_s12, 1  ;;  %vm517_vm0 = vcmask 1043456   ;;  %vm408_vm1 = vcmask 31744   ;;  %v983_v8 = vld [vmem:[#allocation3 + $0xf8] sm:$0xff] }
  0x26   : > { %v400_v0 = vld [vmem:[%s7900_s1] sm:$0xf]  ;;  %5195 = vmatprep.subr.mxu1 %v983_v8  ;;  %v934_v10 = vld [vmem:[#allocation3 + $0x78] sm:$0xff]  ;;  %v982_v11 = vld [vmem:[#allocation3 + $0xf0] sm:$0xff]  ;;  %v6231_v57 = vmov 0.0   ;;  %s352_s28 = sand.u32 1, %s6210_s10  }
  0x27   : > { %s356_s18 = scalar_select %p355_p12, %s6218_s12, 1  ;;  %5139 = vmatprep.subr.msk.mxu0 %vm517_vm0, %v400_v0  ;;  %5196 = vmatpush3.msra.mxu1 %v983_v8  ;;  %v933_v13 = vld [vmem:[#allocation3 + $0x70] sm:$0xff]  ;;  %v981_v14 = vld [vmem:[#allocation3 + $0xe8] sm:$0xff]  ;;  %v980_v17 = vld [vmem:[#allocation3 + $0xe0] sm:$0xff]  ;;  %880 = vst [vmem:[#allocation2 + $0x10] sm:$0xff] %v6231_v57 }
  0x28   : > { %5140 = vmatpush3.msk.msra.mxu0 %vm517_vm0, %v400_v0  ;;  %5197 = vmatprep.subr.mxu1 %v982_v11  ;;  %v932_v15 = vld [vmem:[#allocation3 + $0x68] sm:$0xff]  ;;  %v931_v19 = vld [vmem:[#allocation3 + $0x60] sm:$0xff]  ;;  %v979_v20 = vld [vmem:[#allocation3 + $0xd8] sm:$0xff]  ;;  %838 = vst [vmem:[#allocation2 + $0x7] sm:$0x1] %v6231_v57  ;;  %s4475_s15 = sshll.u32 %s352_s28, 8 }
  0x29   : > { %s6047_s20 = smul.u32 288, %s356_s18  ;;  %5275 = vmatprep.subr.mxu0 %v934_v10  ;;  %5198 = vmatpush3.msra.mxu1 %v982_v11  ;;  %v930_v23 = vld [vmem:[#allocation3 + $0x58] sm:$0xff]  ;;  %v978_v24 = vld [vmem:[#allocation3 + $0xd0] sm:$0xff]  ;;  %v977_v27 = vld [vmem:[#allocation3 + $0xc8] sm:$0xff]  ;;  %839 = vst [vmem:[#allocation2 + $0x27] sm:$0x1] %v6231_v57 }
  0x2a   : > { %5199 = vmatprep.subr.mxu1 %v981_v14  ;;  %v929_v25 = vld [vmem:[#allocation3 + $0x50] sm:$0xff]  ;;  %v928_v29 = vld [vmem:[#allocation3 + $0x48] sm:$0xff]  ;;  %v976_v30 = vld [vmem:[#allocation3 + $0xc0] sm:$0xff]  ;;  %840 = vst [vmem:[#allocation2 + $0x47] sm:$0x1] %v6231_v57  ;;  %5227 = vmatprep.mubr.f32.mxu1 %v6231_v57  ;;  %s7731_s16 = scalar_lea.vmem [#allocation6], %s4475_s15 }
  0x2b   : > { %s6366_s26 = scalar_lea.vmem %s7899_s0, %s6047_s20  ;;  %5200 = vmatpush3.msra.mxu1 %v981_v14  ;;  %v927_v33 = vld [vmem:[#allocation3 + $0x40] sm:$0xff]  ;;  %v975_v47 = vld [vmem:[#allocation3 + $0xb8] sm:$0xff]  ;;  %v974_v50 = vld [vmem:[#allocation3 + $0xb0] sm:$0xff]  ;;  %841 = vst [vmem:[#allocation2 + $0x67] sm:$0x1] %v6231_v57  ;;  %s4588_s18 = sshll.u32 %s6218_s12, 12 }
  0x2c   : > { %v364_v1 = vld [vmem:[%s6366_s26] sm:$0xff]  ;;  %v365_v2 = vld [vmem:[%s6366_s26 + $0x8] sm:$0xff]  ;;  %v366_v3 = vld [vmem:[%s6366_s26 + $0x10] sm:$0xff]  ;;  %5201 = vmatprep.subr.mxu1 %v980_v17  ;;  %842 = vst [vmem:[#allocation2 + $0x87] sm:$0x1] %v6231_v57  ;;  %s4377_s20 = sshll.u32 %s7731_s16, 4  ;;  %s7848_s20 = int_to_ptr.vmem [resolvable:$true] %s4377_s20 }
  0x2d   : > { %5141 = vmatprep.mubr.msk.f32.mxu0 %vm408_vm1, %v364_v1  ;;  %v367_v4 = vld [vmem:[%s6366_s26 + $0x18] sm:$0xff]  ;;  %v368_v5 = vld [vmem:[%s6366_s26 + $0x20] sm:$0xff]  ;;  %v369_v6 = vld [vmem:[%s6366_s26 + $0x28] sm:$0xff]  ;;  %5202 = vmatpush3.msra.mxu1 %v980_v17  ;;  %843 = vst [vmem:[#allocation2 + $0xa7] sm:$0x1] %v6231_v57  ;;  %s7854_s23 = scalar_lea.sflag [#allocation5], %s352_s28 }
  0x2e   : > { %5142 = vmatmul.mubr.msk.f32.vlgmr.msra.gmra.mxu0 %vm408_vm1, %v365_v2  ;;  %v370_v7 = vld [vmem:[%s6366_s26 + $0x30] sm:$0xff]  ;;  %v371_v9 = vld [vmem:[%s6366_s26 + $0x38] sm:$0xff]  ;;  %v372_v12 = vld [vmem:[%s6366_s26 + $0x40] sm:$0xff]  ;;  %5203 = vmatprep.subr.mxu1 %v979_v20  ;;  %844 = vst [vmem:[#allocation2 + $0xc7] sm:$0x1] %v6231_v57  ;;  %s6146_s12 = scalar_lea.vmem %s7848_s20, 4096 }
  0x2f   : > { %5144 = vmatprep.mubr.msk.f32.mxu0 %vm408_vm1, %v366_v3  ;;  %5276 = vmatpush3.msra.mxu0 %v934_v10  ;;  %v373_v16 = vld [vmem:[%s6366_s26 + $0x48] sm:$0xff]  ;;  %v374_v18 = vld [vmem:[%s6366_s26 + $0x50] sm:$0xff]  ;;  %v375_v21 = vld [vmem:[%s6366_s26 + $0x58] sm:$0xff]  ;;  %845 = vst [vmem:[#allocation2 + $0xe7] sm:$0x1] %v6231_v57  ;;  %p6147_p10 = scmp.ne.s32.totalorder %s7848_s20, %s6146_s12  ;;  %s6232_s24 = smov [#allocation6]  }
  0x30   : > { %5277 = vmatprep.subr.mxu0 %v933_v13  ;;  %v376_v22 = vld [vmem:[%s6366_s26 + $0x60] sm:$0xff]  ;;  %5204 = vmatpush3.msra.mxu1 %v979_v20  ;;  %v377_v26 = vld [vmem:[%s6366_s26 + $0x68] sm:$0xff]  ;;  %v378_v28 = vld [vmem:[%s6366_s26 + $0x70] sm:$0xff]  ;;  %846 = vst [vmem:[#allocation2 + $0x107] sm:$0x1] %v6231_v57  ;;  %s6150_s29 = sshll.u32 %s6232_s24, 4  ;;  %s6151_s29 = int_to_ptr.vmem [resolvable:$false] %s6150_s29 }
  0x31   : > { %5278 = vmatpush3.msra.mxu0 %v933_v13  ;;  %5205 = vmatprep.subr.mxu1 %v978_v24  ;;  %v379_v31 = vld [vmem:[%s6366_s26 + $0x78] sm:$0xff]  ;;  %v380_v32 = vld [vmem:[%s6366_s26 + $0x80] sm:$0xff]  ;;  %v381_v34 = vld [vmem:[%s6366_s26 + $0x88] sm:$0xff]  ;;  %847 = vst [vmem:[#allocation2 + $0x127] sm:$0x1] %v6231_v57  ;;  %p6148_p11 = pnand %p6147_p10, %p6325_p4  ;;  %s6152_s15 = scalar_lea.vmem %s6151_s29, 8192 }
  0x32   : > { %5145 = vmatmul.mubr.msk.f32.gmra.mxu0 %vm408_vm1, %v367_v4  ;;  %5279 = vmatprep.subr.mxu0 %v932_v15  ;;  %v382_v35 = vld [vmem:[%s6366_s26 + $0x90] sm:$0xff]  ;;  %v383_v36 = vld [vmem:[%s6366_s26 + $0x98] sm:$0xff]  ;;  %v384_v37 = vld [vmem:[%s6366_s26 + $0xa0] sm:$0xff]  ;;  %848 = vst [vmem:[#allocation2 + $0x147] sm:$0x1] %v6231_v57  ;;  %p6153_p0 = scmp.lt.s32.totalorder %s7848_s20, %s6151_s29  ;;  %p6154_p1 = scmp.lt.s32.totalorder %s6152_s15, %s6146_s12 }
  0x33   : > { %5147 = vmatprep.mubr.msk.f32.mxu0 %vm408_vm1, %v368_v5  ;;  %5280 = vmatpush3.msra.mxu0 %v932_v15  ;;  %v385_v38 = vld [vmem:[%s6366_s26 + $0xa8] sm:$0xff]  ;;  %v386_v39 = vld [vmem:[%s6366_s26 + $0xb0] sm:$0xff]  ;;  %v387_v40 = vld [vmem:[%s6366_s26 + $0xb8] sm:$0xff]  ;;  %849 = vst [vmem:[#allocation2 + $0x167] sm:$0x1] %v6231_v57  ;;  %p6149_p13 = pneg %p6148_p11 }
  0x34   : > { %5281 = vmatprep.subr.mxu0 %v931_v19  ;;  %5206 = vmatpush3.msra.mxu1 %v978_v24  ;;  %v388_v41 = vld [vmem:[%s6366_s26 + $0xc0] sm:$0xff]  ;;  %v389_v42 = vld [vmem:[%s6366_s26 + $0xc8] sm:$0xff]  ;;  %v390_v43 = vld [vmem:[%s6366_s26 + $0xd0] sm:$0xff]  ;;  %850 = vst [vmem:[#allocation2 + $0x187] sm:$0x1] %v6231_v57  ;;  %p6155_p2 = por %p6154_p1, %p6153_p0 }
  0x35   : > { %5282 = vmatpush3.msra.mxu0 %v931_v19  ;;  %5207 = vmatprep.subr.mxu1 %v977_v27  ;;  %v391_v44 = vld [vmem:[%s6366_s26 + $0xd8] sm:$0xff]  ;;  %v392_v45 = vld [vmem:[%s6366_s26 + $0xe0] sm:$0xff]  ;;  %v393_v46 = vld [vmem:[%s6366_s26 + $0xe8] sm:$0xff]  ;;  %851 = vst [vmem:[#allocation2 + $0x1a7] sm:$0x1] %v6231_v57 }
  0x36   : > { %5148 = vmatmul.mubr.msk.f32.gmra.mxu0 %vm408_vm1, %v369_v6  ;;  %5283 = vmatprep.subr.mxu0 %v930_v23  ;;  %v926_v48 = vld [vmem:[#allocation3 + $0x38] sm:$0xff]  ;;  %v394_v49 = vld [vmem:[%s6366_s26 + $0xf0] sm:$0xff]  ;;  %v973_v53 = vld [vmem:[#allocation3 + $0xa8] sm:$0xff]  ;;  %852 = vst [vmem:[#allocation2 + $0x1c7] sm:$0x1] %v6231_v57  ;;  %p6156_p3 = pnand %p6155_p2, %p6149_p13 }
  0x37   : > { %5150 = vmatprep.mubr.msk.f32.mxu0 %vm408_vm1, %v370_v7  ;;  %5284 = vmatpush3.msra.mxu0 %v930_v23  ;;  %v925_v51 = vld [vmem:[#allocation3 + $0x30] sm:$0xff]  ;;  %v395_v52 = vld [vmem:[%s6366_s26 + $0xf8] sm:$0xff]  ;;  %v924_v54 = vld [vmem:[#allocation3 + $0x28] sm:$0xff]  ;;  %853 = vst [vmem:[#allocation2 + $0x1e7] sm:$0x1] %v6231_v57 }
  0x38   : > { %5285 = vmatprep.subr.mxu0 %v929_v25  ;;  %5208 = vmatpush3.msra.mxu1 %v977_v27  ;;  %v396_v55 = vld [vmem:[%s6366_s26 + $0x100] sm:$0xff]  ;;  %854 = vst [vmem:[#allocation2 + $0x207] sm:$0x1] %v6231_v57  ;;  %855 = vst [vmem:[#allocation2 + $0x227] sm:$0x1] %v6231_v57  ;;  %v397_v59 = vld [vmem:[%s6366_s26 + $0x108] sm:$0xff] }
  0x39   : > { %5286 = vmatpush3.msra.mxu0 %v929_v25  ;;  %5209 = vmatprep.subr.mxu1 %v976_v30  ;;  %v972_v56 = vld [vmem:[#allocation3 + $0xa0] sm:$0xff]  ;;  %856 = vst [vmem:[#allocation2 + $0x18] sm:$0x1] %v6231_v57  ;;  %857 = vst [vmem:[#allocation2 + $0x38] sm:$0x1] %v6231_v57  ;;  %v971_v60 = vld [vmem:[#allocation3 + $0x98] sm:$0xff] }
  0x3a   : > { %5151 = vmatmul.mubr.msk.f32.gmra.mxu0 %vm408_vm1, %v371_v9  ;;  %5287 = vmatprep.subr.mxu0 %v928_v29  ;;  %858 = vst [vmem:[#allocation2 + $0x58] sm:$0x1] %v6231_v57  ;;  %859 = vst [vmem:[#allocation2 + $0x78] sm:$0x1] %v6231_v57  ;;  %v923_v58 = vld [vmem:[#allocation3 + $0x20] sm:$0xff]  ;;  %v922_v61 = vld [vmem:[#allocation3 + $0x18] sm:$0xff] }
  0x3b   : > { %5153 = vmatprep.mubr.msk.f32.mxu0 %vm408_vm1, %v372_v12  ;;  %5288 = vmatpush3.msra.mxu0 %v928_v29  ;;  %860 = vst [vmem:[#allocation2 + $0x98] sm:$0x1] %v6231_v57  ;;  %861 = vst [vmem:[#allocation2 + $0xb8] sm:$0x1] %v6231_v57  ;;  %v970_v62 = vld [vmem:[#allocation3 + $0x90] sm:$0xff]  ;;  %v969_v1 = vld [vmem:[#allocation3 + $0x88] sm:$0xff] }
  0x3c   : > { %5210 = vmatpush3.msra.mxu1 %v976_v30  ;;  %5289 = vmatprep.subr.mxu0 %v927_v33  ;;  %862 = vst [vmem:[#allocation2 + $0xd8] sm:$0x1] %v6231_v57  ;;  %863 = vst [vmem:[#allocation2 + $0xf8] sm:$0x1] %v6231_v57  ;;  %v398_v63 = vld [vmem:[%s6366_s26 + $0x110] sm:$0xff]  ;;  %v399_v2 = vld [vmem:[%s6366_s26 + $0x118] sm:$0xff] }
  0x3d   : > { %5290 = vmatpush3.msra.mxu0 %v927_v33  ;;  %5211 = vmatprep.subr.mxu1 %v975_v47  ;;  %864 = vst [vmem:[#allocation2 + $0x118] sm:$0x1] %v6231_v57  ;;  %865 = vst [vmem:[#allocation2 + $0x138] sm:$0x1] %v6231_v57  ;;  %v921_v0 = vld [vmem:[#allocation3 + $0x10] sm:$0xff]  ;;  %v920_v3 = vld [vmem:[#allocation3 + $0x8] sm:$0xff] }
  0x3e   : > { %5154 = vmatmul.mubr.msk.f32.gmra.mxu0 %vm408_vm1, %v373_v16  ;;  %5291 = vmatprep.subr.mxu0 %v926_v48  ;;  %866 = vst [vmem:[#allocation2 + $0x158] sm:$0x1] %v6231_v57  ;;  %867 = vst [vmem:[#allocation2 + $0x178] sm:$0x1] %v6231_v57  ;;  %v968_v4 = vld [vmem:[#allocation3 + $0x80] sm:$0xff]  ;;  %v1482_v8 = vld [vmem:[#allocation3 + $0x178] sm:$0xff] }
  0x3f   : > { %5156 = vmatprep.mubr.msk.f32.mxu0 %vm408_vm1, %v374_v18  ;;  %5212 = vmatpush3.msra.mxu1 %v975_v47  ;;  %868 = vst [vmem:[#allocation2 + $0x198] sm:$0x1] %v6231_v57  ;;  %869 = vst [vmem:[#allocation2 + $0x1b8] sm:$0x1] %v6231_v57  ;;  %v919_v5 = vld [vmem:[#allocation3] sm:$0xff]  ;;  %v1481_v9 = vld [vmem:[#allocation3 + $0x170] sm:$0xff] }
  0x40   : > { %5292 = vmatpush3.msra.mxu0 %v926_v48  ;;  %5213 = vmatprep.subr.mxu1 %v974_v50  ;;  %870 = vst [vmem:[#allocation2 + $0x1d8] sm:$0x1] %v6231_v57  ;;  %871 = vst [vmem:[#allocation2 + $0x1f8] sm:$0x1] %v6231_v57  ;;  %v1480_v10 = vld [vmem:[#allocation3 + $0x168] sm:$0xff]  ;;  %v1479_v11 = vld [vmem:[#allocation3 + $0x160] sm:$0xff] }
  0x41   : > { %5214 = vmatpush3.msra.mxu1 %v974_v50  ;;  %5293 = vmatprep.subr.mxu0 %v925_v51  ;;  %872 = vst [vmem:[#allocation2 + $0x218] sm:$0x1] %v6231_v57  ;;  %873 = vst [vmem:[#allocation2 + $0x238] sm:$0x1] %v6231_v57  ;;  %v1478_v12 = vld [vmem:[#allocation3 + $0x158] sm:$0xff]  ;;  %v1477_v13 = vld [vmem:[#allocation3 + $0x150] sm:$0xff] }
  0x42   : > { %5157 = vmatmul.mubr.msk.f32.gmra.mxu0 %vm408_vm1, %v375_v21  ;;  %5215 = vmatprep.subr.mxu1 %v973_v53  ;;  %879 = vst [vmem:[#allocation2 + $0x8] sm:$0xff] %v6231_v57  ;;  %885 = vst [vmem:[#allocation2 + $0x230] sm:$0xff] %v6231_v57  ;;  %v1476_v14 = vld [vmem:[#allocation3 + $0x148] sm:$0xff]  ;;  %v1789_v15 = vld [vmem:[#allocation3 + $0x1f8] sm:$0xff] }
  0x43   : > { %5159 = vmatprep.mubr.msk.f32.mxu0 %vm408_vm1, %v376_v22  ;;  %5294 = vmatpush3.msra.mxu0 %v925_v51  ;;  %884 = vst [vmem:[#allocation2 + $0x228] sm:$0xff] %v6231_v57  ;;  %878 = vst [vmem:[#allocation2] sm:$0xff] %v6231_v57  ;;  %v1475_v16 = vld [vmem:[#allocation3 + $0x140] sm:$0xff]  ;;  %v1788_v17 = vld [vmem:[#allocation3 + $0x1f0] sm:$0xff] }
  0x44   : > { %5216 = vmatpush3.msra.mxu1 %v973_v53  ;;  %5295 = vmatprep.subr.mxu0 %v924_v54  ;;  %881 = vst [vmem:[#allocation2 + $0x18] sm:$0x1] %v6231_v57  ;;  %883 = vst [vmem:[#allocation2 + $0x220] sm:$0xff] %v6231_v57  ;;  %v1787_v18 = vld [vmem:[#allocation3 + $0x1e8] sm:$0xff]  ;;  %v1474_v19 = vld [vmem:[#allocation3 + $0x138] sm:$0xff] }
  0x45   : > { %886 = vst [vmem:[#allocation2 + $0x238] sm:$0x1] %v6231_v57  ;;  %5217 = vmatprep.subr.mxu1 %v972_v56  ;;  %5296 = vmatpush3.msra.mxu0 %v924_v54  ;;  %v1786_v20 = vld [vmem:[#allocation3 + $0x1e0] sm:$0xff]  ;;  %v1785_v21 = vld [vmem:[#allocation3 + $0x1d8] sm:$0xff]  ;;  %v1473_v22 = vld [vmem:[#allocation3 + $0x130] sm:$0xff] }
  0x46   : > { %5160 = vmatmul.mubr.msk.f32.gmra.mxu0 %vm408_vm1, %v377_v26  ;;  %5218 = vmatpush3.msra.mxu1 %v972_v56  ;;  %v1784_v23 = vld [vmem:[#allocation3 + $0x1d0] sm:$0xff]  ;;  %v1472_v24 = vld [vmem:[#allocation3 + $0x128] sm:$0xff]  ;;  %v1471_v26 = vld [vmem:[#allocation3 + $0x120] sm:$0xff] }
  0x47   : > { %5162 = vmatprep.mubr.msk.f32.mxu0 %vm408_vm1, %v378_v28  ;;  %5297 = vmatprep.subr.mxu0 %v923_v58  ;;  %v1783_v25 = vld [vmem:[#allocation3 + $0x1c8] sm:$0xff]  ;;  %v1782_v27 = vld [vmem:[#allocation3 + $0x1c0] sm:$0xff]  ;;  %v1470_v28 = vld [vmem:[#allocation3 + $0x118] sm:$0xff] }
  0x48   : > { %5219 = vmatprep.subr.mxu1 %v971_v60  ;;  %5298 = vmatpush3.msra.mxu0 %v923_v58  ;;  %v1781_v29 = vld [vmem:[#allocation3 + $0x1b8] sm:$0xff]  ;;  %v1780_v30 = vld [vmem:[#allocation3 + $0x1b0] sm:$0xff]  ;;  %v1468_v33 = vld [vmem:[#allocation3 + $0x108] sm:$0xff] }
  0x49   : > { %5220 = vmatpush3.msra.mxu1 %v971_v60  ;;  %5299 = vmatprep.subr.mxu0 %v922_v61  ;;  %v888_v7 = vld [vmem:[#allocation2 + $0xf] sm:$0xff] }
  0x4a   : > { %5163 = vmatmul.mubr.msk.f32.gmra.mxu0 %vm408_vm1, %v379_v31  ;;  %5221 = vmatprep.subr.mxu1 %v970_v62  ;;  %v887_v6 = vld [vmem:[#allocation2 + $0x7] sm:$0xff]  ;;  %v1469_v31 = vld [vmem:[#allocation3 + $0x110] sm:$0xff] }
  0x4b   : > { %5165 = vmatprep.mubr.msk.f32.mxu0 %vm408_vm1, %v380_v32  ;;  %5222 = vmatpush3.msra.mxu1 %v970_v62  ;;  %v1779_v32 = vld [vmem:[#allocation3 + $0x1a8] sm:$0xff] }
  0x4c   : > { %5300 = vmatpush3.msra.mxu0 %v922_v61  ;;  %5223 = vmatprep.subr.mxu1 %v969_v1 }
  0x4d   : > { %5301 = vmatprep.subr.mxu0 %v921_v0  ;;  %5224 = vmatpush3.msra.mxu1 %v969_v1 }
  0x4e   : > { %5166 = vmatmul.mubr.msk.f32.gmra.mxu0 %vm408_vm1, %v381_v34  ;;  %5225 = vmatprep.subr.mxu1 %v968_v4  ;;  %v1778_v34 = vld [vmem:[#allocation3 + $0x1a0] sm:$0xff] }
  0x4f   : > { %5168 = vmatprep.mubr.msk.f32.mxu0 %vm408_vm1, %v382_v35  ;;  %5302 = vmatpush3.msra.mxu0 %v921_v0  ;;  %v1467_v35 = vld [vmem:[#allocation3 + $0x100] sm:$0xff] }
  0x50   : > { %5303 = vmatprep.subr.mxu0 %v920_v3  ;;  %5226 = vmatpush3.msra.mxu1 %v968_v4 }
  0x51   : > { %5304 = vmatpush3.msra.mxu0 %v920_v3  ;;  %5228 = vmatmul.mubr.f32.vlgmr.msra.gmra.mxu1 %v6231_v57 }
  0x52   : > { %5169 = vmatmul.mubr.msk.f32.gmra.mxu0 %vm408_vm1, %v383_v36  ;;  %5305 = vmatprep.subr.mxu0 %v919_v5  ;;  %v1777_v36 = vld [vmem:[#allocation3 + $0x198] sm:$0xff] }
  0x53   : > { %5171 = vmatprep.mubr.msk.f32.mxu0 %vm408_vm1, %v384_v37  ;;  %5306 = vmatpush3.msra.mxu0 %v919_v5  ;;  %v1776_v37 = vld [vmem:[#allocation3 + $0x190] sm:$0xff] }
  0x54   : > { %5355 = vmatprep.subr.mxu1 %v1482_v8  ;;  %5435 = vmatprep.subr.mxu0 %v1789_v15 }
  0x55   : > { %5356 = vmatpush3.msra.mxu1 %v1482_v8 }
  0x56   : > { %5172 = vmatmul.mubr.msk.f32.gmra.mxu0 %vm408_vm1, %v385_v38  ;;  %5357 = vmatprep.subr.mxu1 %v1481_v9  ;;  %v1775_v38 = vld [vmem:[#allocation3 + $0x188] sm:$0xff] }
  0x57   : > { %5174 = vmatprep.mubr.msk.f32.mxu0 %vm408_vm1, %v386_v39  ;;  %5358 = vmatpush3.msra.mxu1 %v1481_v9  ;;  %v1774_v39 = vld [vmem:[#allocation3 + $0x180] sm:$0xff] }
  0x58   : > { %5359 = vmatprep.subr.mxu1 %v1480_v10 }
  0x59   : > { %5360 = vmatpush3.msra.mxu1 %v1480_v10 }
  0x5a   : > { %5175 = vmatmul.mubr.msk.f32.gmra.mxu0 %vm408_vm1, %v387_v40  ;;  %5361 = vmatprep.subr.mxu1 %v1479_v11  ;;  %v6491_v40 = vld [vmem:[#allocation3 + $0x278] sm:$0xff] }
  0x5b   : > { %5177 = vmatprep.mubr.msk.f32.mxu0 %vm408_vm1, %v388_v41  ;;  %5362 = vmatpush3.msra.mxu1 %v1479_v11  ;;  %v6494_v41 = vld [vmem:[#allocation3 + $0x2f8] sm:$0xff] }
  0x5c   : > { %5363 = vmatprep.subr.mxu1 %v1478_v12 }
  0x5d   : > { %5364 = vmatpush3.msra.mxu1 %v1478_v12 }
  0x5e   : > { %5178 = vmatmul.mubr.msk.f32.gmra.mxu0 %vm408_vm1, %v389_v42  ;;  %5365 = vmatprep.subr.mxu1 %v1477_v13 }
  0x5f   : > { %5180 = vmatprep.mubr.msk.f32.mxu0 %vm408_vm1, %v390_v43  ;;  %5366 = vmatpush3.msra.mxu1 %v1477_v13  ;;  %v6500_v43 = vld [vmem:[%s7901_s2] ss:$0 sm:$0xff] }
  0x60   : > { %5367 = vmatprep.subr.mxu1 %v1476_v14 }
  0x61   : > { %5368 = vmatpush3.msra.mxu1 %v1476_v14 }
  0x62   : > { %5181 = vmatmul.mubr.msk.f32.gmra.mxu0 %vm408_vm1, %v391_v44  ;;  %5369 = vmatprep.subr.mxu1 %v1475_v16 }
  0x63   : > { %5183 = vmatprep.mubr.msk.f32.mxu0 %vm408_vm1, %v392_v45  ;;  %5370 = vmatpush3.msra.mxu1 %v1475_v16 }
  0x64   : > { %5371 = vmatprep.subr.mxu1 %v1474_v19 }
  0x65   : > { %5372 = vmatpush3.msra.mxu1 %v1474_v19 }
  0x66   : > { %5184 = vmatmul.mubr.msk.f32.gmra.mxu0 %vm408_vm1, %v393_v46  ;;  %5373 = vmatprep.subr.mxu1 %v1473_v22 }
  0x67   : > { %5186 = vmatprep.mubr.msk.f32.mxu0 %vm408_vm1, %v394_v49  ;;  %5374 = vmatpush3.msra.mxu1 %v1473_v22 }
  0x68   : > { %5375 = vmatprep.subr.mxu1 %v1472_v24 }
  0x69   : > { %5376 = vmatpush3.msra.mxu1 %v1472_v24 }
  0x6a   : > { %5187 = vmatmul.mubr.msk.f32.gmra.mxu0 %vm408_vm1, %v395_v52  ;;  %5377 = vmatprep.subr.mxu1 %v1471_v26 }
  0x6b   : > { %5189 = vmatprep.mubr.msk.f32.mxu0 %vm408_vm1, %v396_v55  ;;  %5378 = vmatpush3.msra.mxu1 %v1471_v26 }
  0x6c   : > { %5379 = vmatprep.subr.mxu1 %v1470_v28 }
  0x6d   : > { %5380 = vmatpush3.msra.mxu1 %v1470_v28 }
  0x6e   : > { %5190 = vmatmul.mubr.msk.f32.gmra.mxu0 %vm408_vm1, %v397_v59  ;;  %5381 = vmatprep.subr.mxu1 %v1469_v31 }
  0x6f   : > { %5192 = vmatprep.mubr.msk.f32.mxu0 %vm408_vm1, %v398_v63  ;;  %5382 = vmatpush3.msra.mxu1 %v1469_v31 }
  0x70   : > { %5383 = vmatprep.subr.mxu1 %v1468_v33 }
  0x71   : > { %5384 = vmatpush3.msra.mxu1 %v1468_v33 }
  0x72   : > { %5193 = vmatmul.mubr.msk.f32.gmra.mxu0 %vm408_vm1, %v399_v2  ;;  %5385 = vmatprep.subr.mxu1 %v1467_v35 }
  0x73   : > { %5307 = vmatprep.mubr.f32.mxu0 %v887_v6  ;;  %5386 = vmatpush3.msra.mxu1 %v1467_v35 }
  0x74   : > { %5515 = vmatprep.subr.mxu1 %v6491_v40 }
  0x76   : > { %5308 = vmatmul.mubr.f32.vlgmr.msra.gmra.mxu0 %v888_v7 }
  0x77   : > { %5436 = vmatpush3.msra.mxu0 %v1789_v15 }
  0x78   : > { %5437 = vmatprep.subr.mxu0 %v1788_v17 }
  0x79   : > { %5438 = vmatpush3.msra.mxu0 %v1788_v17 }
  0x7a   : > { %5439 = vmatprep.subr.mxu0 %v1787_v18 }
  0x7b   : > { %5440 = vmatpush3.msra.mxu0 %v1787_v18 }
  0x7c   : > { %5441 = vmatprep.subr.mxu0 %v1786_v20 }
  0x7d   : > { %5442 = vmatpush3.msra.mxu0 %v1786_v20 }
  0x7e   : > { %5443 = vmatprep.subr.mxu0 %v1785_v21 }
  0x7f   : > { %5444 = vmatpush3.msra.mxu0 %v1785_v21 }
  0x80   : > { %5445 = vmatprep.subr.mxu0 %v1784_v23 }
  0x81   : > { %5446 = vmatpush3.msra.mxu0 %v1784_v23 }
  0x82   : > { %5447 = vmatprep.subr.mxu0 %v1783_v25 }
  0x83   : > { %5448 = vmatpush3.msra.mxu0 %v1783_v25 }
  0x84   : > { %5449 = vmatprep.subr.mxu0 %v1782_v27 }
  0x85   : > { %5450 = vmatpush3.msra.mxu0 %v1782_v27 }
  0x86   : > { %5451 = vmatprep.subr.mxu0 %v1781_v29 }
  0x87   : > { %5452 = vmatpush3.msra.mxu0 %v1781_v29 }
  0x88   : > { %5453 = vmatprep.subr.mxu0 %v1780_v30 }
  0x89   : > { %5454 = vmatpush3.msra.mxu0 %v1780_v30 }
  0x8a   : > { %5455 = vmatprep.subr.mxu0 %v1779_v32 }
  0x8b   : > { %5456 = vmatpush3.msra.mxu0 %v1779_v32 }
  0x8c   : > { %5457 = vmatprep.subr.mxu0 %v1778_v34 }
  0x8d   : > { %5458 = vmatpush3.msra.mxu0 %v1778_v34 }
  0x8e   : > { %5459 = vmatprep.subr.mxu0 %v1777_v36 }
  0x8f   : > { %5460 = vmatpush3.msra.mxu0 %v1777_v36 }
  0x90   : > { %5461 = vmatprep.subr.mxu0 %v1776_v37 }
  0x91   : > { %5462 = vmatpush3.msra.mxu0 %v1776_v37 }
  0x92   : > { %5463 = vmatprep.subr.mxu0 %v1775_v38 }
  0x93   : > { %5464 = vmatpush3.msra.mxu0 %v1775_v38 }
  0x94   : > { %5465 = vmatprep.subr.mxu0 %v1774_v39 }
  0x95   : > { %5466 = vmatpush3.msra.mxu0 %v1774_v39 }
  0x96   : > { %5595 = vmatprep.subr.mxu0 %v6494_v41 }
  0xee   : > { %v5143_v42 = vpop.f32.mrf.mxu0 }
  0xf0   : > { %v587_v44 = vpop.f32.mrf.mxu0 }
  0xf2   : > { %v5146_v45 = vpop.f32.mrf.mxu0 }
  0xf3   : > { %v603_v46 = vadd.f32 %v5146_v45, %v6500_v43 }
  0xf4   : > { %v597_v47 = vpop.f32.mrf.mxu0 }
  0xf5   : > { %v769_v48 = vmax.f32 %v603_v46, 0.0  ;;  %v598_v49 = vadd.f32 %v6500_v43, %v597_v47 }
  0xf6   : > { %v5149_v50 = vpop.f32.mrf.mxu0 }
  0xf7   : > { %805 = vst [vmem:[#allocation2 + $0x30] sm:$0xff] %v769_v48  ;;  %v768_v51 = vmax.f32 %v598_v49, 0.0  ;;  %v613_v52 = vadd.f32 %v5149_v50, %v6500_v43 }
  0xf8   : > { %v607_v53 = vpop.f32.mrf.mxu0 }
  0xf9   : > { %804 = vst [vmem:[#allocation2 + $0x28] sm:$0xff] %v768_v51  ;;  %v771_v54 = vmax.f32 %v613_v52, 0.0  ;;  %v608_v55 = vadd.f32 %v6500_v43, %v607_v53  ;;  %5230 = vmatprep.mubr.f32.mxu1 %v768_v51 }
  0xfa   : > { %v5152_v56 = vpop.f32.mrf.mxu0  ;;  %5231 = vmatmul.mubr.f32.gmra.mxu1 %v769_v48 }
  0xfb   : > { %807 = vst [vmem:[#allocation2 + $0x50] sm:$0xff] %v771_v54  ;;  %v770_v57 = vmax.f32 %v608_v55, 0.0  ;;  %v623_v58 = vadd.f32 %v5152_v56, %v6500_v43 }
  0xfc   : > { %v617_v59 = vpop.f32.mrf.mxu0 }
  0xfd   : > { %806 = vst [vmem:[#allocation2 + $0x48] sm:$0xff] %v770_v57  ;;  %v773_v60 = vmax.f32 %v623_v58, 0.0  ;;  %v618_v61 = vadd.f32 %v6500_v43, %v617_v59  ;;  %5233 = vmatprep.mubr.f32.mxu1 %v770_v57 }
  0xfe   : > { %v5155_v62 = vpop.f32.mrf.mxu0  ;;  %5234 = vmatmul.mubr.f32.gmra.mxu1 %v771_v54 }
  0xff   : > { %809 = vst [vmem:[#allocation2 + $0x70] sm:$0xff] %v773_v60  ;;  %v772_v63 = vmax.f32 %v618_v61, 0.0  ;;  %v633_v0 = vadd.f32 %v5155_v62, %v6500_v43 }
 0x100   : > { %v627_v1 = vpop.f32.mrf.mxu0  ;;  %v6509_v2 = vld [vmem:[#allocation2 + $0x27] sm:$0xff]  ;;  %v6511_v3 = vld [vmem:[#allocation2 + $0x2f] sm:$0xff] }
 0x101   : > { %808 = vst [vmem:[#allocation2 + $0x68] sm:$0xff] %v772_v63  ;;  %v775_v4 = vmax.f32 %v633_v0, 0.0  ;;  %v628_v5 = vadd.f32 %v6500_v43, %v627_v1  ;;  %5310 = vmatprep.mubr.f32.mxu0 %v6509_v2  ;;  %5236 = vmatprep.mubr.f32.mxu1 %v772_v63 }
 0x102   : > { %v5158_v6 = vpop.f32.mrf.mxu0  ;;  %5311 = vmatmul.mubr.f32.gmra.mxu0 %v6511_v3  ;;  %5237 = vmatmul.mubr.f32.gmra.mxu1 %v773_v60 }
 0x103   : > { %811 = vst [vmem:[#allocation2 + $0x90] sm:$0xff] %v775_v4  ;;  %v774_v7 = vmax.f32 %v628_v5, 0.0  ;;  %v643_v8 = vadd.f32 %v5158_v6, %v6500_v43 }
 0x104   : > { %v637_v9 = vpop.f32.mrf.mxu0  ;;  %v6517_v10 = vld [vmem:[#allocation2 + $0x47] sm:$0xff]  ;;  %v6519_v11 = vld [vmem:[#allocation2 + $0x4f] sm:$0xff] }
 0x105   : > { %810 = vst [vmem:[#allocation2 + $0x88] sm:$0xff] %v774_v7  ;;  %v777_v12 = vmax.f32 %v643_v8, 0.0  ;;  %v638_v13 = vadd.f32 %v6500_v43, %v637_v9  ;;  %5313 = vmatprep.mubr.f32.mxu0 %v6517_v10  ;;  %5239 = vmatprep.mubr.f32.mxu1 %v774_v7 }
 0x106   : > { %v5161_v14 = vpop.f32.mrf.mxu0  ;;  %5314 = vmatmul.mubr.f32.gmra.mxu0 %v6519_v11  ;;  %5240 = vmatmul.mubr.f32.gmra.mxu1 %v775_v4 }
 0x107   : > { %813 = vst [vmem:[#allocation2 + $0xb0] sm:$0xff] %v777_v12  ;;  %v776_v15 = vmax.f32 %v638_v13, 0.0  ;;  %v653_v16 = vadd.f32 %v5161_v14, %v6500_v43 }
 0x108   : > { %v647_v17 = vpop.f32.mrf.mxu0  ;;  %v6525_v18 = vld [vmem:[#allocation2 + $0x67] sm:$0xff]  ;;  %v6527_v19 = vld [vmem:[#allocation2 + $0x6f] sm:$0xff] }
 0x109   : > { %812 = vst [vmem:[#allocation2 + $0xa8] sm:$0xff] %v776_v15  ;;  %v779_v20 = vmax.f32 %v653_v16, 0.0  ;;  %v648_v21 = vadd.f32 %v6500_v43, %v647_v17  ;;  %5316 = vmatprep.mubr.f32.mxu0 %v6525_v18  ;;  %5242 = vmatprep.mubr.f32.mxu1 %v776_v15 }
 0x10a   : > { %v5164_v22 = vpop.f32.mrf.mxu0  ;;  %5317 = vmatmul.mubr.f32.gmra.mxu0 %v6527_v19  ;;  %5243 = vmatmul.mubr.f32.gmra.mxu1 %v777_v12 }
 0x10b   : > { %815 = vst [vmem:[#allocation2 + $0xd0] sm:$0xff] %v779_v20  ;;  %v778_v23 = vmax.f32 %v648_v21, 0.0  ;;  %v663_v24 = vadd.f32 %v5164_v22, %v6500_v43 }
 0x10c   : > { %v657_v25 = vpop.f32.mrf.mxu0  ;;  %v6533_v26 = vld [vmem:[#allocation2 + $0x87] sm:$0xff]  ;;  %v6535_v27 = vld [vmem:[#allocation2 + $0x8f] sm:$0xff] }
 0x10d   : > { %814 = vst [vmem:[#allocation2 + $0xc8] sm:$0xff] %v778_v23  ;;  %v781_v28 = vmax.f32 %v663_v24, 0.0  ;;  %v658_v29 = vadd.f32 %v6500_v43, %v657_v25  ;;  %5319 = vmatprep.mubr.f32.mxu0 %v6533_v26  ;;  %5245 = vmatprep.mubr.f32.mxu1 %v778_v23 }
 0x10e   : > { %v5167_v30 = vpop.f32.mrf.mxu0  ;;  %5320 = vmatmul.mubr.f32.gmra.mxu0 %v6535_v27  ;;  %5246 = vmatmul.mubr.f32.gmra.mxu1 %v779_v20 }
 0x10f   : > { %817 = vst [vmem:[#allocation2 + $0xf0] sm:$0xff] %v781_v28  ;;  %v780_v31 = vmax.f32 %v658_v29, 0.0  ;;  %v673_v32 = vadd.f32 %v5167_v30, %v6500_v43 }
 0x110   : > { %v667_v33 = vpop.f32.mrf.mxu0  ;;  %v6541_v34 = vld [vmem:[#allocation2 + $0xa7] sm:$0xff]  ;;  %v6543_v35 = vld [vmem:[#allocation2 + $0xaf] sm:$0xff] }
 0x111   : > { %816 = vst [vmem:[#allocation2 + $0xe8] sm:$0xff] %v780_v31  ;;  %v783_v36 = vmax.f32 %v673_v32, 0.0  ;;  %v668_v37 = vadd.f32 %v6500_v43, %v667_v33  ;;  %5322 = vmatprep.mubr.f32.mxu0 %v6541_v34  ;;  %5248 = vmatprep.mubr.f32.mxu1 %v780_v31 }
 0x112   : > { %v5170_v38 = vpop.f32.mrf.mxu0  ;;  %5323 = vmatmul.mubr.f32.gmra.mxu0 %v6543_v35  ;;  %5249 = vmatmul.mubr.f32.gmra.mxu1 %v781_v28 }
 0x113   : > { %819 = vst [vmem:[#allocation2 + $0x110] sm:$0xff] %v783_v36  ;;  %v782_v39 = vmax.f32 %v668_v37, 0.0  ;;  %v683_v42 = vadd.f32 %v5170_v38, %v6500_v43 }
 0x114   : > { %v677_v44 = vpop.f32.mrf.mxu0  ;;  %v6549_v45 = vld [vmem:[#allocation2 + $0xc7] sm:$0xff]  ;;  %v6551_v46 = vld [vmem:[#allocation2 + $0xcf] sm:$0xff] }
 0x115   : > { %818 = vst [vmem:[#allocation2 + $0x108] sm:$0xff] %v782_v39  ;;  %v785_v47 = vmax.f32 %v683_v42, 0.0  ;;  %v678_v48 = vadd.f32 %v6500_v43, %v677_v44  ;;  %5325 = vmatprep.mubr.f32.mxu0 %v6549_v45  ;;  %5251 = vmatprep.mubr.f32.mxu1 %v782_v39 }
 0x116   : > { %v5173_v49 = vpop.f32.mrf.mxu0  ;;  %5326 = vmatmul.mubr.f32.gmra.mxu0 %v6551_v46  ;;  %5252 = vmatmul.mubr.f32.gmra.mxu1 %v783_v36 }
 0x117   : > { %821 = vst [vmem:[#allocation2 + $0x130] sm:$0xff] %v785_v47  ;;  %v784_v50 = vmax.f32 %v678_v48, 0.0  ;;  %v693_v51 = vadd.f32 %v5173_v49, %v6500_v43 }
 0x118   : > { %v687_v52 = vpop.f32.mrf.mxu0  ;;  %v6557_v53 = vld [vmem:[#allocation2 + $0xe7] sm:$0xff]  ;;  %v6559_v54 = vld [vmem:[#allocation2 + $0xef] sm:$0xff] }
 0x119   : > { %820 = vst [vmem:[#allocation2 + $0x128] sm:$0xff] %v784_v50  ;;  %v787_v55 = vmax.f32 %v693_v51, 0.0  ;;  %v688_v56 = vadd.f32 %v6500_v43, %v687_v52  ;;  %5328 = vmatprep.mubr.f32.mxu0 %v6557_v53  ;;  %5254 = vmatprep.mubr.f32.mxu1 %v784_v50 }
 0x11a   : > { %v5176_v57 = vpop.f32.mrf.mxu0  ;;  %5329 = vmatmul.mubr.f32.gmra.mxu0 %v6559_v54  ;;  %5255 = vmatmul.mubr.f32.gmra.mxu1 %v785_v47 }
 0x11b   : > { %823 = vst [vmem:[#allocation2 + $0x150] sm:$0xff] %v787_v55  ;;  %v786_v58 = vmax.f32 %v688_v56, 0.0  ;;  %v703_v59 = vadd.f32 %v5176_v57, %v6500_v43 }
 0x11c   : > { %v697_v60 = vpop.f32.mrf.mxu0  ;;  %v6565_v61 = vld [vmem:[#allocation2 + $0x107] sm:$0xff]  ;;  %v6567_v62 = vld [vmem:[#allocation2 + $0x10f] sm:$0xff] }
 0x11d   : > { %822 = vst [vmem:[#allocation2 + $0x148] sm:$0xff] %v786_v58  ;;  %v789_v63 = vmax.f32 %v703_v59, 0.0  ;;  %v698_v0 = vadd.f32 %v6500_v43, %v697_v60  ;;  %5331 = vmatprep.mubr.f32.mxu0 %v6565_v61  ;;  %5257 = vmatprep.mubr.f32.mxu1 %v786_v58  ;;  %v1435_v59 = vld [vmem:[#allocation2 + $0x11] sm:$0xff] }
 0x11e   : > { %v5179_v1 = vpop.f32.mrf.mxu0  ;;  %5332 = vmatmul.mubr.f32.gmra.mxu0 %v6567_v62  ;;  %5258 = vmatmul.mubr.f32.gmra.mxu1 %v787_v55  ;;  %v1434_v55 = vld [vmem:[#allocation2 + $0x9] sm:$0xff] }
 0x11f   : > { %825 = vst [vmem:[#allocation2 + $0x170] sm:$0xff] %v789_v63  ;;  %v788_v4 = vmax.f32 %v698_v0, 0.0  ;;  %v713_v5 = vadd.f32 %v5179_v1, %v6500_v43 }
 0x120   : > { %v707_v6 = vpop.f32.mrf.mxu0  ;;  %v6573_v7 = vld [vmem:[#allocation2 + $0x127] sm:$0xff]  ;;  %v6575_v8 = vld [vmem:[#allocation2 + $0x12f] sm:$0xff] }
 0x121   : > { %824 = vst [vmem:[#allocation2 + $0x168] sm:$0xff] %v788_v4  ;;  %v791_v9 = vmax.f32 %v713_v5, 0.0  ;;  %v708_v12 = vadd.f32 %v6500_v43, %v707_v6  ;;  %5334 = vmatprep.mubr.f32.mxu0 %v6573_v7  ;;  %5260 = vmatprep.mubr.f32.mxu1 %v788_v4  ;;  %v2094_v4 = vld [vmem:[#allocation3 + $0x270] sm:$0xff] }
 0x122   : > { %v5182_v13 = vpop.f32.mrf.mxu0  ;;  %5335 = vmatmul.mubr.f32.gmra.mxu0 %v6575_v8  ;;  %5261 = vmatmul.mubr.f32.gmra.mxu1 %v789_v63 }
 0x123   : > { %827 = vst [vmem:[#allocation2 + $0x190] sm:$0xff] %v791_v9  ;;  %v790_v14 = vmax.f32 %v708_v12, 0.0  ;;  %v723_v15 = vadd.f32 %v5182_v13, %v6500_v43  ;;  %v6649_v12 = vld [vmem:[#allocation2 + $0x31] sm:$0xff]  ;;  %v2093_v13 = vld [vmem:[#allocation3 + $0x268] sm:$0xff] }
 0x124   : > { %v717_v16 = vpop.f32.mrf.mxu0  ;;  %v6581_v17 = vld [vmem:[#allocation2 + $0x147] sm:$0xff]  ;;  %v6583_v20 = vld [vmem:[#allocation2 + $0x14f] sm:$0xff] }
 0x125   : > { %826 = vst [vmem:[#allocation2 + $0x188] sm:$0xff] %v790_v14  ;;  %v793_v21 = vmax.f32 %v723_v15, 0.0  ;;  %v718_v22 = vadd.f32 %v6500_v43, %v717_v16  ;;  %5337 = vmatprep.mubr.f32.mxu0 %v6581_v17  ;;  %5263 = vmatprep.mubr.f32.mxu1 %v790_v14  ;;  %v5229_v14 = vpop.f32.mrf.mxu1 }
 0x126   : > { %v5185_v23 = vpop.f32.mrf.mxu0  ;;  %5338 = vmatmul.mubr.f32.gmra.mxu0 %v6583_v20  ;;  %5264 = vmatmul.mubr.f32.gmra.mxu1 %v791_v9 }
 0x127   : > { %829 = vst [vmem:[#allocation2 + $0x1b0] sm:$0xff] %v793_v21  ;;  %v6588_v24 = vmax.f32 %v718_v22, 0.0  ;;  %v733_v25 = vadd.f32 %v5185_v23, %v6500_v43  ;;  %v2092_v22 = vld [vmem:[#allocation3 + $0x260] sm:$0xff]  ;;  %v6663_v23 = vld [vmem:[#allocation2 + $0x69] sm:$0xff] }
 0x128   : > { %v727_v28 = vpop.f32.mrf.mxu0  ;;  %v6591_v29 = vld [vmem:[#allocation2 + $0x167] sm:$0xff]  ;;  %v6593_v30 = vld [vmem:[#allocation2 + $0x16f] sm:$0xff] }
 0x129   : > { %828 = vst [vmem:[#allocation2 + $0x1a8] sm:$0xff] %v6588_v24  ;;  %v795_v31 = vmax.f32 %v733_v25, 0.0  ;;  %v728_v32 = vadd.f32 %v6500_v43, %v727_v28  ;;  %5340 = vmatprep.mubr.f32.mxu0 %v6591_v29  ;;  %5266 = vmatprep.mubr.f32.mxu1 %v6588_v24  ;;  %v2400_v25 = vld [vmem:[#allocation3 + $0x2f0] sm:$0xff]  ;;  %v2091_v28 = vld [vmem:[#allocation3 + $0x258] sm:$0xff] }
 0x12a   : > { %v5188_v33 = vpop.f32.mrf.mxu0  ;;  %5341 = vmatmul.mubr.f32.gmra.mxu0 %v6593_v30  ;;  %5267 = vmatmul.mubr.f32.gmra.mxu1 %v793_v21  ;;  %v6659_v21 = vld [vmem:[#allocation2 + $0x51] sm:$0xff] }
 0x12b   : > { %831 = vst [vmem:[#allocation2 + $0x1d0] sm:$0xff] %v795_v31  ;;  %v6600_v36 = vmax.f32 %v728_v32, 0.0  ;;  %v743_v37 = vadd.f32 %v5188_v33, %v6500_v43  ;;  %v2398_v32 = vld [vmem:[#allocation3 + $0x2e0] sm:$0xff]  ;;  %v2089_v33 = vld [vmem:[#allocation3 + $0x248] sm:$0xff] }
 0x12c   : > { %v737_v38 = vpop.f32.mrf.mxu0  ;;  %v6603_v39 = vld [vmem:[#allocation2 + $0x187] sm:$0xff]  ;;  %v6605_v42 = vld [vmem:[#allocation2 + $0x18f] sm:$0xff] }
 0x12d   : > { %830 = vst [vmem:[#allocation2 + $0x1c8] sm:$0xff] %v6600_v36  ;;  %v797_v44 = vmax.f32 %v743_v37, 0.0  ;;  %v738_v47 = vadd.f32 %v6500_v43, %v737_v38  ;;  %5343 = vmatprep.mubr.f32.mxu0 %v6603_v39  ;;  %5269 = vmatprep.mubr.f32.mxu1 %v6600_v36  ;;  %v2397_v37 = vld [vmem:[#allocation3 + $0x2d8] sm:$0xff]  ;;  %v2088_v38 = vld [vmem:[#allocation3 + $0x240] sm:$0xff] }
 0x12e   : > { %5344 = vmatmul.mubr.f32.gmra.mxu0 %v6605_v42  ;;  %5270 = vmatmul.mubr.f32.gmra.mxu1 %v795_v31  ;;  %v5191_v48 = vpop.f32.mrf.mxu0  ;;  %v2399_v31 = vld [vmem:[#allocation3 + $0x2e8] sm:$0xff] }
 0x12f   : > { %833 = vst [vmem:[#allocation2 + $0x1f0] sm:$0xff] %v797_v44  ;;  %v6612_v49 = vmax.f32 %v738_v47, 0.0  ;;  %v6615_v50 = vadd.f32 %v5191_v48, %v6500_v43  ;;  %v2087_v47 = vld [vmem:[#allocation3 + $0x238] sm:$0xff]  ;;  %v2395_v48 = vld [vmem:[#allocation3 + $0x2c8] sm:$0xff] }
 0x130   : > { %v6617_v51 = vld [vmem:[#allocation2 + $0x1a7] sm:$0xff]  ;;  %v6619_v52 = vld [vmem:[#allocation2 + $0x1af] sm:$0xff]  ;;  %v747_v56 = vpop.f32.mrf.mxu0 }
 0x131   : > { %832 = vst [vmem:[#allocation2 + $0x1e8] sm:$0xff] %v6612_v49  ;;  %5346 = vmatprep.mubr.f32.mxu0 %v6617_v51  ;;  %5272 = vmatprep.mubr.f32.mxu1 %v6612_v49  ;;  %v799_v57 = vmax.f32 %v6615_v50, 0.0  ;;  %v6626_v58 = vadd.f32 %v6500_v43, %v747_v56  ;;  %v6640_v43 = vld [vmem:[#allocation2 + $0x29] sm:$0xff]  ;;  %v2394_v56 = vld [vmem:[#allocation3 + $0x2c0] sm:$0xff] }
 0x132   : > { %5347 = vmatmul.mubr.f32.gmra.mxu0 %v6619_v52  ;;  %5273 = vmatmul.mubr.f32.gmra.mxu1 %v797_v44  ;;  %v5194_v1 = vpop.f32.mrf.mxu0  ;;  %v2396_v44 = vld [vmem:[#allocation3 + $0x2d0] sm:$0xff] }
 0x133   : > { %5387 = vmatprep.mubr.f32.mxu1 %v1434_v55  ;;  %835 = vst [vmem:[#allocation2 + $0x210] sm:$0xff] %v799_v57  ;;  %v798_v60 = vmax.f32 %v6626_v58, 0.0  ;;  %v2086_v55 = vld [vmem:[#allocation3 + $0x230] sm:$0xff]  ;;  %v2393_v1 = vld [vmem:[#allocation3 + $0x2b8] sm:$0xff] }
 0x134   : > { %v6632_v63 = vld [vmem:[#allocation2 + $0x1c7] sm:$0xff]  ;;  %v6634_v0 = vld [vmem:[#allocation2 + $0x1cf] sm:$0xff]  ;;  %v757_v5 = vpop.f32.mrf.mxu0 }
 0x135   : > { %5349 = vmatprep.mubr.f32.mxu0 %v6632_v63  ;;  %834 = vst [vmem:[#allocation2 + $0x208] sm:$0xff] %v798_v60  ;;  %v2392_v5 = vld [vmem:[#allocation3 + $0x2b0] sm:$0xff] }
 0x136   : > { %5350 = vmatmul.mubr.f32.gmra.mxu0 %v6634_v0  ;;  %5388 = vmatmul.mubr.f32.vlgmr.msra.gmra.mxu1 %v1435_v59  ;;  %v5309_v15 = vpop.f32.mrf.mxu0  ;;  %v2085_v59 = vld [vmem:[#allocation3 + $0x228] sm:$0xff] }
 0x137   : > { %5516 = vmatpush3.msra.mxu1 %v6491_v40  ;;  %5390 = vmatprep.mubr.f32.mxu1 %v6640_v43  ;;  %v6653_v40 = vld [vmem:[#allocation2 + $0x49] sm:$0xff]  ;;  %v6655_v16 = vadd.f32 %v5309_v15, %v5229_v14 }
 0x138   : > { %v6644_v6 = vld [vmem:[#allocation2 + $0x1e7] sm:$0xff]  ;;  %v6646_v9 = vld [vmem:[#allocation2 + $0x1ef] sm:$0xff]  ;;  %5517 = vmatprep.subr.mxu1 %v2094_v4 }
 0x139   : > { %5352 = vmatprep.mubr.f32.mxu0 %v6644_v6  ;;  %5518 = vmatpush3.msra.mxu1 %v2094_v4  ;;  %v2084_v4 = vld [vmem:[#allocation3 + $0x220] sm:$0xff]  ;;  %v2391_v14 = vld [vmem:[#allocation3 + $0x2a8] sm:$0xff]  ;;  %v2082_v15 = vld [vmem:[#allocation3 + $0x210] sm:$0xff] }
 0x13a   : > { %5353 = vmatmul.mubr.f32.gmra.mxu0 %v6646_v9  ;;  %5391 = vmatmul.mubr.f32.gmra.mxu1 %v6649_v12  ;;  %v6897_v50 = vld [vmem:[#allocation2 + $0x211] sm:$0xff] }
 0x13b   : > { %5467 = vmatprep.mubr.f32.mxu0 %v6509_v2  ;;  %5393 = vmatprep.mubr.f32.mxu1 %v6653_v40  ;;  %v6668_v2 = vld [vmem:[#allocation2 + $0x71] sm:$0xff] }
 0x13c   : > { %5519 = vmatprep.subr.mxu1 %v2093_v13  ;;  %v6892_v58 = vld [vmem:[#allocation2 + $0x209] sm:$0xff] }
 0x13d   : > { %5520 = vmatpush3.msra.mxu1 %v2093_v13  ;;  %v2083_v13 = vld [vmem:[#allocation3 + $0x218] sm:$0xff] }
 0x13e   : > { %5468 = vmatmul.mubr.f32.vlgmr.msra.gmra.mxu0 %v6511_v3  ;;  %5394 = vmatmul.mubr.f32.gmra.mxu1 %v6659_v21  ;;  %v6672_v3 = vld [vmem:[#allocation2 + $0x89] sm:$0xff] }
 0x13f   : > { %5470 = vmatprep.mubr.f32.mxu0 %v6517_v10  ;;  %5396 = vmatprep.mubr.f32.mxu1 %v6663_v23  ;;  %v6676_v10 = vld [vmem:[#allocation2 + $0x91] sm:$0xff] }
 0x140   : > { %5521 = vmatprep.subr.mxu1 %v2092_v22  ;;  %5596 = vmatpush3.msra.mxu0 %v6494_v41  ;;  %v2090_v41 = vld [vmem:[#allocation3 + $0x250] sm:$0xff] }
 0x141   : > { %5522 = vmatpush3.msra.mxu1 %v2092_v22  ;;  %5597 = vmatprep.subr.mxu0 %v2400_v25  ;;  %v2390_v22 = vld [vmem:[#allocation3 + $0x2a0] sm:$0xff] }
 0x142   : > { %5471 = vmatmul.mubr.f32.gmra.mxu0 %v6519_v11  ;;  %5397 = vmatmul.mubr.f32.gmra.mxu1 %v6668_v2  ;;  %v6680_v11 = vld [vmem:[#allocation2 + $0xa9] sm:$0xff] }
 0x143   : > { %5473 = vmatprep.mubr.f32.mxu0 %v6525_v18  ;;  %5399 = vmatprep.mubr.f32.mxu1 %v6672_v3  ;;  %v6684_v18 = vld [vmem:[#allocation2 + $0xb1] sm:$0xff] }
 0x144   : > { %5523 = vmatprep.subr.mxu1 %v2091_v28  ;;  %5598 = vmatpush3.msra.mxu0 %v2400_v25  ;;  %v2081_v25 = vld [vmem:[#allocation3 + $0x208] sm:$0xff] }
 0x145   : > { %5524 = vmatpush3.msra.mxu1 %v2091_v28  ;;  %5599 = vmatprep.subr.mxu0 %v2399_v31  ;;  %v2389_v28 = vld [vmem:[#allocation3 + $0x298] sm:$0xff] }
 0x146   : > { %5474 = vmatmul.mubr.f32.gmra.mxu0 %v6527_v19  ;;  %5400 = vmatmul.mubr.f32.gmra.mxu1 %v6676_v10  ;;  %v6688_v19 = vld [vmem:[#allocation2 + $0xc9] sm:$0xff] }
 0x147   : > { %5476 = vmatprep.mubr.f32.mxu0 %v6533_v26  ;;  %5402 = vmatprep.mubr.f32.mxu1 %v6680_v11  ;;  %v6692_v26 = vld [vmem:[#allocation2 + $0xd1] sm:$0xff] }
 0x148   : > { %5525 = vmatprep.subr.mxu1 %v2090_v41  ;;  %5600 = vmatpush3.msra.mxu0 %v2399_v31  ;;  %v2080_v31 = vld [vmem:[#allocation3 + $0x200] sm:$0xff] }
 0x149   : > { %5526 = vmatpush3.msra.mxu1 %v2090_v41  ;;  %5601 = vmatprep.subr.mxu0 %v2398_v32  ;;  %v2388_v41 = vld [vmem:[#allocation3 + $0x290] sm:$0xff] }
 0x14a   : > { %5477 = vmatmul.mubr.f32.gmra.mxu0 %v6535_v27  ;;  %5403 = vmatmul.mubr.f32.gmra.mxu1 %v6684_v18  ;;  %v6696_v27 = vld [vmem:[#allocation2 + $0xe9] sm:$0xff] }
 0x14b   : > { %5479 = vmatprep.mubr.f32.mxu0 %v6541_v34  ;;  %5405 = vmatprep.mubr.f32.mxu1 %v6688_v19  ;;  %v6700_v34 = vld [vmem:[#allocation2 + $0xf1] sm:$0xff] }
 0x14c   : > { %5527 = vmatprep.subr.mxu1 %v2089_v33  ;;  %5602 = vmatpush3.msra.mxu0 %v2398_v32  ;;  %v2387_v32 = vld [vmem:[#allocation3 + $0x288] sm:$0xff] }
 0x14d   : > { %5528 = vmatpush3.msra.mxu1 %v2089_v33  ;;  %5603 = vmatprep.subr.mxu0 %v2397_v37  ;;  %v2047_v33 = vld [vmem:[#allocation2 + $0x28] sm:$0xff] }
 0x14e   : > { %5480 = vmatmul.mubr.f32.gmra.mxu0 %v6543_v35  ;;  %5406 = vmatmul.mubr.f32.gmra.mxu1 %v6692_v26  ;;  %v6704_v35 = vld [vmem:[#allocation2 + $0x109] sm:$0xff] }
 0x14f   : > { %5482 = vmatprep.mubr.f32.mxu0 %v6549_v45  ;;  %5408 = vmatprep.mubr.f32.mxu1 %v6696_v27  ;;  %v6708_v45 = vld [vmem:[#allocation2 + $0x111] sm:$0xff] }
 0x150   : > { %5529 = vmatprep.subr.mxu1 %v2088_v38  ;;  %5604 = vmatpush3.msra.mxu0 %v2397_v37  ;;  %v2386_v37 = vld [vmem:[#allocation3 + $0x280] sm:$0xff] }
 0x151   : > { %5530 = vmatpush3.msra.mxu1 %v2088_v38  ;;  %5605 = vmatprep.subr.mxu0 %v2396_v44  ;;  %v6771_v38 = vld [vmem:[#allocation3 + $0x3f8] sm:$0xff] }
 0x152   : > { %5483 = vmatmul.mubr.f32.gmra.mxu0 %v6551_v46  ;;  %5409 = vmatmul.mubr.f32.gmra.mxu1 %v6700_v34  ;;  %v6712_v46 = vld [vmem:[#allocation2 + $0x129] sm:$0xff] }
 0x153   : > { %5485 = vmatprep.mubr.f32.mxu0 %v6557_v53  ;;  %5411 = vmatprep.mubr.f32.mxu1 %v6704_v35  ;;  %v6716_v53 = vld [vmem:[#allocation2 + $0x131] sm:$0xff] }
 0x154   : > { %5531 = vmatprep.subr.mxu1 %v2087_v47  ;;  %5606 = vmatpush3.msra.mxu0 %v2396_v44  ;;  %v2707_v44 = vld [vmem:[#allocation3 + $0x370] sm:$0xff] }
 0x155   : > { %5532 = vmatpush3.msra.mxu1 %v2087_v47  ;;  %5607 = vmatprep.subr.mxu0 %v2395_v48  ;;  %v6777_v47 = vld [vmem:[#allocation2 + $0x48] sm:$0xff] }
 0x156   : > { %5486 = vmatmul.mubr.f32.gmra.mxu0 %v6559_v54  ;;  %5412 = vmatmul.mubr.f32.gmra.mxu1 %v6708_v45  ;;  %v6720_v54 = vld [vmem:[#allocation2 + $0x149] sm:$0xff] }
 0x157   : > { %5488 = vmatprep.mubr.f32.mxu0 %v6565_v61  ;;  %5414 = vmatprep.mubr.f32.mxu1 %v6712_v46  ;;  %v6724_v61 = vld [vmem:[#allocation2 + $0x151] sm:$0xff] }
 0x158   : > { %5533 = vmatprep.subr.mxu1 %v2086_v55  ;;  %5608 = vmatpush3.msra.mxu0 %v2395_v48  ;;  %v2706_v48 = vld [vmem:[#allocation3 + $0x368] sm:$0xff] }
 0x159   : > { %5534 = vmatpush3.msra.mxu1 %v2086_v55  ;;  %5609 = vmatprep.subr.mxu0 %v2394_v56  ;;  %v2705_v55 = vld [vmem:[#allocation3 + $0x360] sm:$0xff] }
 0x15a   : > { %5489 = vmatmul.mubr.f32.gmra.mxu0 %v6567_v62  ;;  %5415 = vmatmul.mubr.f32.gmra.mxu1 %v6716_v53  ;;  %v6728_v62 = vld [vmem:[#allocation2 + $0x169] sm:$0xff] }
 0x15b   : > { %5491 = vmatprep.mubr.f32.mxu0 %v6573_v7  ;;  %5417 = vmatprep.mubr.f32.mxu1 %v6720_v54  ;;  %v6732_v7 = vld [vmem:[#allocation2 + $0x171] sm:$0xff] }
 0x15c   : > { %5535 = vmatprep.subr.mxu1 %v2085_v59  ;;  %5610 = vmatpush3.msra.mxu0 %v2394_v56  ;;  %v6786_v56 = vld [vmem:[#allocation2 + $0x68] sm:$0xff] }
 0x15d   : > { %5536 = vmatpush3.msra.mxu1 %v2085_v59  ;;  %5611 = vmatprep.subr.mxu0 %v2393_v1  ;;  %v2704_v59 = vld [vmem:[#allocation3 + $0x358] sm:$0xff] }
 0x15e   : > { %5492 = vmatmul.mubr.f32.gmra.mxu0 %v6575_v8  ;;  %5418 = vmatmul.mubr.f32.gmra.mxu1 %v6724_v61  ;;  %v6736_v8 = vld [vmem:[#allocation2 + $0x189] sm:$0xff] }
 0x15f   : > { %5494 = vmatprep.mubr.f32.mxu0 %v6581_v17  ;;  %5420 = vmatprep.mubr.f32.mxu1 %v6728_v62  ;;  %v6740_v17 = vld [vmem:[#allocation2 + $0x191] sm:$0xff] }
 0x160   : > { %5537 = vmatprep.subr.mxu1 %v2084_v4  ;;  %5612 = vmatpush3.msra.mxu0 %v2393_v1  ;;  %v6791_v1 = vld [vmem:[#allocation2 + $0x70] sm:$0xff] }
 0x161   : > { %5538 = vmatpush3.msra.mxu1 %v2084_v4  ;;  %5613 = vmatprep.subr.mxu0 %v2392_v5  ;;  %v6794_v4 = vld [vmem:[#allocation2 + $0x88] sm:$0xff] }
 0x162   : > { %5495 = vmatmul.mubr.f32.gmra.mxu0 %v6583_v20  ;;  %5421 = vmatmul.mubr.f32.gmra.mxu1 %v6732_v7  ;;  %v6744_v20 = vld [vmem:[#allocation2 + $0x1a9] sm:$0xff] }
 0x163   : > { %5497 = vmatprep.mubr.f32.mxu0 %v6591_v29  ;;  %5423 = vmatprep.mubr.f32.mxu1 %v6736_v8  ;;  %v6748_v29 = vld [vmem:[#allocation2 + $0x1b1] sm:$0xff] }
 0x164   : > { %5539 = vmatprep.subr.mxu1 %v2083_v13  ;;  %5614 = vmatpush3.msra.mxu0 %v2392_v5  ;;  %v2702_v5 = vld [vmem:[#allocation3 + $0x348] sm:$0xff] }
 0x165   : > { %5540 = vmatpush3.msra.mxu1 %v2083_v13  ;;  %5615 = vmatprep.subr.mxu0 %v2391_v14  ;;  %v6802_v13 = vld [vmem:[#allocation2 + $0xa8] sm:$0xff] }
 0x166   : > { %5498 = vmatmul.mubr.f32.gmra.mxu0 %v6593_v30  ;;  %5424 = vmatmul.mubr.f32.gmra.mxu1 %v6740_v17  ;;  %v6752_v30 = vld [vmem:[#allocation2 + $0x1c9] sm:$0xff] }
 0x167   : > { %5500 = vmatprep.mubr.f32.mxu0 %v6603_v39  ;;  %5426 = vmatprep.mubr.f32.mxu1 %v6744_v20  ;;  %v6756_v39 = vld [vmem:[#allocation2 + $0x1d1] sm:$0xff] }
 0x168   : > { %5541 = vmatprep.subr.mxu1 %v2082_v15  ;;  %5616 = vmatpush3.msra.mxu0 %v2391_v14  ;;  %v2700_v14 = vld [vmem:[#allocation3 + $0x338] sm:$0xff] }
 0x169   : > { %5542 = vmatpush3.msra.mxu1 %v2082_v15  ;;  %5617 = vmatprep.subr.mxu0 %v2390_v22  ;;  %v6810_v15 = vld [vmem:[#allocation2 + $0xc8] sm:$0xff] }
 0x16a   : > { %5501 = vmatmul.mubr.f32.gmra.mxu0 %v6605_v42  ;;  %5427 = vmatmul.mubr.f32.gmra.mxu1 %v6748_v29  ;;  %v6760_v42 = vld [vmem:[#allocation2 + $0x1e9] sm:$0xff] }
 0x16b   : > { %5503 = vmatprep.mubr.f32.mxu0 %v6617_v51  ;;  %5429 = vmatprep.mubr.f32.mxu1 %v6752_v30  ;;  %v6764_v51 = vld [vmem:[#allocation2 + $0x1f1] sm:$0xff] }
 0x16c   : > { %5543 = vmatprep.subr.mxu1 %v2081_v25  ;;  %5618 = vmatpush3.msra.mxu0 %v2390_v22  ;;  %v3013_v22 = vld [vmem:[#allocation3 + $0x3f0] sm:$0xff] }
 0x16d   : > { %5544 = vmatpush3.msra.mxu1 %v2081_v25  ;;  %5619 = vmatprep.subr.mxu0 %v2389_v28  ;;  %v3012_v25 = vld [vmem:[#allocation3 + $0x3e8] sm:$0xff] }
 0x16e   : > { %5504 = vmatmul.mubr.f32.gmra.mxu0 %v6619_v52  ;;  %5430 = vmatmul.mubr.f32.gmra.mxu1 %v6756_v39  ;;  %v2708_v52 = vld [vmem:[#allocation3 + $0x378] sm:$0xff] }
 0x16f   : > { %5506 = vmatprep.mubr.f32.mxu0 %v6632_v63  ;;  %5432 = vmatprep.mubr.f32.mxu1 %v6760_v42  ;;  %v6769_v63 = vld [vmem:[#allocation2 + $0x207] sm:$0xff] }
 0x170   : > { %5620 = vmatpush3.msra.mxu0 %v2389_v28  ;;  %5545 = vmatprep.subr.mxu1 %v2080_v31  ;;  %v2698_v28 = vld [vmem:[#allocation3 + $0x328] sm:$0xff] }
 0x171   : > { %5621 = vmatprep.subr.mxu0 %v2388_v41  ;;  %5546 = vmatpush3.msra.mxu1 %v2080_v31  ;;  %v6827_v31 = vld [vmem:[#allocation2 + $0x108] sm:$0xff] }
 0x172   : > { %5507 = vmatmul.mubr.f32.gmra.mxu0 %v6634_v0  ;;  %5433 = vmatmul.mubr.f32.gmra.mxu1 %v6764_v51  ;;  %v6775_v0 = vld [vmem:[#allocation2 + $0x20f] sm:$0xff] }
 0x173   : > { %5509 = vmatprep.mubr.f32.mxu0 %v6644_v6  ;;  %5622 = vmatpush3.msra.mxu0 %v2388_v41  ;;  %v2048_v6 = vld [vmem:[#allocation2 + $0x30] sm:$0xff]  ;;  %v3010_v41 = vld [vmem:[#allocation3 + $0x3d8] sm:$0xff] }
 0x174   : > { %5623 = vmatprep.subr.mxu0 %v2387_v32  ;;  %5547 = vmatprep.mubr.f32.mxu1 %v2047_v33  ;;  %v3008_v33 = vld [vmem:[#allocation3 + $0x3c8] sm:$0xff] }
 0x175   : > { %5624 = vmatpush3.msra.mxu0 %v2387_v32  ;;  %5675 = vmatprep.subr.mxu1 %v2708_v52  ;;  %v6835_v32 = vld [vmem:[#allocation2 + $0x128] sm:$0xff] }
 0x176   : > { %5510 = vmatmul.mubr.f32.gmra.mxu0 %v6646_v9  ;;  %5625 = vmatprep.subr.mxu0 %v2386_v37  ;;  %v6783_v9 = vld [vmem:[#allocation2 + $0x50] sm:$0xff] }
 0x177   : > { %5512 = vmatprep.mubr.f32.mxu0 %v6769_v63  ;;  %5626 = vmatpush3.msra.mxu0 %v2386_v37  ;;  %v3007_v37 = vld [vmem:[#allocation3 + $0x3c0] sm:$0xff] }
 0x178   : > { %5548 = vmatmul.mubr.f32.vlgmr.msra.gmra.mxu1 %v2048_v6  ;;  %5755 = vmatprep.subr.mxu0 %v6771_v38  ;;  %v3006_v6 = vld [vmem:[#allocation3 + $0x3b8] sm:$0xff] }
 0x179   : > { %5676 = vmatpush3.msra.mxu1 %v2708_v52  ;;  %5550 = vmatprep.mubr.f32.mxu1 %v6777_v47  ;;  %v3009_v52 = vld [vmem:[#allocation3 + $0x3d0] sm:$0xff] }
 0x17a   : > { %5513 = vmatmul.mubr.f32.gmra.mxu0 %v6775_v0  ;;  %5677 = vmatprep.subr.mxu1 %v2707_v44 }
 0x17b   : > { %5627 = vmatprep.mubr.f32.mxu0 %v6640_v43  ;;  %5678 = vmatpush3.msra.mxu1 %v2707_v44  ;;  %v2703_v43 = vld [vmem:[#allocation3 + $0x350] sm:$0xff]  ;;  %v6859_v44 = vld [vmem:[#allocation2 + $0x188] sm:$0xff] }
 0x17c   : > { %5551 = vmatmul.mubr.f32.gmra.mxu1 %v6783_v9  ;;  %5679 = vmatprep.subr.mxu1 %v2706_v48 }
 0x17d   : > { %5553 = vmatprep.mubr.f32.mxu1 %v6786_v56  ;;  %5680 = vmatpush3.msra.mxu1 %v2706_v48  ;;  %v3005_v48 = vld [vmem:[#allocation3 + $0x3b0] sm:$0xff] }
 0x17e   : > { %5628 = vmatmul.mubr.f32.vlgmr.msra.gmra.mxu0 %v6649_v12  ;;  %5681 = vmatprep.subr.mxu1 %v2705_v55  ;;  %v6799_v12 = vld [vmem:[#allocation2 + $0x90] sm:$0xff] }
 0x17f   : > { %5630 = vmatprep.mubr.f32.mxu0 %v6653_v40  ;;  %5682 = vmatpush3.msra.mxu1 %v2705_v55  ;;  %v2701_v40 = vld [vmem:[#allocation3 + $0x340] sm:$0xff] }
 0x180   : > { %5554 = vmatmul.mubr.f32.gmra.mxu1 %v6791_v1  ;;  %5683 = vmatprep.subr.mxu1 %v2704_v59  ;;  %v3003_v55 = vld [vmem:[#allocation3 + $0x3a0] sm:$0xff] }
 0x181   : > { %5556 = vmatprep.mubr.f32.mxu1 %v6794_v4  ;;  %5684 = vmatpush3.msra.mxu1 %v2704_v59  ;;  %v3002_v59 = vld [vmem:[#allocation3 + $0x398] sm:$0xff] }
 0x182   : > { %5631 = vmatmul.mubr.f32.gmra.mxu0 %v6659_v21  ;;  %5685 = vmatprep.subr.mxu1 %v2703_v43  ;;  %v6807_v21 = vld [vmem:[#allocation2 + $0xb0] sm:$0xff] }
 0x183   : > { %5633 = vmatprep.mubr.f32.mxu0 %v6663_v23  ;;  %5686 = vmatpush3.msra.mxu1 %v2703_v43  ;;  %v2699_v23 = vld [vmem:[#allocation3 + $0x330] sm:$0xff] }
 0x184   : > { %5557 = vmatmul.mubr.f32.gmra.mxu1 %v6799_v12  ;;  %5687 = vmatprep.subr.mxu1 %v2702_v5  ;;  %v2663_v43 = vld [vmem:[#allocation2 + $0x6f] sm:$0xff] }
 0x185   : > { %5559 = vmatprep.mubr.f32.mxu1 %v6802_v13  ;;  %5688 = vmatpush3.msra.mxu1 %v2702_v5  ;;  %v3317_v5 = vld [vmem:[#allocation3 + $0x460] sm:$0xff] }
 0x186   : > { %5634 = vmatmul.mubr.f32.gmra.mxu0 %v6668_v2  ;;  %5689 = vmatprep.subr.mxu1 %v2701_v40  ;;  %v6815_v2 = vld [vmem:[#allocation2 + $0xd0] sm:$0xff] }
 0x187   : > { %5636 = vmatprep.mubr.f32.mxu0 %v6672_v3  ;;  %5690 = vmatpush3.msra.mxu1 %v2701_v40  ;;  %v6819_v3 = vld [vmem:[#allocation2 + $0xe8] sm:$0xff] }
 0x188   : > { %5560 = vmatmul.mubr.f32.gmra.mxu1 %v6807_v21  ;;  %5691 = vmatprep.subr.mxu1 %v2700_v14  ;;  %v2664_v40 = vld [vmem:[#allocation2 + $0x87] sm:$0xff] }
 0x189   : > { %5562 = vmatprep.mubr.f32.mxu1 %v6810_v15  ;;  %5692 = vmatpush3.msra.mxu1 %v2700_v14 }
 0x18a   : > { %5637 = vmatmul.mubr.f32.gmra.mxu0 %v6676_v10  ;;  %5693 = vmatprep.subr.mxu1 %v2699_v23  ;;  %v3011_v10 = vld [vmem:[#allocation3 + $0x3e0] sm:$0xff] }
 0x18b   : > { %5639 = vmatprep.mubr.f32.mxu0 %v6680_v11  ;;  %5756 = vmatpush3.msra.mxu0 %v6771_v38  ;;  %v6824_v11 = vld [vmem:[#allocation2 + $0xf0] sm:$0xff]  ;;  %v6851_v38 = vld [vmem:[#allocation2 + $0x168] sm:$0xff] }
 0x18c   : > { %5563 = vmatmul.mubr.f32.gmra.mxu1 %v6815_v2  ;;  %5757 = vmatprep.subr.mxu0 %v3013_v22 }
 0x18d   : > { %5565 = vmatprep.mubr.f32.mxu1 %v6819_v3  ;;  %5758 = vmatpush3.msra.mxu0 %v3013_v22 }
 0x18e   : > { %5640 = vmatmul.mubr.f32.gmra.mxu0 %v6684_v18  ;;  %5694 = vmatpush3.msra.mxu1 %v2699_v23  ;;  %v6832_v18 = vld [vmem:[#allocation2 + $0x110] sm:$0xff]  ;;  %v3316_v23 = vld [vmem:[#allocation3 + $0x458] sm:$0xff] }
 0x18f   : > { %5642 = vmatprep.mubr.f32.mxu0 %v6688_v19  ;;  %5759 = vmatprep.subr.mxu0 %v3012_v25  ;;  %v2697_v19 = vld [vmem:[#allocation3 + $0x320] sm:$0xff] }
 0x190   : > { %5566 = vmatmul.mubr.f32.gmra.mxu1 %v6824_v11  ;;  %5760 = vmatpush3.msra.mxu0 %v3012_v25  ;;  %v2665_v25 = vld [vmem:[#allocation2 + $0x8f] sm:$0xff] }
 0x191   : > { %5568 = vmatprep.mubr.f32.mxu1 %v6827_v31  ;;  %5761 = vmatprep.subr.mxu0 %v3011_v10 }
 0x192   : > { %5643 = vmatmul.mubr.f32.gmra.mxu0 %v6692_v26  ;;  %5695 = vmatprep.subr.mxu1 %v2698_v28  ;;  %v6840_v26 = vld [vmem:[#allocation2 + $0x130] sm:$0xff] }
 0x193   : > { %5645 = vmatprep.mubr.f32.mxu0 %v6696_v27  ;;  %5762 = vmatpush3.msra.mxu0 %v3011_v10  ;;  %v6843_v27 = vld [vmem:[#allocation2 + $0x148] sm:$0xff]  ;;  %v3315_v10 = vld [vmem:[#allocation3 + $0x450] sm:$0xff] }
 0x194   : > { %5569 = vmatmul.mubr.f32.gmra.mxu1 %v6832_v18  ;;  %5763 = vmatprep.subr.mxu0 %v3010_v41 }
 0x195   : > { %5571 = vmatprep.mubr.f32.mxu1 %v6835_v32  ;;  %5696 = vmatpush3.msra.mxu1 %v2698_v28  ;;  %v2666_v28 = vld [vmem:[#allocation2 + $0xa7] sm:$0xff] }
 0x196   : > { %5646 = vmatmul.mubr.f32.gmra.mxu0 %v6700_v34  ;;  %5697 = vmatprep.subr.mxu1 %v2697_v19  ;;  %v6848_v34 = vld [vmem:[#allocation2 + $0x150] sm:$0xff] }
 0x197   : > { %5648 = vmatprep.mubr.f32.mxu0 %v6704_v35  ;;  %5764 = vmatpush3.msra.mxu0 %v3010_v41  ;;  %v2696_v35 = vld [vmem:[#allocation3 + $0x318] sm:$0xff] }
 0x198   : > { %5572 = vmatmul.mubr.f32.gmra.mxu1 %v6840_v26  ;;  %5765 = vmatprep.subr.mxu0 %v3009_v52 }
 0x199   : > { %5574 = vmatprep.mubr.f32.mxu1 %v6843_v27  ;;  %5766 = vmatpush3.msra.mxu0 %v3009_v52 }
 0x19a   : > { %5649 = vmatmul.mubr.f32.gmra.mxu0 %v6708_v45  ;;  %5698 = vmatpush3.msra.mxu1 %v2697_v19  ;;  %v6856_v45 = vld [vmem:[#allocation2 + $0x170] sm:$0xff]  ;;  %v3314_v19 = vld [vmem:[#allocation3 + $0x448] sm:$0xff] }
 0x19b   : > { %5651 = vmatprep.mubr.f32.mxu0 %v6712_v46  ;;  %5767 = vmatprep.subr.mxu0 %v3008_v33  ;;  %v2695_v46 = vld [vmem:[#allocation3 + $0x310] sm:$0xff] }
 0x19c   : > { %5575 = vmatmul.mubr.f32.gmra.mxu1 %v6848_v34  ;;  %5768 = vmatpush3.msra.mxu0 %v3008_v33 }
 0x19d   : > { %5577 = vmatprep.mubr.f32.mxu1 %v6851_v38  ;;  %5769 = vmatprep.subr.mxu0 %v3007_v37 }
 0x19e   : > { %5652 = vmatmul.mubr.f32.gmra.mxu0 %v6716_v53  ;;  %5699 = vmatprep.subr.mxu1 %v2696_v35  ;;  %v6864_v53 = vld [vmem:[#allocation2 + $0x190] sm:$0xff] }
 0x19f   : > { %5654 = vmatprep.mubr.f32.mxu0 %v6720_v54  ;;  %5770 = vmatpush3.msra.mxu0 %v3007_v37  ;;  %v3004_v54 = vld [vmem:[#allocation3 + $0x3a8] sm:$0xff]  ;;  %v3313_v37 = vld [vmem:[#allocation3 + $0x440] sm:$0xff] }
 0x1a0   : > { %5578 = vmatmul.mubr.f32.gmra.mxu1 %v6856_v45  ;;  %5771 = vmatprep.subr.mxu0 %v3006_v6 }
 0x1a1   : > { %5580 = vmatprep.mubr.f32.mxu1 %v6859_v44  ;;  %5700 = vmatpush3.msra.mxu1 %v2696_v35 }
 0x1a2   : > { %5655 = vmatmul.mubr.f32.gmra.mxu0 %v6724_v61  ;;  %5701 = vmatprep.subr.mxu1 %v2695_v46  ;;  %v6870_v61 = vld [vmem:[#allocation2 + $0x1b0] sm:$0xff] }
 0x1a3   : > { %5657 = vmatprep.mubr.f32.mxu0 %v6728_v62  ;;  %5772 = vmatpush3.msra.mxu0 %v3006_v6  ;;  %v2694_v62 = vld [vmem:[#allocation3 + $0x308] sm:$0xff] }
 0x1a4   : > { %5581 = vmatmul.mubr.f32.gmra.mxu1 %v6864_v53  ;;  %5773 = vmatprep.subr.mxu0 %v3005_v48  ;;  %v2668_v6 = vld [vmem:[#allocation2 + $0xc7] sm:$0xff] }
 0x1a5   : > { %5583 = vmatprep.mubr.f32.mxu1 %v6588_v24  ;;  %5774 = vmatpush3.msra.mxu0 %v3005_v48  ;;  %v6876_v24 = vld [vmem:[#allocation2 + $0x1d0] sm:$0xff] }
 0x1a6   : > { %5658 = vmatmul.mubr.f32.gmra.mxu0 %v6732_v7  ;;  %5702 = vmatpush3.msra.mxu1 %v2695_v46  ;;  %v2693_v7 = vld [vmem:[#allocation3 + $0x300] sm:$0xff] }
 0x1a7   : > { %5660 = vmatprep.mubr.f32.mxu0 %v6736_v8  ;;  %5775 = vmatprep.subr.mxu0 %v3004_v54  ;;  %v3001_v8 = vld [vmem:[#allocation3 + $0x390] sm:$0xff] }
 0x1a8   : > { %5584 = vmatmul.mubr.f32.gmra.mxu1 %v6870_v61  ;;  %5776 = vmatpush3.msra.mxu0 %v3004_v54  ;;  %v3312_v54 = vld [vmem:[#allocation3 + $0x438] sm:$0xff] }
 0x1a9   : > { %5586 = vmatprep.mubr.f32.mxu1 %v6600_v36  ;;  %5777 = vmatprep.subr.mxu0 %v3003_v55  ;;  %v6882_v36 = vld [vmem:[#allocation2 + $0x1f0] sm:$0xff] }
 0x1aa   : > { %5661 = vmatmul.mubr.f32.gmra.mxu0 %v6740_v17  ;;  %5703 = vmatprep.subr.mxu1 %v2694_v62  ;;  %v3000_v17 = vld [vmem:[#allocation3 + $0x388] sm:$0xff] }
 0x1ab   : > { %5663 = vmatprep.mubr.f32.mxu0 %v6744_v20  ;;  %5778 = vmatpush3.msra.mxu0 %v3003_v55  ;;  %v3320_v20 = vld [vmem:[#allocation3 + $0x478] sm:$0xff] }
 0x1ac   : > { %5587 = vmatmul.mubr.f32.gmra.mxu1 %v6876_v24  ;;  %5779 = vmatprep.subr.mxu0 %v3002_v59 }
 0x1ad   : > { %5589 = vmatprep.mubr.f32.mxu1 %v6612_v49  ;;  %5704 = vmatpush3.msra.mxu1 %v2694_v62  ;;  %v2999_v49 = vld [vmem:[#allocation3 + $0x380] sm:$0xff] }
 0x1ae   : > { %5664 = vmatmul.mubr.f32.gmra.mxu0 %v6748_v29  ;;  %5705 = vmatprep.subr.mxu1 %v2693_v7  ;;  %v2660_v29 = vld [vmem:[#allocation2 + $0x47] sm:$0xff] }
 0x1af   : > { %5666 = vmatprep.mubr.f32.mxu0 %v6752_v30  ;;  %5780 = vmatpush3.msra.mxu0 %v3002_v59  ;;  %v3319_v30 = vld [vmem:[#allocation3 + $0x470] sm:$0xff] }
 0x1b0   : > { %5590 = vmatmul.mubr.f32.gmra.mxu1 %v6882_v36  ;;  %5781 = vmatprep.subr.mxu0 %v3001_v8  ;;  %v3311_v59 = vld [vmem:[#allocation3 + $0x430] sm:$0xff] }
 0x1b1   : > { %5592 = vmatprep.mubr.f32.mxu1 %v798_v60  ;;  %5782 = vmatpush3.msra.mxu0 %v3001_v8  ;;  %v2661_v60 = vld [vmem:[#allocation2 + $0x4f] sm:$0xff]  ;;  %v2670_v8 = vld [vmem:[#allocation2 + $0xe7] sm:$0xff] }
 0x1b2   : > { %5667 = vmatmul.mubr.f32.gmra.mxu0 %v6756_v39  ;;  %5706 = vmatpush3.msra.mxu1 %v2693_v7  ;;  %v2662_v39 = vld [vmem:[#allocation2 + $0x67] sm:$0xff] }
 0x1b3   : > { %5669 = vmatprep.mubr.f32.mxu0 %v6760_v42  ;;  %5783 = vmatprep.subr.mxu0 %v3000_v17  ;;  %v6895_v42 = vpop.f32.mrf.mxu1 }
 0x1b4   : > { %5593 = vmatmul.mubr.f32.gmra.mxu1 %v799_v57  ;;  %5784 = vmatpush3.msra.mxu0 %v3000_v17  ;;  %v3318_v57 = vld [vmem:[#allocation3 + $0x468] sm:$0xff] }
 0x1b5   : > { %5707 = vmatprep.mubr.f32.mxu1 %v2660_v29  ;;  %5785 = vmatprep.subr.mxu0 %v2999_v49 }
 0x1b6   : > { %5670 = vmatmul.mubr.f32.gmra.mxu0 %v6764_v51  ;;  %5835 = vmatprep.subr.mxu1 %v3320_v20 }
 0x1b7   : > { %5672 = vmatprep.mubr.f32.mxu0 %v6892_v58  ;;  %5786 = vmatpush3.msra.mxu0 %v2999_v49 }
 0x1b8   : > { %5708 = vmatmul.mubr.f32.vlgmr.msra.gmra.mxu1 %v2661_v60 }
 0x1b9   : > { %5836 = vmatpush3.msra.mxu1 %v3320_v20  ;;  %5710 = vmatprep.mubr.f32.mxu1 %v2662_v39  ;;  %v3310_v20 = vld [vmem:[#allocation3 + $0x428] sm:$0xff] }
 0x1ba   : > { %5673 = vmatmul.mubr.f32.gmra.mxu0 %v6897_v50  ;;  %5837 = vmatprep.subr.mxu1 %v3319_v30  ;;  %v5232_v51 = vpop.f32.mrf.mxu1 }
 0x1bb   : > { %5787 = vmatprep.mubr.f32.mxu0 %v6777_v47  ;;  %5838 = vmatpush3.msra.mxu1 %v3319_v30  ;;  %v6903_v47 = vpop.f32.mrf.mxu0  ;;  %v3309_v30 = vld [vmem:[#allocation3 + $0x420] sm:$0xff] }
 0x1bc   : > { %5711 = vmatmul.mubr.f32.gmra.mxu1 %v2663_v43  ;;  %v1060_v14 = vpop.f32.mrf.mxu1  ;;  %5839 = vmatprep.subr.mxu1 %v3318_v57 }
 0x1bd   : > { %5713 = vmatprep.mubr.f32.mxu1 %v2664_v40  ;;  %5840 = vmatpush3.msra.mxu1 %v3318_v57  ;;  %v2672_v57 = vld [vmem:[#allocation2 + $0x107] sm:$0xff] }
 0x1be   : > { %5788 = vmatmul.mubr.f32.vlgmr.msra.gmra.mxu0 %v6783_v9  ;;  %v5235_v22 = vpop.f32.mrf.mxu1  ;;  %5841 = vmatprep.subr.mxu1 %v3317_v5 }
 0x1bf   : > { %5790 = vmatprep.mubr.f32.mxu0 %v6786_v56  ;;  %5842 = vmatpush3.msra.mxu1 %v3317_v5  ;;  %v2667_v56 = vld [vmem:[#allocation2 + $0xaf] sm:$0xff]  ;;  %v3308_v5 = vld [vmem:[#allocation3 + $0x418] sm:$0xff] }
 0x1c0   : > { %5714 = vmatmul.mubr.f32.gmra.mxu1 %v2665_v25  ;;  %v1070_v41 = vpop.f32.mrf.mxu1  ;;  %5843 = vmatprep.subr.mxu1 %v3316_v23  ;;  %v2674_v25 = vld [vmem:[#allocation2 + $0x127] sm:$0xff] }
 0x1c1   : > { %5716 = vmatprep.mubr.f32.mxu1 %v2666_v28  ;;  %5844 = vmatpush3.msra.mxu1 %v3316_v23  ;;  %v3307_v23 = vld [vmem:[#allocation3 + $0x410] sm:$0xff] }
 0x1c2   : > { %v5312_v52 = vpop.f32.mrf.mxu0  ;;  %5791 = vmatmul.mubr.f32.gmra.mxu0 %v6791_v1  ;;  %v5238_v9 = vpop.f32.mrf.mxu1  ;;  %5845 = vmatprep.subr.mxu1 %v3315_v10 }
 0x1c3   : > { %v6906_v33 = vadd.f32 %v5312_v52, %v5232_v51  ;;  %5793 = vmatprep.mubr.f32.mxu0 %v6794_v4  ;;  %5846 = vmatpush3.msra.mxu1 %v3315_v10  ;;  %v2669_v4 = vld [vmem:[#allocation2 + $0xcf] sm:$0xff] }
 0x1c4   : > { %v1285_v35 = vpop.f32.mrf.mxu0  ;;  %5717 = vmatmul.mubr.f32.gmra.mxu1 %v2667_v56  ;;  %v1080_v46 = vpop.f32.mrf.mxu1  ;;  %5847 = vmatprep.subr.mxu1 %v3314_v19 }
 0x1c5   : > { %v6909_v48 = vadd.f32 %v1285_v35, %v1060_v14  ;;  %5719 = vmatprep.mubr.f32.mxu1 %v2668_v6  ;;  %5848 = vmatpush3.msra.mxu1 %v3314_v19 }
 0x1c6   : > { %v5315_v1 = vpop.f32.mrf.mxu0  ;;  %5794 = vmatmul.mubr.f32.gmra.mxu0 %v6799_v12  ;;  %v5241_v55 = vpop.f32.mrf.mxu1  ;;  %5849 = vmatprep.subr.mxu1 %v3313_v37 }
 0x1c7   : > { %v6912_v62 = vadd.f32 %v5315_v1, %v5235_v22  ;;  %5796 = vmatprep.mubr.f32.mxu0 %v6802_v13  ;;  %5850 = vmatpush3.msra.mxu1 %v3313_v37  ;;  %v2671_v13 = vld [vmem:[#allocation2 + $0xef] sm:$0xff]  ;;  %v2676_v37 = vld [vmem:[#allocation2 + $0x147] sm:$0xff] }
 0x1c8   : > { %v1295_v7 = vpop.f32.mrf.mxu0  ;;  %5720 = vmatmul.mubr.f32.gmra.mxu1 %v2669_v4  ;;  %v1090_v17 = vpop.f32.mrf.mxu1  ;;  %5851 = vmatprep.subr.mxu1 %v3312_v54 }
 0x1c9   : > { %v6915_v49 = vadd.f32 %v1295_v7, %v1070_v41  ;;  %5722 = vmatprep.mubr.f32.mxu1 %v2670_v8  ;;  %5852 = vmatpush3.msra.mxu1 %v3312_v54  ;;  %v3306_v41 = vld [vmem:[#allocation3 + $0x408] sm:$0xff] }
 0x1ca   : > { %v5318_v12 = vpop.f32.mrf.mxu0  ;;  %5797 = vmatmul.mubr.f32.gmra.mxu0 %v6807_v21  ;;  %v5244_v29 = vpop.f32.mrf.mxu1  ;;  %5853 = vmatprep.subr.mxu1 %v3311_v59 }
 0x1cb   : > { %v6918_v60 = vadd.f32 %v5318_v12, %v5238_v9  ;;  %5799 = vmatprep.mubr.f32.mxu0 %v6810_v15  ;;  %5854 = vmatpush3.msra.mxu1 %v3311_v59  ;;  %v2673_v15 = vld [vmem:[#allocation2 + $0x10f] sm:$0xff]  ;;  %v3305_v9 = vld [vmem:[#allocation3 + $0x400] sm:$0xff] }
 0x1cc   : > { %v1305_v39 = vpop.f32.mrf.mxu0  ;;  %5723 = vmatmul.mubr.f32.gmra.mxu1 %v2671_v13  ;;  %v1100_v51 = vpop.f32.mrf.mxu1  ;;  %5855 = vmatprep.subr.mxu1 %v3310_v20 }
 0x1cd   : > { %v6921_v43 = vadd.f32 %v1305_v39, %v1080_v46  ;;  %5725 = vmatprep.mubr.f32.mxu1 %v2672_v57  ;;  %5856 = vmatpush3.msra.mxu1 %v3310_v20  ;;  %v2680_v20 = vld [vmem:[#allocation2 + $0x187] sm:$0xff] }
 0x1ce   : > { %v5321_v21 = vpop.f32.mrf.mxu0  ;;  %5800 = vmatmul.mubr.f32.gmra.mxu0 %v6815_v2  ;;  %v5247_v40 = vpop.f32.mrf.mxu1  ;;  %5857 = vmatprep.subr.mxu1 %v3309_v30 }
 0x1cf   : > { %v6924_v14 = vadd.f32 %v5321_v21, %v5241_v55  ;;  %5802 = vmatprep.mubr.f32.mxu0 %v6819_v3  ;;  %5858 = vmatpush3.msra.mxu1 %v3309_v30  ;;  %v2675_v3 = vld [vmem:[#allocation2 + $0x12f] sm:$0xff]  ;;  %v2678_v55 = vld [vmem:[#allocation2 + $0x167] sm:$0xff] }
 0x1d0   : > { %v1315_v22 = vpop.f32.mrf.mxu0  ;;  %5726 = vmatmul.mubr.f32.gmra.mxu1 %v2673_v15  ;;  %v1110_v10 = vpop.f32.mrf.mxu1  ;;  %5859 = vmatprep.subr.mxu1 %v3308_v5 }
 0x1d1   : > { %v6927_v28 = vadd.f32 %v1315_v22, %v1090_v17  ;;  %5728 = vmatprep.mubr.f32.mxu1 %v2674_v25  ;;  %5860 = vmatpush3.msra.mxu1 %v3308_v5  ;;  %v2679_v17 = vld [vmem:[#allocation2 + $0x16f] sm:$0xff] }
 0x1d2   : > { %v5324_v2 = vpop.f32.mrf.mxu0  ;;  %5803 = vmatmul.mubr.f32.gmra.mxu0 %v6824_v11  ;;  %v5250_v19 = vpop.f32.mrf.mxu1  ;;  %5861 = vmatprep.subr.mxu1 %v3307_v23  ;;  %v2988_v25 = vld [vmem:[#allocation2 + $0x1a8] sm:$0xff] }
 0x1d3   : > { %v6930_v52 = vadd.f32 %v5324_v2, %v5244_v29  ;;  %5805 = vmatprep.mubr.f32.mxu0 %v6827_v31  ;;  %5862 = vmatpush3.msra.mxu1 %v3307_v23  ;;  %v2677_v31 = vld [vmem:[#allocation2 + $0x14f] sm:$0xff] }
 0x1d4   : > { %v1325_v56 = vpop.f32.mrf.mxu0  ;;  %5729 = vmatmul.mubr.f32.gmra.mxu1 %v2675_v3  ;;  %v1120_v35 = vpop.f32.mrf.mxu1  ;;  %5863 = vmatprep.subr.mxu1 %v3306_v41 }
 0x1d5   : > { %v6933_v6 = vadd.f32 %v1325_v56, %v1100_v51  ;;  %5731 = vmatprep.mubr.f32.mxu1 %v2676_v37  ;;  %5864 = vmatpush3.msra.mxu1 %v3306_v41 }
 0x1d6   : > { %v5327_v46 = vpop.f32.mrf.mxu0  ;;  %5806 = vmatmul.mubr.f32.gmra.mxu0 %v6832_v18  ;;  %v5253_v11 = vpop.f32.mrf.mxu1  ;;  %5865 = vmatprep.subr.mxu1 %v3305_v9 }
 0x1d7   : > { %v6936_v54 = vadd.f32 %v5327_v46, %v5247_v40  ;;  %5808 = vmatprep.mubr.f32.mxu0 %v6835_v32  ;;  %5866 = vmatpush3.msra.mxu1 %v3305_v9  ;;  %v2990_v9 = vld [vmem:[#allocation2 + $0x1c8] sm:$0xff] }
 0x1d8   : > { %v1335_v1 = vpop.f32.mrf.mxu0  ;;  %5732 = vmatmul.mubr.f32.gmra.mxu1 %v2677_v31  ;;  %v6939_v4 = vpop.f32.mrf.mxu1  ;;  %v2992_v31 = vld [vmem:[#allocation2 + $0x1e8] sm:$0xff] }
 0x1d9   : > { %v6941_v59 = vadd.f32 %v1335_v1, %v1110_v10  ;;  %5734 = vmatprep.mubr.f32.mxu1 %v2678_v55  ;;  %v2690_v55 = vld [vmem:[#allocation2 + $0x227] sm:$0xff] }
 0x1da   : > { %v5330_v7 = vpop.f32.mrf.mxu0  ;;  %5809 = vmatmul.mubr.f32.gmra.mxu0 %v6840_v26  ;;  %v5256_v18 = vpop.f32.mrf.mxu1  ;;  %v2681_v26 = vld [vmem:[#allocation2 + $0x18f] sm:$0xff] }
 0x1db   : > { %v6944_v8 = vadd.f32 %v5330_v7, %v5250_v19  ;;  %5811 = vmatprep.mubr.f32.mxu0 %v6843_v27  ;;  %v2682_v27 = vld [vmem:[#allocation2 + $0x1a7] sm:$0xff] }
 0x1dc   : > { %v1345_v32 = vpop.f32.mrf.mxu0  ;;  %5735 = vmatmul.mubr.f32.gmra.mxu1 %v2679_v17  ;;  %v6947_v12 = vpop.f32.mrf.mxu1  ;;  %v2691_v17 = vld [vmem:[#allocation2 + $0x22f] sm:$0xff] }
 0x1dd   : > { %v6949_v29 = vadd.f32 %v1345_v32, %v1120_v35  ;;  %5737 = vmatprep.mubr.f32.mxu1 %v2680_v20 }
 0x1de   : > { %v5333_v13 = vpop.f32.mrf.mxu0  ;;  %5812 = vmatmul.mubr.f32.gmra.mxu0 %v6848_v34  ;;  %v5259_v30 = vpop.f32.mrf.mxu1  ;;  %v2683_v34 = vld [vmem:[#allocation2 + $0x1af] sm:$0xff] }
 0x1df   : > { %v6952_v39 = vadd.f32 %v5333_v13, %v5253_v11  ;;  %5814 = vmatprep.mubr.f32.mxu0 %v6851_v38  ;;  %v2684_v38 = vld [vmem:[#allocation2 + $0x1c7] sm:$0xff] }
 0x1e0   : > { %v6955_v57 = vpop.f32.mrf.mxu0  ;;  %5738 = vmatmul.mubr.f32.gmra.mxu1 %v2681_v26  ;;  %v6957_v51 = vpop.f32.mrf.mxu1 }
 0x1e1   : > { %5740 = vmatprep.mubr.f32.mxu1 %v2682_v27  ;;  %v2995_v27 = vld [vmem:[#allocation2 + $0x210] sm:$0xff] }
 0x1e2   : > { %v5336_v5 = vpop.f32.mrf.mxu0  ;;  %5815 = vmatmul.mubr.f32.gmra.mxu0 %v6856_v45  ;;  %v5262_v21 = vpop.f32.mrf.mxu1  ;;  %v2685_v45 = vld [vmem:[#allocation2 + $0x1cf] sm:$0xff] }
 0x1e3   : > { %v6960_v40 = vadd.f32 %v5336_v5, %v5256_v18  ;;  %5817 = vmatprep.mubr.f32.mxu0 %v6859_v44  ;;  %v2686_v44 = vld [vmem:[#allocation2 + $0x1e7] sm:$0xff] }
 0x1e4   : > { %v6963_v15 = vpop.f32.mrf.mxu0  ;;  %5741 = vmatmul.mubr.f32.gmra.mxu1 %v2683_v34  ;;  %v6965_v23 = vpop.f32.mrf.mxu1  ;;  %v6119_v34 = vld [vmem:[#allocation2 + $0x10] sm:$0xff] }
 0x1e5   : > { %5743 = vmatprep.mubr.f32.mxu1 %v2684_v38  ;;  %v3273_v38 = vld [vmem:[#allocation2 + $0x51] sm:$0xff] }
 0x1e6   : > { %v5339_v22 = vpop.f32.mrf.mxu0  ;;  %5818 = vmatmul.mubr.f32.gmra.mxu0 %v6864_v53  ;;  %v5265_v10 = vpop.f32.mrf.mxu1  ;;  %v2687_v53 = vld [vmem:[#allocation2 + $0x1ef] sm:$0xff] }
 0x1e7   : > { %v6968_v41 = vadd.f32 %v5339_v22, %v5259_v30  ;;  %5820 = vmatprep.mubr.f32.mxu0 %v2988_v25  ;;  %v3272_v30 = vld [vmem:[#allocation2 + $0x49] sm:$0xff] }
 0x1e8   : > { %v6970_v2 = vpop.f32.mrf.mxu0  ;;  %5744 = vmatmul.mubr.f32.gmra.mxu1 %v2685_v45  ;;  %v6972_v19 = vpop.f32.mrf.mxu1  ;;  %v3274_v25 = vld [vmem:[#allocation2 + $0x69] sm:$0xff] }
 0x1e9   : > { %5746 = vmatprep.mubr.f32.mxu1 %v2686_v44 }
 0x1ea   : > { %v5342_v3 = vpop.f32.mrf.mxu0  ;;  %5821 = vmatmul.mubr.f32.gmra.mxu0 %v6870_v61  ;;  %v5268_v56 = vpop.f32.mrf.mxu1 }
 0x1eb   : > { %v6975_v37 = vadd.f32 %v5342_v3, %v5262_v21  ;;  %5823 = vmatprep.mubr.f32.mxu0 %v2990_v9 }
 0x1ec   : > { %v6977_v35 = vpop.f32.mrf.mxu0  ;;  %5747 = vmatmul.mubr.f32.gmra.mxu1 %v2687_v53  ;;  %v6979_v46 = vpop.f32.mrf.mxu1 }
 0x1ed   : > { %5749 = vmatprep.mubr.f32.mxu1 %v6769_v63  ;;  %v2994_v63 = vld [vmem:[#allocation2 + $0x208] sm:$0xff] }
 0x1ee   : > { %v5345_v11 = vpop.f32.mrf.mxu0  ;;  %5824 = vmatmul.mubr.f32.gmra.mxu0 %v6876_v24  ;;  %v5271_v1 = vpop.f32.mrf.mxu1 }
 0x1ef   : > { %v6983_v61 = vadd.f32 %v5345_v11, %v5265_v10  ;;  %5826 = vmatprep.mubr.f32.mxu0 %v2992_v31 }
 0x1f0   : > { %v6985_v7 = vpop.f32.mrf.mxu0  ;;  %5750 = vmatmul.mubr.f32.gmra.mxu1 %v6775_v0  ;;  %v6988_v18 = vpop.f32.mrf.mxu1 }
 0x1f1   : > { %5752 = vmatprep.mubr.f32.mxu1 %v2690_v55 }
 0x1f2   : > { %v5348_v32 = vpop.f32.mrf.mxu0  ;;  %5827 = vmatmul.mubr.f32.gmra.mxu0 %v6882_v36  ;;  %v5274_v20 = vpop.f32.mrf.mxu1 }
 0x1f3   : > { %v6991_v24 = vadd.f32 %v5348_v32, %v5268_v56  ;;  %5829 = vmatprep.mubr.f32.mxu0 %v2994_v63  ;;  %v3275_v56 = vld [vmem:[#allocation2 + $0x71] sm:$0xff] }
 0x1f4   : > { %v6993_v13 = vpop.f32.mrf.mxu0  ;;  %5753 = vmatmul.mubr.f32.gmra.mxu1 %v2691_v17  ;;  %v6995_v26 = vpop.f32.mrf.mxu1  ;;  %v3277_v63 = vld [vmem:[#allocation2 + $0x91] sm:$0xff] }
 0x1f5   : > { %5867 = vmatprep.mubr.f32.mxu1 %v3272_v30 }
 0x1f6   : > { %v5351_v0 = vpop.f32.mrf.mxu0  ;;  %5830 = vmatmul.mubr.f32.gmra.mxu0 %v2995_v27  ;;  %v5389_v5 = vpop.f32.mrf.mxu1 }
 0x1f7   : > { %v6997_v21 = vadd.f32 %v5351_v0, %v5271_v1  ;;  %5832 = vmatprep.mubr.f32.mxu0 %v6119_v34  ;;  %v1709_v36 = vadd.f32 %v5389_v5, %v6655_v16  ;;  %v3276_v16 = vld [vmem:[#allocation2 + $0x89] sm:$0xff] }
 0x1f8   : > { %v7000_v22 = vpop.f32.mrf.mxu0  ;;  %5868 = vmatmul.mubr.f32.vlgmr.msra.gmra.mxu1 %v3273_v38  ;;  %v7002_v10 = vpop.f32.mrf.mxu1 }
 0x1f9   : > { %5870 = vmatprep.mubr.f32.mxu1 %v3274_v25 }
 0x1fa   : > { %v5354_v45 = vpop.f32.mrf.mxu0  ;;  %5833 = vmatmul.mubr.f32.gmra.mxu0 %v6119_v34  ;;  %v5392_v44 = vpop.f32.mrf.mxu1 }
 0x1fb   : > { %v7004_v3 = vadd.f32 %v5354_v45, %v5274_v20  ;;  %v1711_v9 = vadd.f32 %v5392_v44, %v6906_v33  ;;  %v3278_v33 = vld [vmem:[#allocation2 + $0xa9] sm:$0xff] }
 0x1fc   : > { %v7007_v53 = vpop.f32.mrf.mxu0  ;;  %5871 = vmatmul.mubr.f32.gmra.mxu1 %v3275_v56  ;;  %v1559_v11 = vpop.f32.mrf.mxu1 }
 0x1fd   : > { %5873 = vmatprep.mubr.f32.mxu1 %v3276_v16  ;;  %v7010_v31 = vadd.f32 %v1559_v11, %v6909_v48 }
 0x1fe   : > { %v5469_v1 = vpop.f32.mrf.mxu0  ;;  %v5395_v55 = vpop.f32.mrf.mxu1 }
 0x1ff   : > { %v7012_v17 = vadd.f32 %v5469_v1, %v1709_v36  ;;  %v1713_v32 = vadd.f32 %v5395_v55, %v6912_v62  ;;  %v3279_v36 = vld [vmem:[#allocation2 + $0xb1] sm:$0xff]  ;;  %v3280_v62 = vld [vmem:[#allocation2 + $0xc9] sm:$0xff] }
 0x200   : > { %v7015_v20 = vpop.f32.mrf.mxu0  ;;  %5874 = vmatmul.mubr.f32.gmra.mxu1 %v3277_v63  ;;  %v1569_v30 = vpop.f32.mrf.mxu1  ;;  %v3282_v1 = vld [vmem:[#allocation2 + $0xe9] sm:$0xff] }
 0x201   : > { %5876 = vmatprep.mubr.f32.mxu1 %v3278_v33  ;;  %v7018_v27 = vadd.f32 %v1569_v30, %v6915_v49  ;;  %v3283_v30 = vld [vmem:[#allocation2 + $0xf1] sm:$0xff] }
 0x202   : > { %v5472_v0 = vpop.f32.mrf.mxu0  ;;  %v5398_v5 = vpop.f32.mrf.mxu1 }
 0x203   : > { %v7020_v48 = vadd.f32 %v5472_v0, %v1711_v9  ;;  %v1715_v34 = vadd.f32 %v5398_v5, %v6918_v60  ;;  %v3281_v9 = vld [vmem:[#allocation2 + $0xd1] sm:$0xff] }
 0x204   : > { %v7023_v38 = vpop.f32.mrf.mxu0  ;;  %5877 = vmatmul.mubr.f32.gmra.mxu1 %v3279_v36  ;;  %v1579_v25 = vpop.f32.mrf.mxu1  ;;  %v3664_v60 = vld [vmem:[%s7904_s5 + $0x78] sm:$0xff]  ;;  %v3663_v0 = vld [vmem:[%s7904_s5 + $0x70] sm:$0xff] }
 0x205   : > { %5879 = vmatprep.mubr.f32.mxu1 %v3280_v62  ;;  %v7026_v45 = vadd.f32 %v1579_v25, %v6921_v43  ;;  %5915 = vmatprep.subr.mxu0 %v3664_v60  ;;  %v3284_v36 = vld [vmem:[#allocation2 + $0x109] sm:$0xff] }
 0x206   : > { %v5475_v44 = vpop.f32.mrf.mxu0  ;;  %v5401_v56 = vpop.f32.mrf.mxu1  ;;  %5916 = vmatpush3.msra.mxu0 %v3664_v60 }
 0x207   : > { %v7028_v49 = vadd.f32 %v5475_v44, %v1713_v32  ;;  %v1717_v16 = vadd.f32 %v5401_v56, %v6924_v14  ;;  %5917 = vmatprep.subr.mxu0 %v3663_v0  ;;  %v3285_v56 = vld [vmem:[#allocation2 + $0x111] sm:$0xff] }
 0x208   : > { %v7034_v11 = vpop.f32.mrf.mxu0  ;;  %5880 = vmatmul.mubr.f32.gmra.mxu1 %v3281_v9  ;;  %v1589_v55 = vpop.f32.mrf.mxu1  ;;  %5918 = vmatpush3.msra.mxu0 %v3663_v0  ;;  %v3662_v9 = vld [vmem:[%s7904_s5 + $0x68] sm:$0xff]  ;;  %v3661_v0 = vld [vmem:[%s7904_s5 + $0x60] sm:$0xff] }
 0x209   : > { %5882 = vmatprep.mubr.f32.mxu1 %v3282_v1  ;;  %v7037_v43 = vadd.f32 %v1589_v55, %v6927_v28  ;;  %v3286_v1 = vld [vmem:[#allocation2 + $0x129] sm:$0xff]  ;;  %5919 = vmatprep.subr.mxu0 %v3662_v9 }
 0x20a   : > { %v5478_v32 = vpop.f32.mrf.mxu0  ;;  %v5404_v63 = vpop.f32.mrf.mxu1  ;;  %5920 = vmatpush3.msra.mxu0 %v3662_v9 }
 0x20b   : > { %v7039_v33 = vadd.f32 %v5478_v32, %v1715_v34  ;;  %v1719_v14 = vadd.f32 %v5404_v63, %v6930_v52  ;;  %5921 = vmatprep.subr.mxu0 %v3661_v0 }
 0x20c   : > { %v7045_v5 = vpop.f32.mrf.mxu0  ;;  %5883 = vmatmul.mubr.f32.gmra.mxu1 %v3283_v30  ;;  %v1599_v62 = vpop.f32.mrf.mxu1  ;;  %v3287_v30 = vld [vmem:[#allocation2 + $0x131] sm:$0xff]  ;;  %5922 = vmatpush3.msra.mxu0 %v3661_v0 }
 0x20d   : > { %5885 = vmatprep.mubr.f32.mxu1 %v3284_v36  ;;  %v7048_v28 = vadd.f32 %v1599_v62, %v6933_v6  ;;  %v3288_v62 = vld [vmem:[#allocation2 + $0x149] sm:$0xff] }
 0x20e   : > { %v5481_v34 = vpop.f32.mrf.mxu0  ;;  %v5407_v25 = vpop.f32.mrf.mxu1 }
 0x20f   : > { %v7050_v44 = vadd.f32 %v5481_v34, %v1717_v16  ;;  %v1721_v52 = vadd.f32 %v5407_v25, %v6936_v54 }
 0x210   : > { %v7056_v60 = vpop.f32.mrf.mxu0  ;;  %5886 = vmatmul.mubr.f32.gmra.mxu1 %v3285_v56  ;;  %v1609_v55 = vpop.f32.mrf.mxu1 }
 0x211   : > { %5888 = vmatprep.mubr.f32.mxu1 %v3286_v1  ;;  %v7059_v6 = vadd.f32 %v1609_v55, %v6941_v59  ;;  %v3289_v1 = vld [vmem:[#allocation2 + $0x151] sm:$0xff] }
 0x212   : > { %v5484_v16 = vpop.f32.mrf.mxu0  ;;  %v5410_v32 = vpop.f32.mrf.mxu1  ;;  %v3660_v55 = vld [vmem:[%s7904_s5 + $0x58] sm:$0xff] }
 0x213   : > { %v7061_v63 = vadd.f32 %v5484_v16, %v1719_v14  ;;  %v1723_v54 = vadd.f32 %v5410_v32, %v6944_v8  ;;  %v1356_v8 = vadd.f32 %v6955_v57, %v6939_v4  ;;  %v3290_v32 = vld [vmem:[#allocation2 + $0x169] sm:$0xff]  ;;  %5923 = vmatprep.subr.mxu0 %v3660_v55 }
 0x214   : > { %v7067_v36 = vpop.f32.mrf.mxu0  ;;  %5889 = vmatmul.mubr.f32.gmra.mxu1 %v3287_v30  ;;  %v1619_v34 = vpop.f32.mrf.mxu1  ;;  %5924 = vmatpush3.msra.mxu0 %v3660_v55 }
 0x215   : > { %5891 = vmatprep.mubr.f32.mxu1 %v3288_v62  ;;  %v7070_v59 = vadd.f32 %v1619_v34, %v6949_v29  ;;  %v7083_v29 = vld [vmem:[%s7906_s7] sm:$0xf]  ;;  %v3291_v34 = vld [vmem:[#allocation2 + $0x171] sm:$0xff] }
 0x216   : > { %v5487_v14 = vpop.f32.mrf.mxu0  ;;  %v5413_v25 = vpop.f32.mrf.mxu1  ;;  %6045 = vmatprep.subr.msk.mxu1 %vm517_vm0, %v7083_v29 }
 0x217   : > { %v7074_v56 = vadd.f32 %v5487_v14, %v1721_v52  ;;  %v1725_v9 = vadd.f32 %v5413_v25, %v6952_v39  ;;  %6046 = vmatpush3.msk.msra.mxu1 %vm517_vm0, %v7083_v29  ;;  %v1366_v52 = vadd.f32 %v6963_v15, %v6947_v12  ;;  %v3659_v14 = vld [vmem:[%s7904_s5 + $0x50] sm:$0xff] }
 0x218   : > { %v7085_v16 = vpop.f32.mrf.mxu0  ;;  %5892 = vmatmul.mubr.f32.gmra.mxu1 %v3289_v1  ;;  %v1629_v30 = vpop.f32.mrf.mxu1  ;;  %5925 = vmatprep.subr.mxu0 %v3659_v14 }
 0x219   : > { %5894 = vmatprep.mubr.f32.mxu1 %v3290_v32  ;;  %v7087_v4 = vadd.f32 %v1629_v30, %v1356_v8  ;;  %v3292_v8 = vld [vmem:[#allocation2 + $0x189] sm:$0xff]  ;;  %5926 = vmatpush3.msra.mxu0 %v3659_v14  ;;  %v3293_v30 = vld [vmem:[#allocation2 + $0x191] sm:$0xff] }
 0x21a   : > { %v5490_v39 = vpop.f32.mrf.mxu0  ;;  %v5416_v57 = vpop.f32.mrf.mxu1 }
 0x21b   : > { %v7095_v0 = vadd.f32 %v5490_v39, %v1723_v54  ;;  %v1727_v62 = vadd.f32 %v5416_v57, %v6960_v40  ;;  %v1376_v40 = vadd.f32 %v6970_v2, %v6957_v51  ;;  %v3658_v39 = vld [vmem:[%s7904_s5 + $0x48] sm:$0xff]  ;;  %v1386_v2 = vadd.f32 %v6977_v35, %v6965_v23 }
 0x21c   : > { %v7101_v25 = vpop.f32.mrf.mxu0  ;;  %5895 = vmatmul.mubr.f32.gmra.mxu1 %v3291_v34  ;;  %v1639_v1 = vpop.f32.mrf.mxu1  ;;  %5927 = vmatprep.subr.mxu0 %v3658_v39  ;;  %v1396_v35 = vadd.f32 %v6985_v7, %v6972_v19 }
 0x21d   : > { %5897 = vmatprep.mubr.f32.mxu1 %v3292_v8  ;;  %v7103_v55 = vadd.f32 %v1639_v1, %v1366_v52  ;;  %v3294_v52 = vld [vmem:[#allocation2 + $0x1a9] sm:$0xff]  ;;  %5928 = vmatpush3.msra.mxu0 %v3658_v39  ;;  %v3295_v1 = vld [vmem:[#allocation2 + $0x1b1] sm:$0xff] }
 0x21e   : > { %v5493_v12 = vpop.f32.mrf.mxu0  ;;  %v5419_v15 = vpop.f32.mrf.mxu1 }
 0x21f   : > { %v7107_v54 = vadd.f32 %v5493_v12, %v1725_v9  ;;  %v1729_v32 = vadd.f32 %v5419_v15, %v6968_v41  ;;  %v3657_v12 = vld [vmem:[%s7904_s5 + $0x40] sm:$0xff] }
 0x220   : > { %v7113_v57 = vpop.f32.mrf.mxu0  ;;  %5898 = vmatmul.mubr.f32.gmra.mxu1 %v3293_v30  ;;  %v1649_v34 = vpop.f32.mrf.mxu1  ;;  %v3296_v30 = vld [vmem:[#allocation2 + $0x1c9] sm:$0xff]  ;;  %5929 = vmatprep.subr.mxu0 %v3657_v12 }
 0x221   : > { %5900 = vmatprep.mubr.f32.mxu1 %v3294_v52  ;;  %v1728_v14 = vadd.f32 %v1649_v34, %v1376_v40  ;;  %5930 = vmatpush3.msra.mxu0 %v3657_v12  ;;  %v3297_v34 = vld [vmem:[#allocation2 + $0x1d1] sm:$0xff] }
 0x222   : > { %v5496_v8 = vpop.f32.mrf.mxu0  ;;  %v5422_v51 = vpop.f32.mrf.mxu1 }
 0x223   : > { %v7117_v41 = vadd.f32 %v5496_v8, %v1727_v62  ;;  %v1731_v9 = vadd.f32 %v5422_v51, %v6975_v37  ;;  %v3656_v8 = vld [vmem:[%s7904_s5 + $0x38] sm:$0xff] }
 0x224   : > { %v7123_v15 = vpop.f32.mrf.mxu0  ;;  %5901 = vmatmul.mubr.f32.gmra.mxu1 %v3295_v1  ;;  %v1659_v40 = vpop.f32.mrf.mxu1  ;;  %v3298_v1 = vld [vmem:[#allocation2 + $0x1e9] sm:$0xff]  ;;  %5931 = vmatprep.subr.mxu0 %v3656_v8 }
 0x225   : > { %5903 = vmatprep.mubr.f32.mxu1 %v3296_v30  ;;  %v1730_v39 = vadd.f32 %v1659_v40, %v1386_v2  ;;  %5932 = vmatpush3.msra.mxu0 %v3656_v8 }
 0x226   : > { %v5499_v52 = vpop.f32.mrf.mxu0  ;;  %v5425_v23 = vpop.f32.mrf.mxu1 }
 0x227   : > { %v7127_v37 = vadd.f32 %v5499_v52, %v1729_v32  ;;  %v1733_v62 = vadd.f32 %v5425_v23, %v6983_v61  ;;  %v1406_v61 = vadd.f32 %v6993_v13, %v6979_v46  ;;  %v3299_v52 = vld [vmem:[#allocation2 + $0x1f1] sm:$0xff] }
 0x228   : > { %v1956_v51 = vpop.f32.mrf.mxu0  ;;  %5904 = vmatmul.mubr.f32.gmra.mxu1 %v3297_v34  ;;  %v1669_v30 = vpop.f32.mrf.mxu1  ;;  %v3655_v23 = vld [vmem:[%s7904_s5 + $0x30] sm:$0xff] }
 0x229   : > { %v7133_v2 = vadd.f32 %v1956_v51, %v1728_v14  ;;  %5906 = vmatprep.mubr.f32.mxu1 %v3298_v1  ;;  %v1732_v12 = vadd.f32 %v1669_v30, %v1396_v35  ;;  %5933 = vmatprep.subr.mxu0 %v3655_v23  ;;  %v3654_v30 = vld [vmem:[%s7904_s5 + $0x28] sm:$0xff] }
 0x22a   : > { %v5502_v19 = vpop.f32.mrf.mxu0  ;;  %v5428_v7 = vpop.f32.mrf.mxu1  ;;  %5934 = vmatpush3.msra.mxu0 %v3655_v23 }
 0x22b   : > { %v7137_v32 = vadd.f32 %v5502_v19, %v1731_v9  ;;  %v1735_v40 = vadd.f32 %v5428_v7, %v6991_v24  ;;  %v3302_v9 = vld [vmem:[#allocation2 + $0x229] sm:$0xff]  ;;  %v1416_v24 = vadd.f32 %v7000_v22, %v6988_v18  ;;  %5935 = vmatprep.subr.mxu0 %v3654_v30 }
 0x22c   : > { %v1966_v34 = vpop.f32.mrf.mxu0  ;;  %5907 = vmatmul.mubr.f32.gmra.mxu1 %v3299_v52  ;;  %v1679_v14 = vpop.f32.mrf.mxu1  ;;  %5936 = vmatpush3.msra.mxu0 %v3654_v30 }
 0x22d   : > { %v7143_v35 = vadd.f32 %v1966_v34, %v1730_v39  ;;  %5909 = vmatprep.mubr.f32.mxu1 %v6892_v58  ;;  %v1734_v8 = vadd.f32 %v1679_v14, %v1406_v61  ;;  %v3303_v61 = vld [vmem:[#allocation2 + $0x231] sm:$0xff]  ;;  %v1276_v34 = vadd.f32 %v6903_v47, %v6895_v42 }
 0x22e   : > { %v5505_v46 = vpop.f32.mrf.mxu0  ;;  %v5431_v13 = vpop.f32.mrf.mxu1  ;;  %v3651_v47 = vld [vmem:[%s7904_s5 + $0x10] sm:$0xff] }
 0x22f   : > { %v7148_v51 = vadd.f32 %v5505_v46, %v1733_v62  ;;  %v1737_v1 = vadd.f32 %v5431_v13, %v6997_v21  ;;  %v1426_v21 = vadd.f32 %v7007_v53, %v6995_v26  ;;  %v1708_v53 = vadd.f32 %v7002_v10, %v1276_v34 }
 0x230   : > { %v1976_v39 = vpop.f32.mrf.mxu0  ;;  %5910 = vmatmul.mubr.f32.gmra.mxu1 %v6897_v50  ;;  %v1689_v58 = vpop.f32.mrf.mxu1  ;;  %v3653_v50 = vld [vmem:[%s7904_s5 + $0x20] sm:$0xff] }
 0x231   : > { %v7155_v19 = vadd.f32 %v1976_v39, %v1732_v12  ;;  %v1736_v7 = vadd.f32 %v1689_v58, %v1416_v24  ;;  %5912 = vmatprep.mubr.f32.mxu1 %v3302_v9  ;;  %5937 = vmatprep.subr.mxu0 %v3653_v50  ;;  %v2015_v24 = vadd.f32 %v7015_v20, %v1708_v53 }
 0x232   : > { %v5508_v18 = vpop.f32.mrf.mxu0  ;;  %v5434_v22 = vpop.f32.mrf.mxu1  ;;  %5938 = vmatpush3.msra.mxu0 %v3653_v50 }
 0x233   : > { %v7159_v62 = vadd.f32 %v5508_v18, %v1735_v40  ;;  %v1739_v52 = vadd.f32 %v5434_v22, %v7004_v3  ;;  %v3652_v3 = vld [vmem:[%s7904_s5 + $0x18] sm:$0xff]  ;;  %v3650_v18 = vld [vmem:[%s7904_s5 + $0x8] sm:$0xff] }
 0x234   : > { %v1986_v23 = vpop.f32.mrf.mxu0  ;;  %5913 = vmatmul.mubr.f32.gmra.mxu1 %v3303_v61  ;;  %v1699_v12 = vpop.f32.mrf.mxu1  ;;  %5939 = vmatprep.subr.mxu0 %v3652_v3 }
 0x235   : > { %v7167_v14 = vadd.f32 %v1986_v23, %v1734_v8  ;;  %v1738_v46 = vadd.f32 %v1699_v12, %v1426_v21  ;;  %5940 = vmatpush3.msra.mxu0 %v3652_v3 }
 0x236   : > { %v5511_v26 = vpop.f32.mrf.mxu0  ;;  %5941 = vmatprep.subr.mxu0 %v3651_v47 }
 0x237   : > { %v7170_v40 = vadd.f32 %v5511_v26, %v1737_v1  ;;  %5942 = vmatpush3.msra.mxu0 %v3651_v47  ;;  %v2023_v47 = vadd.f32 %v7056_v60, %v7037_v43 }
 0x238   : > { %v1996_v13 = vpop.f32.mrf.mxu0  ;;  %v5549_v9 = vpop.f32.mrf.mxu1  ;;  %5943 = vmatprep.subr.mxu0 %v3650_v18 }
 0x239   : > { %v7176_v30 = vadd.f32 %v1996_v13, %v1736_v7  ;;  %v7179_v42 = vadd.f32 %v5549_v9, %v7012_v17  ;;  %v2017_v7 = vadd.f32 %v7023_v38, %v7010_v31  ;;  %5944 = vmatpush3.msra.mxu0 %v3650_v18  ;;  %v2019_v31 = vadd.f32 %v7034_v11, %v7018_v27  ;;  %v3649_v38 = vld [vmem:[%s7904_s5] sm:$0xff]  ;;  %v4521_v18 = vld [vmem:[%s6366_s26 + $0x30] sm:$0xff] }
 0x23a   : > { %v5514_v10 = vpop.f32.mrf.mxu0  ;;  %v2162_v8 = vpop.f32.mrf.mxu1  ;;  %5945 = vmatprep.subr.mxu0 %v3649_v38  ;;  %v2021_v27 = vadd.f32 %v7045_v5, %v7026_v45  ;;  %6003 = vmatprep.mubr.msk.f32.mxu1 %vm408_vm1, %v4521_v18 }
 0x23b   : > { %v7184_v1 = vadd.f32 %v5514_v10, %v1739_v52  ;;  %v7186_v39 = vadd.f32 %v2162_v8, %v2015_v24  ;;  %5946 = vmatpush3.msra.mxu0 %v3649_v38 }
 0x23c   : > { %v2006_v58 = vpop.f32.mrf.mxu0  ;;  %v5552_v20 = vpop.f32.mrf.mxu1  ;;  %5995 = vmatprep.subr.msk.mxu0 %vm517_vm0, %v7083_v29 }
 0x23d   : > { %v7190_v17 = vadd.f32 %v2006_v58, %v1738_v46  ;;  %v7193_v61 = vadd.f32 %v5552_v20, %v7020_v48  ;;  %v2025_v20 = vadd.f32 %v7067_v36, %v7048_v28  ;;  %v2027_v28 = vadd.f32 %v7085_v16, %v7059_v6  ;;  %v4523_v36 = vld [vmem:[%s6366_s26 + $0x40] sm:$0xff]  ;;  %v4525_v16 = vld [vmem:[%s6366_s26 + $0x50] sm:$0xff] }
 0x23e   : > { %v7198_v22 = vpop.f32.mrf.mxu0  ;;  %v2172_v21 = vpop.f32.mrf.mxu1  ;;  %v2029_v6 = vadd.f32 %v7101_v25, %v7070_v59  ;;  %v2031_v59 = vadd.f32 %v7113_v57, %v7087_v4  ;;  %v4527_v25 = vld [vmem:[%s6366_s26 + $0x60] sm:$0xff]  ;;  %v2033_v4 = vadd.f32 %v7123_v15, %v7103_v55  ;;  %v4529_v57 = vld [vmem:[%s6366_s26 + $0x70] sm:$0xff] }
 0x23f   : > { %v7200_v52 = vadd.f32 %v2172_v21, %v2017_v7  ;;  %v4522_v21 = vld [vmem:[%s6366_s26 + $0x38] sm:$0xff] }
 0x240   : > { %v7202_v50 = vpop.f32.mrf.mxu0  ;;  %v5555_v23 = vpop.f32.mrf.mxu1  ;;  %6004 = vmatmul.mubr.msk.f32.vlgmr.msra.gmra.mxu1 %vm408_vm1, %v4522_v21 }
 0x241   : > { %v7207_v48 = vadd.f32 %v5555_v23, %v7028_v49  ;;  %6006 = vmatprep.mubr.msk.f32.mxu1 %vm408_vm1, %v4523_v36  ;;  %v4528_v36 = vld [vmem:[%s6366_s26 + $0x68] sm:$0xff] }
 0x242   : > { %v7212_v12 = vpop.f32.mrf.mxu0  ;;  %v2182_v34 = vpop.f32.mrf.mxu1 }
 0x243   : > { %v7214_v46 = vadd.f32 %v2182_v34, %v2019_v31 }
 0x244   : > { %v7216_v26 = vpop.f32.mrf.mxu0  ;;  %v5558_v53 = vpop.f32.mrf.mxu1 }
 0x245   : > { %v7223_v49 = vadd.f32 %v5558_v53, %v7039_v33 }
 0x246   : > { %v7225_v11 = vpop.f32.mrf.mxu0  ;;  %v2192_v3 = vpop.f32.mrf.mxu1 }
 0x247   : > { %v7227_v13 = vadd.f32 %v2192_v3, %v2021_v27  ;;  %v4524_v27 = vld [vmem:[%s6366_s26 + $0x48] sm:$0xff] }
 0x248   : > { %v7229_v9 = vpop.f32.mrf.mxu0  ;;  %v5561_v24 = vpop.f32.mrf.mxu1  ;;  %6007 = vmatmul.mubr.msk.f32.gmra.mxu1 %vm408_vm1, %v4524_v27 }
 0x249   : > { %v7234_v10 = vadd.f32 %v5561_v24, %v7050_v44  ;;  %6009 = vmatprep.mubr.msk.f32.mxu1 %vm408_vm1, %v4525_v16 }
 0x24a   : > { %v7236_v45 = vpop.f32.mrf.mxu0  ;;  %v2202_v5 = vpop.f32.mrf.mxu1 }
 0x24b   : > { %v7238_v33 = vadd.f32 %v2202_v5, %v2023_v47 }
 0x24c   : > { %v7240_v8 = vpop.f32.mrf.mxu0  ;;  %v5564_v58 = vpop.f32.mrf.mxu1 }
 0x24d   : > { %v7245_v7 = vadd.f32 %v5564_v58, %v7061_v63 }
 0x24e   : > { %v7248_v43 = vpop.f32.mrf.mxu0  ;;  %v2212_v44 = vpop.f32.mrf.mxu1 }
 0x24f   : > { %v7251_v60 = vadd.f32 %v2212_v44, %v2025_v20  ;;  %v4526_v20 = vld [vmem:[%s6366_s26 + $0x58] sm:$0xff] }
 0x250   : > { %v7254_v23 = vpop.f32.mrf.mxu0  ;;  %v5567_v31 = vpop.f32.mrf.mxu1  ;;  %6010 = vmatmul.mubr.msk.f32.gmra.mxu1 %vm408_vm1, %v4526_v20 }
 0x251   : > { %v7260_v63 = vadd.f32 %v5567_v31, %v7074_v56  ;;  %6012 = vmatprep.mubr.msk.f32.mxu1 %vm408_vm1, %v4527_v25 }
 0x252   : > { %v7263_v38 = vpop.f32.mrf.mxu0  ;;  %v2222_v34 = vpop.f32.mrf.mxu1 }
 0x253   : > { %v7266_v53 = vadd.f32 %v2222_v34, %v2027_v28 }
 0x254   : > { %v7269_v3 = vpop.f32.mrf.mxu0  ;;  %v5570_v24 = vpop.f32.mrf.mxu1  ;;  %6013 = vmatmul.mubr.msk.f32.gmra.mxu1 %vm408_vm1, %v4528_v36 }
 0x255   : > { %v7275_v56 = vadd.f32 %v5570_v24, %v7095_v0  ;;  %6015 = vmatprep.mubr.msk.f32.mxu1 %vm408_vm1, %v4529_v57 }
 0x256   : > { %v7278_v47 = vpop.f32.mrf.mxu0  ;;  %v2232_v5 = vpop.f32.mrf.mxu1 }
 0x257   : > { %7913 = vst [vmem:[#allocation9_spill] sm:$0xff] %v7275_v56  ;;  %v7281_v58 = vadd.f32 %v2232_v5, %v2029_v6  ;;  %v4530_v5 = vld [vmem:[%s6366_s26 + $0x78] sm:$0xff] }
 0x258   : > { %v7284_v18 = vpop.f32.mrf.mxu0  ;;  %v5573_v44 = vpop.f32.mrf.mxu1  ;;  %6016 = vmatmul.mubr.msk.f32.gmra.mxu1 %vm408_vm1, %v4530_v5  ;;  %v4534_v5 = vld [vmem:[%s6366_s26 + $0x98] sm:$0xff] }
 0x259   : > { %7914 = vst [vmem:[#allocation10_spill] sm:$0xff] %v7281_v58  ;;  %v7290_v0 = vadd.f32 %v5573_v44, %v7107_v54 }
 0x25a   : > { %v7293_v21 = vpop.f32.mrf.mxu0  ;;  %v2242_v31 = vpop.f32.mrf.mxu1 }
 0x25b   : > { %7915 = vst [vmem:[#allocation11_spill] sm:$0xff] %v7290_v0  ;;  %7916 = vst [vmem:[#allocation12_spill] sm:$0xff] %v7293_v21  ;;  %v7296_v28 = vadd.f32 %v2242_v31, %v2031_v59  ;;  %v4532_v31 = vld [vmem:[%s6366_s26 + $0x88] sm:$0xff] }
 0x25c   : > { %v7299_v34 = vpop.f32.mrf.mxu0  ;;  %v5576_v27 = vpop.f32.mrf.mxu1 }
 0x25d   : > { %7917 = vst [vmem:[#allocation13_spill] sm:$0xff] %v7296_v28  ;;  %7918 = vst [vmem:[#allocation14_spill] sm:$0xff] %v7299_v34  ;;  %v7305_v54 = vadd.f32 %v5576_v27, %v7117_v41  ;;  %v4531_v41 = vld [vmem:[%s6366_s26 + $0x80] sm:$0xff] }
 0x25e   : > { %v7308_v24 = vpop.f32.mrf.mxu0  ;;  %v2252_v6 = vpop.f32.mrf.mxu1  ;;  %6018 = vmatprep.mubr.msk.f32.mxu1 %vm408_vm1, %v4531_v41 }
 0x25f   : > { %7919 = vst [vmem:[#allocation15_spill] sm:$0xff] %v7305_v54  ;;  %7920 = vst [vmem:[#allocation16_spill] sm:$0xff] %v7308_v24  ;;  %v7311_v16 = vadd.f32 %v2252_v6, %v2033_v4  ;;  %6019 = vmatmul.mubr.msk.f32.gmra.mxu1 %vm408_vm1, %v4532_v31  ;;  %v4533_v4 = vld [vmem:[%s6366_s26 + $0x90] sm:$0xff] }
 0x260   : > { %v7314_v20 = vpop.f32.mrf.mxu0  ;;  %v5579_v44 = vpop.f32.mrf.mxu1  ;;  %6021 = vmatprep.mubr.msk.f32.mxu1 %vm408_vm1, %v4533_v4  ;;  %v4536_v4 = vld [vmem:[%s6366_s26 + $0xa8] sm:$0xff] }
 0x261   : > { %7921 = vst [vmem:[#allocation17_spill] sm:$0xff] %v7311_v16  ;;  %7922 = vst [vmem:[#allocation18_spill] sm:$0xff] %v7314_v20  ;;  %v7318_v55 = vadd.f32 %v5579_v44, %v7127_v37 }
 0x262   : > { %v7321_v15 = vpop.f32.mrf.mxu0  ;;  %v2262_v59 = vpop.f32.mrf.mxu1 }
 0x263   : > { %7923 = vst [vmem:[#allocation19_spill] sm:$0xff] %v7318_v55  ;;  %7924 = vst [vmem:[#allocation20_spill] sm:$0xff] %v7321_v15  ;;  %v7325_v25 = vadd.f32 %v2262_v59, %v7133_v2  ;;  %6022 = vmatmul.mubr.msk.f32.gmra.mxu1 %vm408_vm1, %v4534_v5  ;;  %v4535_v59 = vld [vmem:[%s6366_s26 + $0xa0] sm:$0xff]  ;;  %v4537_v5 = vld [vmem:[%s6366_s26 + $0xb0] sm:$0xff] }
 0x264   : > { %v7328_v36 = vpop.f32.mrf.mxu0  ;;  %v5582_v27 = vpop.f32.mrf.mxu1  ;;  %6024 = vmatprep.mubr.msk.f32.mxu1 %vm408_vm1, %v4535_v59  ;;  %v4538_v59 = vld [vmem:[%s6366_s26 + $0xb8] sm:$0xff] }
 0x265   : > { %7925 = vst [vmem:[#allocation21_spill] sm:$0xff] %v7325_v25  ;;  %7926 = vst [vmem:[#allocation22_spill] sm:$0xff] %v7328_v36  ;;  %v7332_v37 = vadd.f32 %v5582_v27, %v7137_v32 }
 0x266   : > { %v7335_v57 = vpop.f32.mrf.mxu0  ;;  %v2272_v6 = vpop.f32.mrf.mxu1 }
 0x267   : > { %7927 = vst [vmem:[#allocation23_spill] sm:$0xff] %v7332_v37  ;;  %7928 = vst [vmem:[#allocation24_spill] sm:$0xff] %v7335_v57  ;;  %v7339_v2 = vadd.f32 %v2272_v6, %v7143_v35  ;;  %6025 = vmatmul.mubr.msk.f32.gmra.mxu1 %vm408_vm1, %v4536_v4 }
 0x268   : > { %v7342_v44 = vpop.f32.mrf.mxu0  ;;  %v5585_v41 = vpop.f32.mrf.mxu1  ;;  %6027 = vmatprep.mubr.msk.f32.mxu1 %vm408_vm1, %v4537_v5 }
 0x269   : > { %7929 = vst [vmem:[#allocation25_spill] sm:$0xff] %v7339_v2  ;;  %7930 = vst [vmem:[#allocation26_spill] sm:$0xff] %v7342_v44  ;;  %v7346_v32 = vadd.f32 %v5585_v41, %v7148_v51 }
 0x26a   : > { %v7349_v31 = vpop.f32.mrf.mxu0  ;;  %v2282_v27 = vpop.f32.mrf.mxu1 }
 0x26b   : > { %7931 = vst [vmem:[#allocation27_spill] sm:$0xff] %v7346_v32  ;;  %7932 = vst [vmem:[#allocation28_spill] sm:$0xff] %v7349_v31  ;;  %v7353_v35 = vadd.f32 %v2282_v27, %v7155_v19  ;;  %6028 = vmatmul.mubr.msk.f32.gmra.mxu1 %vm408_vm1, %v4538_v59 }
 0x26c   : > { %v7356_v6 = vpop.f32.mrf.mxu0  ;;  %v5588_v2 = vpop.f32.mrf.mxu1 }
 0x26d   : > { %7933 = vst [vmem:[#allocation29_spill] sm:$0xff] %v7353_v35  ;;  %7934 = vst [vmem:[#allocation30_spill] sm:$0xff] %v7356_v6  ;;  %v7360_v51 = vadd.f32 %v5588_v2, %v7159_v62  ;;  %v4539_v2 = vld [vmem:[%s6366_s26 + $0xc0] sm:$0xff] }
 0x26e   : > { %v7363_v41 = vpop.f32.mrf.mxu0  ;;  %v2292_v32 = vpop.f32.mrf.mxu1  ;;  %6030 = vmatprep.mubr.msk.f32.mxu1 %vm408_vm1, %v4539_v2 }
 0x26f   : > { %7935 = vst [vmem:[#allocation31_spill] sm:$0xff] %v7360_v51  ;;  %7936 = vst [vmem:[#allocation32_spill] sm:$0xff] %v7363_v41  ;;  %v7367_v19 = vadd.f32 %v2292_v32, %v7167_v14  ;;  %v4540_v32 = vld [vmem:[%s6366_s26 + $0xc8] sm:$0xff] }
 0x270   : > { %v7370_v27 = vpop.f32.mrf.mxu0  ;;  %v5591_v35 = vpop.f32.mrf.mxu1  ;;  %6031 = vmatmul.mubr.msk.f32.gmra.mxu1 %vm408_vm1, %v4540_v32 }
 0x271   : > { %7937 = vst [vmem:[#allocation33_spill] sm:$0xff] %v7367_v19  ;;  %7938 = vst [vmem:[#allocation34_spill] sm:$0xff] %v7370_v27  ;;  %v7374_v62 = vadd.f32 %v5591_v35, %v7170_v40  ;;  %v4541_v35 = vld [vmem:[%s6366_s26 + $0xd0] sm:$0xff] }
 0x272   : > { %v7377_v4 = vpop.f32.mrf.mxu0  ;;  %v2302_v51 = vpop.f32.mrf.mxu1  ;;  %6033 = vmatprep.mubr.msk.f32.mxu1 %vm408_vm1, %v4541_v35  ;;  %v4544_v35 = vld [vmem:[%s6366_s26 + $0xe8] sm:$0xff] }
 0x273   : > { %7939 = vst [vmem:[#allocation35_spill] sm:$0xff] %v7374_v62  ;;  %7940 = vst [vmem:[#allocation36_spill] sm:$0xff] %v7377_v4  ;;  %v7381_v14 = vadd.f32 %v2302_v51, %v7176_v30  ;;  %v4542_v51 = vld [vmem:[%s6366_s26 + $0xd8] sm:$0xff] }
 0x274   : > { %v7384_v5 = vpop.f32.mrf.mxu0  ;;  %v5594_v19 = vpop.f32.mrf.mxu1  ;;  %6034 = vmatmul.mubr.msk.f32.gmra.mxu1 %vm408_vm1, %v4542_v51 }
 0x275   : > { %7941 = vst [vmem:[#allocation37_spill] sm:$0xff] %v7381_v14  ;;  %7942 = vst [vmem:[#allocation38_spill] sm:$0xff] %v7384_v5  ;;  %v7388_v40 = vadd.f32 %v5594_v19, %v7184_v1  ;;  %v4543_v1 = vld [vmem:[%s6366_s26 + $0xe0] sm:$0xff] }
 0x276   : > { %v7391_v59 = vpop.f32.mrf.mxu0  ;;  %v2312_v62 = vpop.f32.mrf.mxu1  ;;  %6036 = vmatprep.mubr.msk.f32.mxu1 %vm408_vm1, %v4543_v1  ;;  %v4548_v1 = vld [vmem:[%s6366_s26 + $0x108] sm:$0xff] }
 0x277   : > { %7943 = vst [vmem:[#allocation39_spill] sm:$0xff] %v7388_v40  ;;  %7944 = vst [vmem:[#allocation40_spill] sm:$0xff] %v7391_v59  ;;  %v7395_v30 = vadd.f32 %v2312_v62, %v7190_v17  ;;  %v4545_v40 = vld [vmem:[%s6366_s26 + $0xf0] sm:$0xff] }
 0x278   : > { %v7398_v2 = vpop.f32.mrf.mxu0  ;;  %v7400_v14 = vpop.f32.mrf.mxu1  ;;  %6037 = vmatmul.mubr.msk.f32.gmra.mxu1 %vm408_vm1, %v4544_v35 }
 0x279   : > { %7945 = vst [vmem:[#allocation41_spill] sm:$0xff] %v7395_v30  ;;  %7946 = vst [vmem:[#allocation42_spill] sm:$0xff] %v7398_v2  ;;  %6039 = vmatprep.mubr.msk.f32.mxu1 %vm408_vm1, %v4545_v40  ;;  %v4546_v30 = vld [vmem:[%s6366_s26 + $0xf8] sm:$0xff] }
 0x27a   : > { %v7404_v19 = vpop.f32.mrf.mxu0  ;;  %v7406_v32 = vpop.f32.mrf.mxu1 }
 0x27b   : > { %7947 = vst [vmem:[#allocation43_spill] sm:$0xff] %v7404_v19  ;;  %v4547_v19 = vld [vmem:[%s6366_s26 + $0x100] sm:$0xff] }
 0x27c   : > { %v7411_v17 = vpop.f32.mrf.mxu0  ;;  %v7413_v62 = vpop.f32.mrf.mxu1  ;;  %6040 = vmatmul.mubr.msk.f32.gmra.mxu1 %vm408_vm1, %v4546_v30 }
 0x27d   : > { %7948 = vst [vmem:[#allocation44_spill] sm:$0xff] %v7411_v17  ;;  %6042 = vmatprep.mubr.msk.f32.mxu1 %vm408_vm1, %v4547_v19 }
 0x27e   : > { %v5789_v51 = vpop.f32.mrf.mxu0  ;;  %v7418_v2 = vpop.f32.mrf.mxu1 }
 0x280   : > { %v3081_v59 = vpop.f32.mrf.mxu0  ;;  %v7421_v5 = vpop.f32.mrf.mxu1  ;;  %6043 = vmatmul.mubr.msk.f32.gmra.mxu1 %vm408_vm1, %v4548_v1 }
 0x282   : > { %v5792_v17 = vpop.f32.mrf.mxu0  ;;  %v7426_v4 = vpop.f32.mrf.mxu1 }
 0x284   : > { %v3091_v27 = vpop.f32.mrf.mxu0  ;;  %v7428_v35 = vpop.f32.mrf.mxu1 }
 0x286   : > { %v7431_v40 = vpop.f32.mrf.mxu0  ;;  %v7433_v41 = vpop.f32.mrf.mxu1 }
 0x288   : > { %v7435_v6 = vpop.f32.mrf.mxu1  ;;  %v7437_v31 = vpop.f32.mrf.mxu0 }
 0x28a   : > { %v7439_v30 = vpop.f32.mrf.mxu1  ;;  %v7443_v37 = vpop.f32.mrf.mxu0 }
 0x28c   : > { %v7441_v19 = vpop.f32.mrf.mxu1  ;;  %v7449_v57 = vpop.f32.mrf.mxu0 }
 0x28e   : > { %v7445_v44 = vpop.f32.mrf.mxu1  ;;  %v7455_v36 = vpop.f32.mrf.mxu0 }
 0x290   : > { %v7447_v25 = vpop.f32.mrf.mxu1  ;;  %v7461_v54 = vpop.f32.mrf.mxu0 }
 0x291   : > { %7949 = vst [vmem:[#allocation45_spill] sm:$0xff] %v7447_v25 }
 0x292   : > { %v7451_v1 = vpop.f32.mrf.mxu1  ;;  %v7467_v24 = vpop.f32.mrf.mxu0 }
 0x293   : > { %7950 = vst [vmem:[#allocation46_spill] sm:$0xff] %v7451_v1 }
 0x294   : > { %v7453_v55 = vpop.f32.mrf.mxu1  ;;  %v7473_v58 = vpop.f32.mrf.mxu0 }
 0x295   : > { %7951 = vst [vmem:[#allocation47_spill] sm:$0xff] %v7453_v55 }
 0x296   : > { %v7457_v16 = vpop.f32.mrf.mxu1 }
 0x297   : > { %7952 = vst [vmem:[#allocation48_spill] sm:$0xff] %v7457_v16  ;;  %v7479_v16 = vpop.f32.mrf.mxu0 }
 0x298   : > { %v7459_v15 = vpop.f32.mrf.mxu1 }
 0x299   : > { %7953 = vst [vmem:[#allocation49_spill] sm:$0xff] %v7459_v15 }
 0x29a   : > { %v7463_v20 = vpop.f32.mrf.mxu1 }
 0x29b   : > { %7954 = vst [vmem:[#allocation50_spill] sm:$0xff] %v7463_v20  ;;  %v7485_v20 = vpop.f32.mrf.mxu0 }
 0x29c   : > { %v7465_v28 = vpop.f32.mrf.mxu1  ;;  %7962 = vst [vmem:[#allocation58_spill] sm:$0xff] %v7485_v20 }
 0x29d   : > { %7955 = vst [vmem:[#allocation51_spill] sm:$0xff] %v7465_v28 }
 0x29e   : > { %v7469_v0 = vpop.f32.mrf.mxu1 }
 0x29f   : > { %7956 = vst [vmem:[#allocation52_spill] sm:$0xff] %v7469_v0  ;;  %v7491_v0 = vpop.f32.mrf.mxu0 }
 0x2a0   : > { %v7471_v34 = vpop.f32.mrf.mxu1  ;;  %7965 = vst [vmem:[#allocation61_spill] sm:$0xff] %v7491_v0 }
 0x2a1   : > { %7957 = vst [vmem:[#allocation53_spill] sm:$0xff] %v7471_v34 }
 0x2a2   : > { %v7475_v55 = vpop.f32.mrf.mxu1 }
 0x2a3   : > { %7958 = vst [vmem:[#allocation54_spill] sm:$0xff] %v7475_v55  ;;  %v7497_v55 = vpop.f32.mrf.mxu0 }
 0x2a4   : > { %v7477_v1 = vpop.f32.mrf.mxu1  ;;  %7968 = vst [vmem:[#allocation64_spill] sm:$0xff] %v7497_v55 }
 0x2a5   : > { %7959 = vst [vmem:[#allocation55_spill] sm:$0xff] %v7477_v1  ;;  %v7508_v20 = vpop.f32.mrf.mxu0 }
 0x2a6   : > { %v7481_v15 = vpop.f32.mrf.mxu1 }
 0x2a7   : > { %7960 = vst [vmem:[#allocation56_spill] sm:$0xff] %v7481_v15  ;;  %v2628_v15 = vadd.f32 %v7198_v22, %v7179_v42  ;;  %v2629_v42 = vadd.f32 %v7216_v26, %v7200_v52  ;;  %v2631_v52 = vadd.f32 %v7229_v9, %v7214_v46 }
 0x2a8   : > { %v7483_v21 = vpop.f32.mrf.mxu1 }
 0x2a9   : > { %7961 = vst [vmem:[#allocation57_spill] sm:$0xff] %v7483_v21 }
 0x2aa   : > { %v7487_v28 = vpop.f32.mrf.mxu1 }
 0x2ab   : > { %7963 = vst [vmem:[#allocation59_spill] sm:$0xff] %v7487_v28  ;;  %v2627_v28 = vadd.f32 %v7202_v50, %v7186_v39  ;;  %v7521_v50 = vld [vmem:[%s7903_s4] ss:$0 sm:$0xff] }
 0x2ac   : > { %v7489_v56 = vpop.f32.mrf.mxu1 }
 0x2ad   : > { %7964 = vst [vmem:[#allocation60_spill] sm:$0xff] %v7489_v56  ;;  %v2935_v56 = vadd.f32 %v7400_v14, %v2628_v15  ;;  %v7523_v15 = vpop.f32.mrf.mxu0 }
 0x2ae   : > { %v7493_v34 = vpop.f32.mrf.mxu1 }
 0x2af   : > { %7966 = vst [vmem:[#allocation62_spill] sm:$0xff] %v7493_v34  ;;  %v3241_v34 = vadd.f32 %v5789_v51, %v2935_v56  ;;  %v2936_v56 = vadd.f32 %v7418_v2, %v2629_v42  ;;  %v2938_v2 = vadd.f32 %v7426_v4, %v2631_v52  ;;  %v2636_v4 = vadd.f32 %v7248_v43, %v7234_v10 }
 0x2b0   : > { %v7495_v25 = vpop.f32.mrf.mxu1 }
 0x2b1   : > { %7967 = vst [vmem:[#allocation63_spill] sm:$0xff] %v7495_v25  ;;  %v2630_v25 = vadd.f32 %v7212_v12, %v7193_v61  ;;  %v2632_v61 = vadd.f32 %v7225_v11, %v7207_v48  ;;  %v7535_v48 = vpop.f32.mrf.mxu0 }
 0x2b2   : > { %v7499_v1 = vpop.f32.mrf.mxu1 }
 0x2b3   : > { %7969 = vst [vmem:[#allocation65_spill] sm:$0xff] %v7499_v1  ;;  %v2934_v1 = vadd.f32 %v7406_v32, %v2627_v28 }
 0x2b4   : > { %v7503_v21 = vpop.f32.mrf.mxu1 }
 0x2b5   : > { %7970 = vst [vmem:[#allocation66_spill] sm:$0xff] %v7503_v21  ;;  %v3240_v22 = vadd.f32 %v3081_v59, %v2934_v1  ;;  %v2937_v21 = vadd.f32 %v7413_v62, %v2630_v25  ;;  %v2939_v25 = vadd.f32 %v7421_v5, %v2632_v61  ;;  %v2634_v62 = vadd.f32 %v7236_v45, %v7223_v49 }
 0x2b6   : > { %v7510_v0 = vpop.f32.mrf.mxu1  ;;  %v3244_v1 = vadd.f32 %v7437_v31, %v2938_v2  ;;  %v2635_v31 = vadd.f32 %v7254_v23, %v7238_v33 }
 0x2b7   : > { %v3243_v12 = vadd.f32 %v5792_v17, %v2937_v21  ;;  %v3245_v21 = vadd.f32 %v7431_v40, %v2939_v25  ;;  %v2941_v49 = vadd.f32 %v7428_v35, %v2634_v62  ;;  %v7547_v40 = vpop.f32.mrf.mxu0 }
 0x2b8   : > { %v5869_v55 = vpop.f32.mrf.mxu1  ;;  %v2942_v23 = vadd.f32 %v7439_v30, %v2635_v31  ;;  %v7978_v31 = vld [vmem:[#allocation47_spill] sm:$0xff] }
 0x2b9   : > { %v3547_v39 = vadd.f32 %v5869_v55, %v3241_v34  ;;  %v3242_v55 = vadd.f32 %v3091_v27, %v2936_v56  ;;  %v2633_v27 = vadd.f32 %v7240_v8, %v7227_v13  ;;  %v3247_v13 = vadd.f32 %v7443_v37, %v2941_v49 }
 0x2ba   : > { %v3387_v14 = vpop.f32.mrf.mxu1  ;;  %v3248_v25 = vadd.f32 %v7461_v54, %v2942_v23  ;;  %v2639_v54 = vadd.f32 %v7284_v18, %v7266_v53  ;;  %v7974_v18 = vld [vmem:[#allocation46_spill] sm:$0xff] }
 0x2bb   : > { %v3546_v28 = vadd.f32 %v3387_v14, %v3240_v22  ;;  %v3586_v26 = vadd.f32 %v7521_v50, %v3547_v39  ;;  %v2940_v8 = vadd.f32 %v7433_v41, %v2633_v27  ;;  %v2638_v41 = vadd.f32 %v7263_v38, %v7245_v7 }
 0x2bc   : > { %v5872_v34 = vpop.f32.mrf.mxu1 }
 0x2bd   : > { %v3585_v59 = vadd.f32 %v7521_v50, %v3546_v28  ;;  %v3549_v32 = vadd.f32 %v5872_v34, %v3243_v12  ;;  %v3618_v17 = vmax.f32 %v3586_v26, 0.0  ;;  %v3246_v43 = vadd.f32 %v7449_v57, %v2940_v8  ;;  %v7561_v28 = vpop.f32.mrf.mxu0 }
 0x2be   : > { %v3397_v11 = vpop.f32.mrf.mxu1  ;;  %v2943_v12 = vadd.f32 %v7435_v6, %v2636_v4  ;;  %v2637_v57 = vadd.f32 %v7269_v3, %v7251_v60  ;;  %v2945_v7 = vadd.f32 %v7441_v19, %v2638_v41  ;;  %v7981_v41 = vld [vmem:[#allocation61_spill] sm:$0xff] }
 0x2bf   : > { %v3617_v46 = vmax.f32 %v3585_v59, 0.0  ;;  %v3548_v9 = vadd.f32 %v3397_v11, %v3242_v55  ;;  %v3588_v5 = vadd.f32 %v7521_v50, %v3549_v32  ;;  %v7573_v30 = vpop.f32.mrf.mxu0 }
 0x2c0   : > { %v5875_v51 = vpop.f32.mrf.mxu1  ;;  %v3249_v33 = vadd.f32 %v7455_v36, %v2943_v12  ;;  %v2640_v36 = vadd.f32 %v7278_v47, %v7260_v63  ;;  %v3251_v60 = vadd.f32 %v7467_v24, %v2945_v7  ;;  %v2944_v3 = vadd.f32 %v7445_v44, %v2637_v57  ;;  %v7971_v63 = vld [vmem:[#allocation45_spill] sm:$0xff] }
 0x2c1   : > { %v3587_v45 = vadd.f32 %v7521_v50, %v3548_v9  ;;  %v3551_v42 = vadd.f32 %v5875_v51, %v3245_v21  ;;  %5947 = vmatprep.mubr.f32.mxu0 %v3617_v46  ;;  %v3620_v35 = vmax.f32 %v3588_v5, 0.0  ;;  %v7972_v24 = vld [vmem:[#allocation9_spill] sm:$0xff]  ;;  %v7585_v5 = vpop.f32.mrf.mxu0 }
 0x2c2   : > { %v3407_v22 = vpop.f32.mrf.mxu1  ;;  %5948 = vmatmul.mubr.f32.vlgmr.msra.gmra.mxu0 %v3618_v17  ;;  %v3250_v46 = vadd.f32 %v7473_v58, %v2944_v3  ;;  %v2947_v47 = vadd.f32 %v7971_v63, %v2640_v36  ;;  %v7973_v17 = vld [vmem:[#allocation12_spill] sm:$0xff]  ;;  %v7975_v58 = vld [vmem:[#allocation10_spill] sm:$0xff]  ;;  %v7983_v57 = vld [vmem:[#allocation13_spill] sm:$0xff] }
 0x2c3   : > { %v3619_v39 = vmax.f32 %v3587_v45, 0.0  ;;  %v3550_v14 = vadd.f32 %v3407_v22, %v3244_v1  ;;  %5996 = vmatpush3.msk.msra.mxu0 %vm517_vm0, %v7083_v29  ;;  %v3590_v61 = vadd.f32 %v7521_v50, %v3551_v42  ;;  %v2642_v44 = vadd.f32 %v7973_v17, %v7972_v24  ;;  %v7976_v42 = vld [vmem:[#allocation14_spill] sm:$0xff]  ;;  %v7986_v36 = vld [vmem:[#allocation49_spill] sm:$0xff] }
 0x2c4   : > { %v5878_v10 = vpop.f32.mrf.mxu1  ;;  %v3253_v53 = vadd.f32 %v7479_v16, %v2947_v47  ;;  %v2946_v1 = vadd.f32 %v7974_v18, %v2639_v54  ;;  %v2641_v4 = vadd.f32 %v7976_v42, %v7975_v58  ;;  %v7979_v16 = vld [vmem:[#allocation11_spill] sm:$0xff]  ;;  %v7991_v24 = vld [vmem:[#allocation22_spill] sm:$0xff]  ;;  %v7994_v42 = vld [vmem:[#allocation24_spill] sm:$0xff] }
 0x2c5   : > { %v3589_v37 = vadd.f32 %v7521_v50, %v3550_v14  ;;  %v3553_v56 = vadd.f32 %v5878_v10, %v3247_v13  ;;  %5950 = vmatprep.mubr.f32.mxu0 %v3619_v39  ;;  %v3622_v6 = vmax.f32 %v3590_v61, 0.0  ;;  %v7977_v39 = vld [vmem:[#allocation58_spill] sm:$0xff] }
 0x2c6   : > { %v3417_v29 = vpop.f32.mrf.mxu1  ;;  %5951 = vmatmul.mubr.f32.gmra.mxu0 %v3620_v35  ;;  %v3252_v14 = vadd.f32 %v7977_v39, %v2946_v1  ;;  %v2949_v35 = vadd.f32 %v7978_v31, %v2642_v44  ;;  %v7992_v1 = vld [vmem:[#allocation51_spill] sm:$0xff]  ;;  %v7995_v39 = vld [vmem:[#allocation52_spill] sm:$0xff] }
 0x2c7   : > { %v3621_v52 = vmax.f32 %v3589_v37, 0.0  ;;  %v3552_v26 = vadd.f32 %v3417_v29, %v3246_v43  ;;  %v3592_v34 = vadd.f32 %v7521_v50, %v3553_v56  ;;  %v7980_v43 = vld [vmem:[#allocation16_spill] sm:$0xff]  ;;  %v7597_v37 = vpop.f32.mrf.mxu0 }
 0x2c8   : > { %v5881_v55 = vpop.f32.mrf.mxu1  ;;  %v2644_v12 = vadd.f32 %v7980_v43, %v7979_v16  ;;  %v3255_v29 = vadd.f32 %v7981_v41, %v2949_v35  ;;  %v7998_v41 = vld [vmem:[#allocation53_spill] sm:$0xff] }
 0x2c9   : > { %v3591_v38 = vadd.f32 %v7521_v50, %v3552_v26  ;;  %v3555_v59 = vadd.f32 %v5881_v55, %v3249_v33  ;;  %5953 = vmatprep.mubr.f32.mxu0 %v3621_v52  ;;  %v3624_v19 = vmax.f32 %v3592_v34, 0.0  ;;  %v7982_v33 = vld [vmem:[#allocation48_spill] sm:$0xff] }
 0x2ca   : > { %v3427_v32 = vpop.f32.mrf.mxu1  ;;  %5954 = vmatmul.mubr.f32.gmra.mxu0 %v3622_v6  ;;  %v2948_v23 = vadd.f32 %v7982_v33, %v2641_v4  ;;  %v7984_v6 = vld [vmem:[#allocation18_spill] sm:$0xff] }
 0x2cb   : > { %v3623_v62 = vmax.f32 %v3591_v38, 0.0  ;;  %v3554_v11 = vadd.f32 %v3427_v32, %v3248_v25  ;;  %v3594_v21 = vadd.f32 %v7521_v50, %v3555_v59  ;;  %v2643_v34 = vadd.f32 %v7984_v6, %v7983_v57  ;;  %v7985_v38 = vld [vmem:[#allocation64_spill] sm:$0xff] }
 0x2cc   : > { %v5884_v2 = vpop.f32.mrf.mxu1  ;;  %v3254_v59 = vadd.f32 %v7985_v38, %v2948_v23  ;;  %v2951_v32 = vadd.f32 %v7986_v36, %v2644_v12 }
 0x2cd   : > { %v3593_v9 = vadd.f32 %v7521_v50, %v3554_v11  ;;  %v3557_v27 = vadd.f32 %v5884_v2, %v3251_v60  ;;  %5956 = vmatprep.mubr.f32.mxu0 %v3623_v62  ;;  %v3626_v22 = vmax.f32 %v3594_v21, 0.0  ;;  %v7987_v62 = vld [vmem:[#allocation15_spill] sm:$0xff]  ;;  %v7988_v11 = vld [vmem:[#allocation20_spill] sm:$0xff] }
 0x2ce   : > { %v3437_v51 = vpop.f32.mrf.mxu1  ;;  %5957 = vmatmul.mubr.f32.gmra.mxu0 %v3624_v19  ;;  %v2646_v54 = vadd.f32 %v7988_v11, %v7987_v62  ;;  %v7609_v19 = vpop.f32.mrf.mxu0  ;;  %v3257_v2 = vadd.f32 %v7508_v20, %v2951_v32  ;;  %v7993_v20 = vld [vmem:[#allocation19_spill] sm:$0xff] }
 0x2cf   : > { %v3625_v49 = vmax.f32 %v3593_v9, 0.0  ;;  %v3556_v45 = vadd.f32 %v3437_v51, %v3250_v46  ;;  %v3596_v13 = vadd.f32 %v7521_v50, %v3557_v27  ;;  %v7989_v46 = vld [vmem:[#allocation50_spill] sm:$0xff]  ;;  %v7990_v27 = vld [vmem:[#allocation17_spill] sm:$0xff]  ;;  %v2648_v4 = vadd.f32 %v7994_v42, %v7993_v20  ;;  %v8004_v11 = vld [vmem:[#allocation55_spill] sm:$0xff] }
 0x2d0   : > { %v5887_v8 = vpop.f32.mrf.mxu1  ;;  %v2950_v63 = vadd.f32 %v7989_v46, %v2643_v34  ;;  %v2645_v17 = vadd.f32 %v7991_v24, %v7990_v27  ;;  %v8006_v46 = vld [vmem:[#allocation32_spill] sm:$0xff]  ;;  %v8010_v20 = vld [vmem:[#allocation57_spill] sm:$0xff] }
 0x2d1   : > { %v3595_v61 = vadd.f32 %v7521_v50, %v3556_v45  ;;  %v3559_v10 = vadd.f32 %v5887_v8, %v3253_v53  ;;  %5959 = vmatprep.mubr.f32.mxu0 %v3625_v49  ;;  %v3628_v55 = vmax.f32 %v3596_v13, 0.0  ;;  %v2953_v49 = vadd.f32 %v7992_v1, %v2646_v54  ;;  %v8007_v24 = vld [vmem:[#allocation56_spill] sm:$0xff] }
 0x2d2   : > { %v3447_v56 = vpop.f32.mrf.mxu1  ;;  %5960 = vmatmul.mubr.f32.gmra.mxu0 %v3626_v22  ;;  %v3256_v18 = vadd.f32 %v7523_v15, %v2950_v63  ;;  %v3201_v22 = vpop.f32.mrf.mxu0  ;;  %v7997_v15 = vld [vmem:[#allocation26_spill] sm:$0xff] }
 0x2d3   : > { %v3627_v52 = vmax.f32 %v3595_v61, 0.0  ;;  %v3558_v26 = vadd.f32 %v3447_v56, %v3252_v14  ;;  %v3598_v25 = vadd.f32 %v7521_v50, %v3559_v10  ;;  %v3259_v8 = vadd.f32 %v7535_v48, %v2953_v49  ;;  %v7996_v61 = vld [vmem:[#allocation21_spill] sm:$0xff]  ;;  %v7999_v48 = vld [vmem:[#allocation23_spill] sm:$0xff] }
 0x2d4   : > { %v5890_v7 = vpop.f32.mrf.mxu1  ;;  %v2952_v14 = vadd.f32 %v7995_v39, %v2645_v17  ;;  %v2647_v10 = vadd.f32 %v7997_v15, %v7996_v61  ;;  %v5828_v57 = vpop.f32.mrf.mxu0  ;;  %v8013_v61 = vld [vmem:[#allocation59_spill] sm:$0xff] }
 0x2d5   : > { %v3597_v60 = vadd.f32 %v7521_v50, %v3558_v26  ;;  %v3561_v3 = vadd.f32 %v5890_v7, %v3255_v29  ;;  %5962 = vmatprep.mubr.f32.mxu0 %v3627_v52  ;;  %v3630_v44 = vmax.f32 %v3598_v25, 0.0  ;;  %v2955_v29 = vadd.f32 %v7998_v41, %v2648_v4  ;;  %v8000_v52 = vld [vmem:[#allocation28_spill] sm:$0xff] }
 0x2d6   : > { %v3457_v21 = vpop.f32.mrf.mxu1  ;;  %5963 = vmatmul.mubr.f32.gmra.mxu0 %v3628_v55  ;;  %v3258_v56 = vadd.f32 %v7547_v40, %v2952_v14  ;;  %v2650_v26 = vadd.f32 %v8000_v52, %v7999_v48  ;;  %v8001_v55 = vld [vmem:[#allocation54_spill] sm:$0xff] }
 0x2d7   : > { %v3629_v47 = vmax.f32 %v3597_v60, 0.0  ;;  %v3560_v9 = vadd.f32 %v3457_v21, %v3254_v59  ;;  %v3600_v51 = vadd.f32 %v7521_v50, %v3561_v3  ;;  %v3261_v34 = vadd.f32 %v7561_v28, %v2955_v29  ;;  %v8002_v59 = vld [vmem:[#allocation25_spill] sm:$0xff]  ;;  %v8003_v40 = vld [vmem:[#allocation30_spill] sm:$0xff]  ;;  %v8005_v28 = vld [vmem:[#allocation27_spill] sm:$0xff] }
 0x2d8   : > { %v5893_v53 = vpop.f32.mrf.mxu1  ;;  %v2954_v25 = vadd.f32 %v8001_v55, %v2647_v10  ;;  %v2649_v36 = vadd.f32 %v8003_v40, %v8002_v59  ;;  %v2957_v54 = vadd.f32 %v8004_v11, %v2650_v26  ;;  %v2652_v63 = vadd.f32 %v8006_v46, %v8005_v28 }
 0x2d9   : > { %v3599_v45 = vadd.f32 %v7521_v50, %v3560_v9  ;;  %v3563_v58 = vadd.f32 %v5893_v53, %v3257_v2  ;;  %5965 = vmatprep.mubr.f32.mxu0 %v3629_v47  ;;  %v3632_v16 = vmax.f32 %v3600_v51, 0.0  ;;  %v3211_v47 = vpop.f32.mrf.mxu0  ;;  %v8008_v53 = vld [vmem:[#allocation29_spill] sm:$0xff] }
 0x2da   : > { %v3467_v13 = vpop.f32.mrf.mxu1  ;;  %5966 = vmatmul.mubr.f32.gmra.mxu0 %v3630_v44  ;;  %v3260_v62 = vadd.f32 %v7573_v30, %v2954_v25  ;;  %v3263_v27 = vadd.f32 %v7585_v5, %v2957_v54  ;;  %v2956_v17 = vadd.f32 %v8007_v24, %v2649_v36  ;;  %v8009_v30 = vld [vmem:[#allocation34_spill] sm:$0xff]  ;;  %v2959_v42 = vadd.f32 %v8010_v20, %v2652_v63  ;;  %v8011_v5 = vld [vmem:[#allocation31_spill] sm:$0xff] }
 0x2db   : > { %v3631_v31 = vmax.f32 %v3599_v45, 0.0  ;;  %v3562_v35 = vadd.f32 %v3467_v13, %v3256_v18  ;;  %v3602_v43 = vadd.f32 %v7521_v50, %v3563_v58  ;;  %v2651_v18 = vadd.f32 %v8009_v30, %v8008_v53  ;;  %v5831_v14 = vpop.f32.mrf.mxu0  ;;  %v8023_v63 = vld [vmem:[#allocation39_spill] sm:$0xff] }
 0x2dc   : > { %v5896_v12 = vpop.f32.mrf.mxu1  ;;  %v3262_v58 = vadd.f32 %v7597_v37, %v2956_v17  ;;  %v8015_v37 = vld [vmem:[#allocation38_spill] sm:$0xff] }
 0x2dd   : > { %v3601_v33 = vadd.f32 %v7521_v50, %v3562_v35  ;;  %v3565_v23 = vadd.f32 %v5896_v12, %v3259_v8  ;;  %5968 = vmatprep.mubr.f32.mxu0 %v3631_v31  ;;  %v3634_v32 = vmax.f32 %v3602_v43, 0.0  ;;  %v8012_v8 = vld [vmem:[#allocation36_spill] sm:$0xff]  ;;  %v3265_v35 = vadd.f32 %v7609_v19, %v2959_v42  ;;  %v8014_v43 = vld [vmem:[#allocation33_spill] sm:$0xff]  ;;  %v3221_v55 = vpop.f32.mrf.mxu0  ;;  %v8028_v42 = vld [vmem:[#allocation66_spill] sm:$0xff] }
 0x2de   : > { %v3477_v6 = vpop.f32.mrf.mxu1  ;;  %5969 = vmatmul.mubr.f32.gmra.mxu0 %v3632_v16  ;;  %v2654_v39 = vadd.f32 %v8012_v8, %v8011_v5  ;;  %v2958_v15 = vadd.f32 %v8013_v61, %v2651_v18  ;;  %v2653_v12 = vadd.f32 %v8015_v37, %v8014_v43  ;;  %v8018_v19 = vld [vmem:[#allocation40_spill] sm:$0xff]  ;;  %v8026_v18 = vld [vmem:[#allocation41_spill] sm:$0xff] }
 0x2df   : > { %v3633_v7 = vmax.f32 %v3601_v33, 0.0  ;;  %v3564_v38 = vadd.f32 %v3477_v6, %v3258_v56  ;;  %v3604_v60 = vadd.f32 %v7521_v50, %v3565_v23  ;;  %v8016_v23 = vld [vmem:[#allocation60_spill] sm:$0xff]  ;;  %v8017_v6 = vld [vmem:[#allocation35_spill] sm:$0xff] }
 0x2e0   : > { %v5899_v3 = vpop.f32.mrf.mxu1  ;;  %v3264_v33 = vadd.f32 %v3201_v22, %v2958_v15  ;;  %v2961_v48 = vadd.f32 %v8016_v23, %v2654_v39 }
 0x2e1   : > { %v3603_v21 = vadd.f32 %v7521_v50, %v3564_v38  ;;  %v3567_v2 = vadd.f32 %v5899_v3, %v3261_v34  ;;  %5971 = vmatprep.mubr.f32.mxu0 %v3633_v7  ;;  %v3636_v1 = vmax.f32 %v3604_v60, 0.0  ;;  %v2656_v34 = vadd.f32 %v8018_v19, %v8017_v6  ;;  %v8019_v38 = vld [vmem:[#allocation62_spill] sm:$0xff]  ;;  %v4518_v6 = vld [vmem:[%s6366_s26 + $0x18] sm:$0xff]  ;;  %v4519_v19 = vld [vmem:[%s6366_s26 + $0x20] sm:$0xff] }
 0x2e2   : > { %v3487_v9 = vpop.f32.mrf.mxu1  ;;  %5972 = vmatmul.mubr.f32.gmra.mxu0 %v3634_v32  ;;  %v3267_v7 = vadd.f32 %v5828_v57, %v2961_v48  ;;  %v2960_v59 = vadd.f32 %v8019_v38, %v2653_v12  ;;  %v8020_v32 = vld [vmem:[#allocation37_spill] sm:$0xff]  ;;  %v8021_v60 = vld [vmem:[#allocation42_spill] sm:$0xff]  ;;  %v8024_v57 = vld [vmem:[#allocation43_spill] sm:$0xff] }
 0x2e3   : > { %v3635_v44 = vmax.f32 %v3603_v21, 0.0  ;;  %v3566_v51 = vadd.f32 %v3487_v9, %v3260_v62  ;;  %v3606_v49 = vadd.f32 %v7521_v50, %v3567_v2  ;;  %v2655_v22 = vadd.f32 %v8021_v60, %v8020_v32  ;;  %v8022_v21 = vld [vmem:[#allocation63_spill] sm:$0xff] }
 0x2e4   : > { %v5902_v45 = vpop.f32.mrf.mxu1  ;;  %v3266_v54 = vadd.f32 %v3211_v47, %v2960_v59  ;;  %v2963_v2 = vadd.f32 %v8022_v21, %v2656_v34  ;;  %v2658_v9 = vadd.f32 %v8024_v57, %v8023_v63  ;;  %v4520_v34 = vld [vmem:[%s6366_s26 + $0x28] sm:$0xff] }
 0x2e5   : > { %v3605_v4 = vadd.f32 %v7521_v50, %v3566_v51  ;;  %v3569_v13 = vadd.f32 %v5902_v45, %v3263_v27  ;;  %5974 = vmatprep.mubr.f32.mxu0 %v3635_v44  ;;  %v3638_v56 = vmax.f32 %v3606_v49, 0.0  ;;  %v5834_v27 = vpop.f32.mrf.mxu0  ;;  %v8025_v44 = vld [vmem:[#allocation65_spill] sm:$0xff] }
 0x2e6   : > { %v3497_v31 = vpop.f32.mrf.mxu1  ;;  %5975 = vmatmul.mubr.f32.gmra.mxu0 %v3636_v1  ;;  %v3269_v17 = vadd.f32 %v5831_v14, %v2963_v2  ;;  %v2962_v51 = vadd.f32 %v8025_v44, %v2655_v22  ;;  %v8027_v1 = vld [vmem:[#allocation44_spill] sm:$0xff] }
 0x2e7   : > { %v3637_v10 = vmax.f32 %v3605_v4, 0.0  ;;  %v3568_v16 = vadd.f32 %v3497_v31, %v3262_v58  ;;  %v3608_v41 = vadd.f32 %v7521_v50, %v3569_v13  ;;  %v2657_v47 = vadd.f32 %v8027_v1, %v8026_v18  ;;  %v3231_v8 = vpop.f32.mrf.mxu0 }
 0x2e8   : > { %v5905_v29 = vpop.f32.mrf.mxu1  ;;  %v3268_v20 = vadd.f32 %v3221_v55, %v2962_v51  ;;  %v2965_v4 = vadd.f32 %v8028_v42, %v2658_v9  ;;  %v7717_v9 = vld [vmem:[%s7905_s6] ss:$0 sm:$0xff] }
 0x2e9   : > { %v3607_v52 = vadd.f32 %v7521_v50, %v3568_v16  ;;  %v3571_v26 = vadd.f32 %v5905_v29, %v3265_v35  ;;  %5977 = vmatprep.mubr.f32.mxu0 %v3637_v10  ;;  %v3640_v3 = vmax.f32 %v3608_v41, 0.0  ;;  %v2964_v14 = vadd.f32 %v7510_v0, %v2657_v47 }
 0x2ea   : > { %v3507_v25 = vpop.f32.mrf.mxu1  ;;  %5978 = vmatmul.mubr.f32.gmra.mxu0 %v3638_v56  ;;  %v3271_v31 = vadd.f32 %v5834_v27, %v2965_v4 }
 0x2eb   : > { %v3639_v40 = vmax.f32 %v3607_v52, 0.0  ;;  %v3570_v36 = vadd.f32 %v3507_v25, %v3264_v33  ;;  %v3610_v62 = vadd.f32 %v7521_v50, %v3571_v26  ;;  %v3270_v43 = vadd.f32 %v3231_v8, %v2964_v14  ;;  %v4517_v26 = vld [vmem:[%s6366_s26 + $0x10] sm:$0xff]  ;;  %s7846_s26 = scalar_lea.hbm %s7908_s9, %s4588_s18 }
 0x2ec   : > { %v5908_v11 = vpop.f32.mrf.mxu1 }
 0x2ed   : > { %v3609_v28 = vadd.f32 %v7521_v50, %v3570_v36  ;;  %v3573_v46 = vadd.f32 %v5908_v11, %v3267_v7  ;;  %5980 = vmatprep.mubr.f32.mxu0 %v3639_v40  ;;  %v3642_v49 = vmax.f32 %v3610_v62, 0.0 }
 0x2ee   : > { %v3517_v24 = vpop.f32.mrf.mxu1  ;;  %5981 = vmatmul.mubr.f32.gmra.mxu0 %v3640_v3 }
 0x2ef   : > { %v3641_v53 = vmax.f32 %v3609_v28, 0.0  ;;  %v3572_v30 = vadd.f32 %v3517_v24, %v3266_v54  ;;  %v3612_v45 = vadd.f32 %v7521_v50, %v3573_v46  ;;  %v7706_v28 = vld [vmem:[%s7907_s8] ss:$0 sm:$0xff] }
 0x2f0   : > { %v5911_v58 = vpop.f32.mrf.mxu1 }
 0x2f1   : > { %v3611_v13 = vadd.f32 %v7521_v50, %v3572_v30  ;;  %v3575_v5 = vadd.f32 %v5911_v58, %v3269_v17  ;;  %5983 = vmatprep.mubr.f32.mxu0 %v3641_v53  ;;  %v3644_v15 = vmax.f32 %v3612_v45, 0.0 }
 0x2f2   : > { %v3527_v39 = vpop.f32.mrf.mxu1  ;;  %5984 = vmatmul.mubr.f32.gmra.mxu0 %v3642_v49 }
 0x2f3   : > { %v3643_v35 = vmax.f32 %v3611_v13, 0.0  ;;  %v3574_v61 = vadd.f32 %v3527_v39, %v3268_v20  ;;  %v3614_v10 = vadd.f32 %v7521_v50, %v3575_v5 }
 0x2f4   : > { %v5914_v16 = vpop.f32.mrf.mxu1 }
 0x2f5   : > { %v3613_v37 = vadd.f32 %v7521_v50, %v3574_v61  ;;  %v3577_v12 = vadd.f32 %v5914_v16, %v3271_v31  ;;  %5986 = vmatprep.mubr.f32.mxu0 %v3643_v35  ;;  %v3646_v0 = vmax.f32 %v3614_v10, 0.0 }
 0x2f6   : > { %v3537_v56 = vpop.f32.mrf.mxu1  ;;  %5987 = vmatmul.mubr.f32.gmra.mxu0 %v3644_v15 }
 0x2f7   : > { %v3645_v41 = vmax.f32 %v3613_v37, 0.0  ;;  %v3576_v29 = vadd.f32 %v3537_v56, %v3270_v43  ;;  %v3616_v33 = vadd.f32 %v7521_v50, %v3577_v12 }
 0x2f9   : > { %v3615_v23 = vadd.f32 %v7521_v50, %v3576_v29  ;;  %5989 = vmatprep.mubr.f32.mxu0 %v3645_v41  ;;  %v3648_v52 = vmax.f32 %v3616_v33, 0.0 }
 0x2fa   : > { %5990 = vmatmul.mubr.f32.gmra.mxu0 %v3646_v0 }
 0x2fb   : > { %v3647_v48 = vmax.f32 %v3615_v23, 0.0 }
 0x2fd   : > { %5992 = vmatprep.mubr.f32.mxu0 %v3647_v48 }
 0x2fe   : > { %5993 = vmatmul.mubr.f32.gmra.mxu0 %v3648_v52 }
 0x2ff   : > { %5997 = vmatprep.mubr.msk.f32.mxu0 %vm408_vm1, %v4517_v26 }
 0x300   : > { %v6005_v55 = vpop.f32.mrf.mxu1 }
 0x301   : > { %v4131_v57 = vadd.f32 %v6005_v55, %v7706_v28 }
 0x302   : > { %5998 = vmatmul.mubr.msk.f32.vlgmr.msra.gmra.mxu0 %vm408_vm1, %v4518_v6  ;;  %v4125_v50 = vpop.f32.mrf.mxu1 }
 0x303   : > { %6000 = vmatprep.mubr.msk.f32.mxu0 %vm408_vm1, %v4519_v19  ;;  %v4126_v17 = vadd.f32 %v7706_v28, %v4125_v50 }
 0x306   : > { %6001 = vmatmul.mubr.msk.f32.gmra.mxu0 %vm408_vm1, %v4520_v34 }
 0x308   : > { %v6008_v25 = vpop.f32.mrf.mxu1 }
 0x309   : > { %v4141_v18 = vadd.f32 %v6008_v25, %v7706_v28 }
 0x30a   : > { %v4135_v7 = vpop.f32.mrf.mxu1 }
 0x30b   : > { %v4136_v58 = vadd.f32 %v7706_v28, %v4135_v7 }
 0x310   : > { %v6011_v38 = vpop.f32.mrf.mxu1 }
 0x311   : > { %v4151_v8 = vadd.f32 %v6011_v38, %v7706_v28 }
 0x312   : > { %v4145_v59 = vpop.f32.mrf.mxu1 }
 0x313   : > { %v4146_v61 = vadd.f32 %v7706_v28, %v4145_v59 }
 0x314   : > { %v6014_v40 = vpop.f32.mrf.mxu1 }
 0x315   : > { %v4161_v12 = vadd.f32 %v6014_v40, %v7706_v28 }
 0x316   : > { %v4155_v36 = vpop.f32.mrf.mxu1 }
 0x317   : > { %v4156_v33 = vadd.f32 %v7706_v28, %v4155_v36 }
 0x318   : > { %v6017_v32 = vpop.f32.mrf.mxu1 }
 0x319   : > { %v4171_v19 = vadd.f32 %v6017_v32, %v7706_v28 }
 0x31a   : > { %v7687_v60 = vpop.f32.mrf.mxu1 }
 0x31b   : > { %v4166_v7 = vadd.f32 %v7706_v28, %v7687_v60 }
 0x31f   : > { %v7689_v22 = vpop.f32.mrf.mxu1 }
 0x320   : > { %v4181_v32 = vadd.f32 %v7689_v22, %v7706_v28 }
 0x321   : > { %v7691_v3 = vpop.f32.mrf.mxu1 }
 0x322   : > { %v4176_v60 = vadd.f32 %v7706_v28, %v7691_v3 }
 0x323   : > { %v7693_v62 = vpop.f32.mrf.mxu1 }
 0x324   : > { %v4191_v22 = vadd.f32 %v7693_v62, %v7706_v28 }
 0x325   : > { %v7699_v21 = vpop.f32.mrf.mxu1 }
 0x326   : > { %v4186_v3 = vadd.f32 %v7706_v28, %v7699_v21 }
 0x327   : > { %v7711_v63 = vpop.f32.mrf.mxu1 }
 0x328   : > { %v4201_v62 = vadd.f32 %v7711_v63, %v7706_v28 }
 0x329   : > { %v7723_v51 = vpop.f32.mrf.mxu1 }
 0x32a   : > { %v4196_v21 = vadd.f32 %v7706_v28, %v7723_v51 }
 0x32b   : > { %v7729_v42 = vpop.f32.mrf.mxu1 }
 0x32c   : > { %v4211_v63 = vadd.f32 %v7729_v42, %v7706_v28 }
 0x32d   : > { %v7739_v10 = vpop.f32.mrf.mxu1 }
 0x32e   : > { %v4206_v51 = vadd.f32 %v7706_v28, %v7739_v10 }
 0x330   : > { %v7747_v48 = vpop.f32.mrf.mxu1 }
 0x331   : > { %v4221_v42 = vadd.f32 %v7747_v48, %v7706_v28 }
 0x332   : > { %v7756_v59 = vpop.f32.mrf.mxu1 }
 0x333   : > { %v4216_v10 = vadd.f32 %v7706_v28, %v7756_v59 }
 0x382   : > { %v7695_v11 = vpop.f32.mrf.mxu0 }
 0x384   : > { %v7697_v54 = vpop.f32.mrf.mxu0 }
 0x386   : > { %v7701_v2 = vpop.f32.mrf.mxu0 }
 0x388   : > { %v7708_v46 = vpop.f32.mrf.mxu0 }
 0x38a   : > { %v5955_v27 = vpop.f32.mrf.mxu0 }
 0x38b   : > { %v3764_v24 = vadd.f32 %v5955_v27, %v7717_v9 }
 0x38c   : > { %v3758_v44 = vpop.f32.mrf.mxu0 }
 0x38d   : > { %v4269_v53 = vadd.f32 %v4131_v57, %v3764_v24  ;;  %v3759_v30 = vadd.f32 %v7717_v9, %v3758_v44 }
 0x38e   : > { %v5958_v1 = vpop.f32.mrf.mxu0 }
 0x38f   : > { %v4301_v47 = vmax.f32 %v4269_v53, 0.0  ;;  %v4268_v49 = vadd.f32 %v4126_v17, %v3759_v30  ;;  %v3774_v45 = vadd.f32 %v5958_v1, %v7717_v9  ;;  %v6035_v30 = vpop.f32.mrf.mxu1 }
 0x390   : > { %v3768_v20 = vpop.f32.mrf.mxu0  ;;  %v4231_v48 = vadd.f32 %v6035_v30, %v7706_v28 }
 0x391   : > { %4333 = vst [vmem:[%s7731_s16 + $0x28] sm:$0xff] %v4301_v47  ;;  %v4300_v4 = vmax.f32 %v4268_v49, 0.0  ;;  %v4271_v13 = vadd.f32 %v4141_v18, %v3774_v45  ;;  %v3769_v5 = vadd.f32 %v7717_v9, %v3768_v20 }
 0x392   : > { %v5961_v39 = vpop.f32.mrf.mxu0 }
 0x393   : > { %4332 = vst [vmem:[%s7731_s16 + $0x20] sm:$0xff] %v4300_v4  ;;  %v4303_v14 = vmax.f32 %v4271_v13, 0.0  ;;  %v4270_v31 = vadd.f32 %v4136_v58, %v3769_v5  ;;  %v3784_v35 = vadd.f32 %v5961_v39, %v7717_v9  ;;  %v4225_v13 = vpop.f32.mrf.mxu1 }
 0x394   : > { %v3778_v15 = vpop.f32.mrf.mxu0 }
 0x395   : > { %4335 = vst [vmem:[%s7731_s16 + $0x38] sm:$0xff] %v4303_v14  ;;  %v4302_v16 = vmax.f32 %v4270_v31, 0.0  ;;  %v4273_v43 = vadd.f32 %v4151_v8, %v3784_v35  ;;  %v3779_v37 = vadd.f32 %v7717_v9, %v3778_v15 }
 0x396   : > { %v5964_v56 = vpop.f32.mrf.mxu0 }
 0x397   : > { %4334 = vst [vmem:[%s7731_s16 + $0x30] sm:$0xff] %v4302_v16  ;;  %v4305_v41 = vmax.f32 %v4273_v43, 0.0  ;;  %v4272_v29 = vadd.f32 %v4146_v61, %v3779_v37  ;;  %v3794_v0 = vadd.f32 %v5964_v56, %v7717_v9  ;;  %v6038_v16 = vpop.f32.mrf.mxu1 }
 0x398   : > { %v3788_v23 = vpop.f32.mrf.mxu0 }
 0x399   : > { %4337 = vst [vmem:[%s7731_s16 + $0x48] sm:$0xff] %v4305_v41  ;;  %v4304_v52 = vmax.f32 %v4272_v29, 0.0  ;;  %v4275_v26 = vadd.f32 %v4161_v12, %v3794_v0  ;;  %v3789_v6 = vadd.f32 %v7717_v9, %v3788_v23  ;;  %v4235_v23 = vpop.f32.mrf.mxu1 }
 0x39a   : > { %v5967_v34 = vpop.f32.mrf.mxu0 }
 0x39b   : > { %4336 = vst [vmem:[%s7731_s16 + $0x40] sm:$0xff] %v4304_v52  ;;  %v4307_v55 = vmax.f32 %v4275_v26, 0.0  ;;  %v4274_v50 = vadd.f32 %v4156_v33, %v3789_v6  ;;  %v3804_v25 = vadd.f32 %v5967_v34, %v7717_v9 }
 0x39c   : > { %v3798_v38 = vpop.f32.mrf.mxu0 }
 0x39d   : > { %4339 = vst [vmem:[%s7731_s16 + $0x58] sm:$0xff] %v4307_v55  ;;  %v4306_v40 = vmax.f32 %v4274_v50, 0.0  ;;  %v4277_v36 = vadd.f32 %v4171_v19, %v3804_v25  ;;  %v3799_v57 = vadd.f32 %v7717_v9, %v3798_v38 }
 0x39e   : > { %v5970_v27 = vpop.f32.mrf.mxu0 }
 0x39f   : > { %4338 = vst [vmem:[%s7731_s16 + $0x50] sm:$0xff] %v4306_v40  ;;  %v4309_v24 = vmax.f32 %v4277_v36, 0.0  ;;  %v4276_v17 = vadd.f32 %v4166_v7, %v3799_v57  ;;  %v3814_v44 = vadd.f32 %v5970_v27, %v7717_v9  ;;  %v6041_v7 = vpop.f32.mrf.mxu1 }
 0x3a0   : > { %v3808_v53 = vpop.f32.mrf.mxu0 }
 0x3a1   : > { %4341 = vst [vmem:[%s7731_s16 + $0x68] sm:$0xff] %v4309_v24  ;;  %v4308_v18 = vmax.f32 %v4276_v17, 0.0  ;;  %v4279_v1 = vadd.f32 %v4181_v32, %v3814_v44  ;;  %v3809_v47 = vadd.f32 %v7717_v9, %v3808_v53  ;;  %v4226_v17 = vadd.f32 %v7706_v28, %v4225_v13  ;;  %v4245_v44 = vpop.f32.mrf.mxu1 }
 0x3a2   : > { %v5973_v49 = vpop.f32.mrf.mxu0 }
 0x3a3   : > { %4340 = vst [vmem:[%s7731_s16 + $0x60] sm:$0xff] %v4308_v18  ;;  %v4311_v45 = vmax.f32 %v4279_v1, 0.0  ;;  %v4278_v58 = vadd.f32 %v4176_v60, %v3809_v47  ;;  %v3824_v20 = vadd.f32 %v5973_v49, %v7717_v9  ;;  %v4241_v1 = vadd.f32 %v6038_v16, %v7706_v28 }
 0x3a4   : > { %v3818_v4 = vpop.f32.mrf.mxu0 }
 0x3a5   : > { %4343 = vst [vmem:[%s7731_s16 + $0x78] sm:$0xff] %v4311_v45  ;;  %v4310_v5 = vmax.f32 %v4278_v58, 0.0  ;;  %v4281_v8 = vadd.f32 %v4191_v22, %v3824_v20  ;;  %v3819_v39 = vadd.f32 %v7717_v9, %v3818_v4  ;;  %v4236_v45 = vadd.f32 %v7706_v28, %v4235_v23  ;;  %v6044_v20 = vpop.f32.mrf.mxu1 }
 0x3a6   : > { %v5976_v14 = vpop.f32.mrf.mxu0 }
 0x3a7   : > { %4342 = vst [vmem:[%s7731_s16 + $0x70] sm:$0xff] %v4310_v5  ;;  %v4313_v31 = vmax.f32 %v4281_v8, 0.0  ;;  %v4280_v35 = vadd.f32 %v4186_v3, %v3819_v39  ;;  %v3834_v61 = vadd.f32 %v5976_v14, %v7717_v9  ;;  %v4251_v5 = vadd.f32 %v6041_v7, %v7706_v28 }
 0x3a8   : > { %v3828_v15 = vpop.f32.mrf.mxu0 }
 0x3a9   : > { %4345 = vst [vmem:[%s7731_s16 + $0x88] sm:$0xff] %v4313_v31  ;;  %v4312_v43 = vmax.f32 %v4280_v35, 0.0  ;;  %v4283_v37 = vadd.f32 %v4201_v62, %v3834_v61  ;;  %v3829_v12 = vadd.f32 %v7717_v9, %v3828_v15  ;;  %v4246_v31 = vadd.f32 %v7706_v28, %v4245_v44  ;;  %v4255_v61 = vpop.f32.mrf.mxu1 }
 0x3aa   : > { %v5979_v56 = vpop.f32.mrf.mxu0 }
 0x3ab   : > { %4344 = vst [vmem:[%s7731_s16 + $0x80] sm:$0xff] %v4312_v43  ;;  %v4315_v41 = vmax.f32 %v4283_v37, 0.0  ;;  %v4282_v29 = vadd.f32 %v4196_v21, %v3829_v12  ;;  %v3844_v0 = vadd.f32 %v5979_v56, %v7717_v9  ;;  %v4261_v43 = vadd.f32 %v6044_v20, %v7706_v28 }
 0x3ac   : > { %v3838_v33 = vpop.f32.mrf.mxu0 }
 0x3ad   : > { %4347 = vst [vmem:[%s7731_s16 + $0x98] sm:$0xff] %v4315_v41  ;;  %v4314_v52 = vmax.f32 %v4282_v29, 0.0  ;;  %v4285_v26 = vadd.f32 %v4211_v63, %v3844_v0  ;;  %v3839_v6 = vadd.f32 %v7717_v9, %v3838_v33  ;;  %v4256_v41 = vadd.f32 %v7706_v28, %v4255_v61 }
 0x3ae   : > { %v5982_v19 = vpop.f32.mrf.mxu0 }
 0x3af   : > { %4346 = vst [vmem:[%s7731_s16 + $0x90] sm:$0xff] %v4314_v52  ;;  %v4317_v34 = vmax.f32 %v4285_v26, 0.0  ;;  %v4284_v55 = vadd.f32 %v4206_v51, %v3839_v6  ;;  %v3854_v50 = vadd.f32 %v5982_v19, %v7717_v9  ;;  %v3744_v52 = vadd.f32 %v7695_v11, %v7717_v9 }
 0x3b0   : > { %v3848_v25 = vpop.f32.mrf.mxu0  ;;  %v3754_v11 = vadd.f32 %v7701_v2, %v7717_v9 }
 0x3b1   : > { %4349 = vst [vmem:[%s7731_s16 + $0xa8] sm:$0xff] %v4317_v34  ;;  %v4316_v38 = vmax.f32 %v4284_v55, 0.0  ;;  %v4287_v40 = vadd.f32 %v4221_v42, %v3854_v50  ;;  %v3849_v36 = vadd.f32 %v7717_v9, %v3848_v25  ;;  %v3739_v34 = vadd.f32 %v7717_v9, %v7697_v54 }
 0x3b2   : > { %v5985_v57 = vpop.f32.mrf.mxu0 }
 0x3b3   : > { %4348 = vst [vmem:[%s7731_s16 + $0xa0] sm:$0xff] %v4316_v38  ;;  %v4319_v32 = vmax.f32 %v4287_v40, 0.0  ;;  %v4286_v27 = vadd.f32 %v4216_v10, %v3849_v36  ;;  %v3864_v24 = vadd.f32 %v5985_v57, %v7717_v9  ;;  %v3749_v36 = vadd.f32 %v7717_v9, %v7708_v46 }
 0x3b4   : > { %v3858_v59 = vpop.f32.mrf.mxu0 }
 0x3b5   : > { %4351 = vst [vmem:[%s7731_s16 + $0xb8] sm:$0xff] %v4319_v32  ;;  %v4318_v60 = vmax.f32 %v4286_v27, 0.0  ;;  %v4289_v53 = vadd.f32 %v4231_v48, %v3864_v24  ;;  %v3859_v18 = vadd.f32 %v7717_v9, %v3858_v59 }
 0x3b6   : > { %v5988_v30 = vpop.f32.mrf.mxu0 }
 0x3b7   : > { %4350 = vst [vmem:[%s7731_s16 + $0xb0] sm:$0xff] %v4318_v60  ;;  %v4321_v47 = vmax.f32 %v4289_v53, 0.0  ;;  %v4288_v22 = vadd.f32 %v4226_v17, %v3859_v18  ;;  %v3874_v49 = vadd.f32 %v5988_v30, %v7717_v9 }
 0x3b8   : > { %v3868_v58 = vpop.f32.mrf.mxu0 }
 0x3b9   : > { %4353 = vst [vmem:[%s7731_s16 + $0xc8] sm:$0xff] %v4321_v47  ;;  %v4320_v3 = vmax.f32 %v4288_v22, 0.0  ;;  %v4291_v4 = vadd.f32 %v4241_v1, %v3874_v49  ;;  %v3869_v13 = vadd.f32 %v7717_v9, %v3868_v58 }
 0x3ba   : > { %v5991_v8 = vpop.f32.mrf.mxu0 }
 0x3bb   : > { %4352 = vst [vmem:[%s7731_s16 + $0xc0] sm:$0xff] %v4320_v3  ;;  %v4323_v39 = vmax.f32 %v4291_v4, 0.0  ;;  %v4290_v62 = vadd.f32 %v4236_v45, %v3869_v13  ;;  %v3884_v14 = vadd.f32 %v5991_v8, %v7717_v9 }
 0x3bc   : > { %v3878_v35 = vpop.f32.mrf.mxu0 }
 0x3bd   : > { %4355 = vst [vmem:[%s7731_s16 + $0xd8] sm:$0xff] %v4323_v39  ;;  %v4322_v21 = vmax.f32 %v4290_v62, 0.0  ;;  %v4293_v15 = vadd.f32 %v4251_v5, %v3884_v14  ;;  %v3879_v16 = vadd.f32 %v7717_v9, %v3878_v35 }
 0x3be   : > { %v5994_v37 = vpop.f32.mrf.mxu0 }
 0x3bf   : > { %4354 = vst [vmem:[%s7731_s16 + $0xd0] sm:$0xff] %v4322_v21  ;;  %v4325_v12 = vmax.f32 %v4293_v15, 0.0  ;;  %v4292_v63 = vadd.f32 %v4246_v31, %v3879_v16  ;;  %v3894_v56 = vadd.f32 %v5994_v37, %v7717_v9 }
 0x3c0   : > { %v3888_v29 = vpop.f32.mrf.mxu0 }
 0x3c1   : > { %4357 = vst [vmem:[%s7731_s16 + $0xe8] sm:$0xff] %v4325_v12  ;;  %v4324_v0 = vmax.f32 %v4292_v63, 0.0  ;;  %v4295_v51 = vadd.f32 %v4261_v43, %v3894_v56  ;;  %v3889_v33 = vadd.f32 %v7717_v9, %v3888_v29 }
 0x3c2   : > { %v5999_v23 = vpop.f32.mrf.mxu0 }
 0x3c3   : > { %4356 = vst [vmem:[%s7731_s16 + $0xe0] sm:$0xff] %v4324_v0  ;;  %v4327_v26 = vmax.f32 %v4295_v51, 0.0  ;;  %v4294_v6 = vadd.f32 %v4256_v41, %v3889_v33  ;;  %v4111_v42 = vadd.f32 %v5999_v23, %v7706_v28 }
 0x3c4   : > { %v4105_v19 = vpop.f32.mrf.mxu0 }
 0x3c5   : > { %4359 = vst [vmem:[%s7731_s16 + $0xf8] sm:$0xff] %v4327_v26  ;;  %v4326_v55 = vmax.f32 %v4294_v6, 0.0  ;;  %v4265_v50 = vadd.f32 %v4111_v42, %v3744_v52  ;;  %v4106_v10 = vadd.f32 %v7706_v28, %v4105_v19 }
 0x3c6   : > { %v6002_v25 = vpop.f32.mrf.mxu0 }
 0x3c7   : > { %4358 = vst [vmem:[%s7731_s16 + $0xf0] sm:$0xff] %v4326_v55  ;;  %v4297_v7 = vmax.f32 %v4265_v50, 0.0  ;;  %v4264_v38 = vadd.f32 %v4106_v10, %v3739_v34  ;;  %v4121_v40 = vadd.f32 %v6002_v25, %v7706_v28 }
 0x3c8   : > { %v4115_v54 = vpop.f32.mrf.mxu0 }
 0x3c9   : > { %4329 = vst [vmem:[%s7731_s16 + $0x8] sm:$0xff] %v4297_v7  ;;  %v4296_v48 = vmax.f32 %v4264_v38, 0.0  ;;  %v4267_v57 = vadd.f32 %v4121_v40, %v3754_v11  ;;  %v4116_v32 = vadd.f32 %v7706_v28, %v4115_v54 }
 0x3cb   : > { %4328 = vst [vmem:[%s7731_s16] sm:$0xff] %v4296_v48  ;;  %v4299_v2 = vmax.f32 %v4267_v57, 0.0  ;;  %v4266_v27 = vadd.f32 %v4116_v32, %v3749_v36 }
 0x3cd   : > { %4331 = vst [vmem:[%s7731_s16 + $0x18] sm:$0xff] %v4299_v2  ;;  %v4298_v46 = vmax.f32 %v4266_v27, 0.0 }
 0x3cf   : > { %4330 = vst [vmem:[%s7731_s16 + $0x10] sm:$0xff] %v4298_v46 }
 0x3d0   : > { %6159 = shalt.err (!%p6156_p3)
}
 0x3d1   : > { %s6160_s28 = scalar_lea.hbm %s7846_s26, 4096  ;;  %s6164_s25 = scalar_lea.hbm %s7908_s9, 8192 }
 0x3d2   : > { %p6161_p5 = scmp.ne.s32.totalorder %s7846_s26, %s6160_s28  ;;  %p6165_p9 = scmp.lt.s32.totalorder %s7846_s26, %s7908_s9 }
 0x3d3   : > { %p6166_p12 = scmp.lt.s32.totalorder %s6164_s25, %s6160_s28 }
 0x3d4   : > { %p6162_p6 = pnand %p6161_p5, %p6325_p4 }
 0x3d5   : > { %p6167_p10 = por %p6166_p12, %p6165_p9 }
 0x3d6   : > { %p6163_p7 = pneg %p6162_p6 }
 0x3d8   : > { %p6168_p11 = pnand %p6167_p10, %p6163_p7 }
 0x3da   : > { %6171 = shalt.err (!%p6168_p11)
}
 0x3db   : > { %s6233_s12 = smov 128   ;;  %s6234_s29 = smov 8  }
 0x3dc   : > { %6052 = dma.vmem_to_hbm [thread:$0]  (%p6325_p4), %s7848_s20, 4096, %s7846_s26, %s7854_s23, %s6233_s12, %s6233_s12, %s6234_s29  }
 0x3dd PF: > { %p6064_p13 = scmp.ge.s32.totalorder %s6226_s14, 2  ;;  %s4392_s15 = sand.u32 1, %s6206_s30  }
 0x3de   : > { %s4393_s28 = scalar_lea.sflag [#allocation5], %s4392_s15 }
 0x3df   : > { %p6059_p0 = pnand %p6064_p13, %p6332_p8 }
 0x3e1   : > { %p6060_p1 = pneg %p6059_p0 }
 0x3e3   : > { %6201 = dma.done.wait (%p6060_p1), %s4393_s28, 4096  }
 0x3e4   : > { %6203 = vsyncadd (%p6060_p1), %s4393_s28, 4294963200  ;;  %s23_s14 = sadd.s32 1, %s6226_s14   ;;  %s8029_s30 = smov %s6210_s10 }
 0x3e5   : > { %p20_p2 = scmp.ge.s32.totalorder %s23_s14, 4   ;;  %s8030_s10 = smov %s6214_s11 }
 0x3e6   : > { %s8031_s11 = smov %s6338_s22  ;;  %s8032_s12 = smov %s6222_s13 }
 0x3e7   : > { %s8033_s13 = smov %s8035_s17  ;;  %22 = sbr.rel (!%p20_p2) target bundleno = 5 (0x5), region = 113 }
 0x3ec   :  { %4398 = vsyncpa [#allocation4], 1 }
 0x3ed   :  { %4400 = vsyncpa [#allocation4 + $0x1], 1 }
 0x3ee   :  { %4401 = vsyncpa [#allocation5], 1 }
 0x3ef   :  { %4403 = vsyncpa [#allocation5 + $0x1], 1 }

</bundles_post_ra>
